<compile_context>
chip_gen: v5e
topology: v5e:2x2
jax: 0.10.0
libtpu: 0.0.40
codegen_flags: <defaults>
</compile_context>

<pallas_src>
import math

import jax
import jax.numpy as jnp
from jax.experimental import pallas as pl
from jax.experimental.pallas import tpu as pltpu


def _round_up(x, m):
    return (x + m - 1) // m * m


# ----------------------------- Pallas kernel ------------------------------ #

def _gru_chunk_kernel(maxlen_ref, len_ref, gi_ref, whh_ref, bhh_ref, out_ref):
    """One chunk of Tc GRU timesteps per grid iteration.

    out_ref ([Bp, Hp], f32) is the resident hidden-state carry.
    gi_ref  ([Tc, Bp, 3*Hp], f32) holds the precomputed x@W_ih^T + b_ih.
    whh_ref ([Hp, 3*Hp], bf16), bhh_ref ([1, 3*Hp], f32), len_ref ([Bp,1], i32).
    maxlen_ref ((1,), i32 in SMEM) gates fully-dead chunks.
    """
    c = pl.program_id(0)
    Tc = gi_ref.shape[0]
    Hp = out_ref.shape[-1]

    @pl.when(c == 0)
    def _():
        out_ref[...] = jnp.zeros_like(out_ref)

    base_t = c * Tc
    max_len = maxlen_ref[0]

    @pl.when(base_t < max_len)
    def _():
        lens = len_ref[...]            # [Bp, 1] int32
        whh = whh_ref[...]             # [Hp, 3*Hp] bf16
        bhh = bhh_ref[...]             # [1, 3*Hp] f32

        def step(i, h):                # h: [Bp, Hp] f32
            gi_t = gi_ref[i]           # [Bp, 3*Hp] f32 (precomputed)
            gh = jnp.dot(h.astype(jnp.bfloat16), whh,
                         preferred_element_type=jnp.float32) + bhh
            i_r, i_z, i_n = (gi_t[:, 0:Hp], gi_t[:, Hp:2 * Hp],
                             gi_t[:, 2 * Hp:3 * Hp])
            h_r, h_z, h_n = (gh[:, 0:Hp], gh[:, Hp:2 * Hp],
                             gh[:, 2 * Hp:3 * Hp])
            r = jax.nn.sigmoid(i_r + h_r)
            z = jax.nn.sigmoid(i_z + h_z)
            n = jnp.tanh(i_n + r * h_n)
            h_new = (1.0 - z) * n + z * h
            # pack_padded_sequence semantics: freeze h for t >= length[b].
            valid = (base_t + i) < lens            # [Bp, 1] bool
            return jnp.where(valid, h_new, h)

        out_ref[...] = jax.lax.fori_loop(0, Tc, step, out_ref[...],
                                         unroll=True)


def gru_last_hidden(x, lengths, w_ih, w_hh, b_ih, b_hh, *, time_chunk=8):
    """GRU forward returning h at the last valid step per sequence.

    x:        [B, T, D_in] float32 (batch_first, like the PyTorch module)
    lengths:  [B] int32
    w_ih:     [3H, D_in], w_hh: [3H, H], b_ih/b_hh: [3H]  (gate order r,z,n)
    returns:  [B, H] float32
    """
    B, T, D = x.shape
    H = w_hh.shape[1]
    Bp = _round_up(B, 8)
    Hp = _round_up(H, 128)
    Tc = max(1, int(time_chunk))
    Tp = _round_up(max(T, 1), Tc)

    # --- pack gate weights into lane-aligned Hp-sized slots, order r|z|n ---
    def pack_w(w, rows):                  # w: [3H, rows] -> [rows, 3*Hp]
        out = jnp.zeros((rows, 3 * Hp), jnp.float32)
        for g in range(3):
            out = out.at[:, g * Hp:g * Hp + H].set(
                w[g * H:(g + 1) * H, :].T.astype(jnp.float32))
        return out

    def pack_b(b):                        # b: [3H] -> [1, 3*Hp]
        out = jnp.zeros((1, 3 * Hp), jnp.float32)
        for g in range(3):
            out = out.at[0, g * Hp:g * Hp + H].set(
                b[g * H:(g + 1) * H].astype(jnp.float32))
        return out

    wih_p = pack_w(w_ih, D)                               # [D, 3*Hp] f32
    bih_p = pack_b(b_ih)                                  # [1, 3*Hp] f32
    whh_p = jnp.zeros((Hp, 3 * Hp), jnp.float32)
    whh_p = whh_p.at[:H, :].set(pack_w(w_hh, H)).astype(jnp.bfloat16)
    bhh_p = pack_b(b_hh)                                  # [1, 3*Hp] f32

    # --- hoisted input projection: one big batched matmul outside the kernel
    x_tm = jnp.transpose(x, (1, 0, 2)).astype(jnp.float32)       # [T, B, D]
    xp = jnp.zeros((Tp, Bp, D), jnp.float32).at[:T, :B, :].set(x_tm)
    gi = (xp.reshape(Tp * Bp, D) @ wih_p).reshape(Tp, Bp, 3 * Hp) + bih_p

    lens_p = jnp.zeros((Bp, 1), jnp.int32)
    lens_p = lens_p.at[:B, 0].set(lengths.astype(jnp.int32))
    max_len = jnp.max(lens_p).reshape((1,)).astype(jnp.int32)

    out_pad = pl.pallas_call(
        _gru_chunk_kernel,
        out_shape=jax.ShapeDtypeStruct((Bp, Hp), jnp.float32),
        grid_spec=pltpu.PrefetchScalarGridSpec(
            num_scalar_prefetch=1,                 # max_len -> SMEM
            grid=(Tp // Tc,),
            in_specs=[
                pl.BlockSpec((Bp, 1), lambda c, ml: (0, 0)),          # lengths
                pl.BlockSpec((Tc, Bp, 3 * Hp), lambda c, ml: (c, 0, 0)),  # gi
                pl.BlockSpec((Hp, 3 * Hp), lambda c, ml: (0, 0)),     # W_hh^T
                pl.BlockSpec((1, 3 * Hp), lambda c, ml: (0, 0)),      # b_hh
            ],
            out_specs=pl.BlockSpec((Bp, Hp), lambda c, ml: (0, 0)),
        ),
        compiler_params=pltpu.CompilerParams(
            dimension_semantics=("arbitrary",)),   # strict time recurrence
    )(max_len, lens_p, gi, whh_p, bhh_p)

    return out_pad[:B, :H]


# --------------------------- module equivalent ----------------------------- #

class LocalModelForMUSTARD:
    """JAX/Pallas port of LocalModelForMUSTARD (GRU backbone per client)."""

    _CONFIG = {0: (371, 700),   # visual
               1: (81, 160),    # audio
               2: (300, 600)}   # text

    def __init__(self, client_number, key):
        indim, hiddim = self._CONFIG.get(client_number, self._CONFIG[2])
        self.indim, self.hiddim = indim, hiddim
        k = 1.0 / math.sqrt(hiddim)
        k0, k1, k2, k3 = jax.random.split(key, 4)
        self.w_ih = jax.random.uniform(k0, (3 * hiddim, indim), jnp.float32, -k, k)
        self.w_hh = jax.random.uniform(k1, (3 * hiddim, hiddim), jnp.float32, -k, k)
        self.b_ih = jax.random.uniform(k2, (3 * hiddim,), jnp.float32, -k, k)
        self.b_hh = jax.random.uniform(k3, (3 * hiddim,), jnp.float32, -k, k)

    def __call__(self, x):
        # x = (sequence [B, T, indim], lengths [B]) -- has_padding=True path.
        seq, lengths = x
        # TODO(synk): nn.Dropout(p=0.1) in the GRU wrapper is training-only;
        # identity here (inference semantics).
        return gru_last_hidden(seq, lengths,
                               self.w_ih, self.w_hh, self.b_ih, self.b_hh)


# ------------------------------- reference --------------------------------- #

def _gru_reference(x, lengths, w_ih, w_hh, b_ih, b_hh):
    B, T, _ = x.shape
    H = w_hh.shape[1]

    def step(h, inp):
        x_t, t = inp
        gi = x_t @ w_ih.T + b_ih
        gh = h @ w_hh.T + b_hh
        i_r, i_z, i_n = jnp.split(gi, 3, axis=-1)
        h_r, h_z, h_n = jnp.split(gh, 3, axis=-1)
        r = jax.nn.sigmoid(i_r + h_r)
        z = jax.nn.sigmoid(i_z + h_z)
        n = jnp.tanh(i_n + r * h_n)
        h_new = (1.0 - z) * n + z * h
        mask = (t < lengths)[:, None]
        return jnp.where(mask, h_new, h), None

    h0 = jnp.zeros((B, H), jnp.float32)
    hT, _ = jax.lax.scan(step, h0,
                         (jnp.transpose(x, (1, 0, 2)), jnp.arange(T)))
    return hT


if __name__ == "__main__":
    key = jax.random.PRNGKey(0)
    k_model, k_x = jax.random.split(key)

    client_number = 1          # audio branch: GRU(81 -> 160), smallest dims
    model = LocalModelForMUSTARD(client_number, k_model)

    B, T = 2, 8
    x_seq = jax.random.normal(k_x, (B, T, model.indim), jnp.float32)
    lengths = jnp.array([8, 5], jnp.int32)

    out = model((x_seq, lengths))
    out = jax.block_until_ready(out)
    assert out.shape == (B, model.hiddim), out.shape

    ref = jax.block_until_ready(
        _gru_reference(x_seq, lengths,
                       model.w_ih, model.w_hh, model.b_ih, model.b_hh))
    assert jnp.allclose(out, ref, rtol=1e-2, atol=1e-2), \
        float(jnp.max(jnp.abs(out - ref)))

    print("KERNEL_OK")
</pallas_src>

<mosaic_0001>
module attributes {stable_mosaic.version = 11 : i64} {
  func.func @_gru_chunk_kernel(%arg0: i32, %arg1: memref<1xi32, #tpu.memory_space<smem>>, %arg2: memref<8x1xi32, #tpu.memory_space<vmem>>, %arg3: memref<8x8x768xf32, #tpu.memory_space<vmem>>, %arg4: memref<256x768xbf16, #tpu.memory_space<vmem>>, %arg5: memref<1x768xf32, #tpu.memory_space<vmem>>, %arg6: memref<8x256xf32, #tpu.memory_space<vmem>>) attributes {dimension_semantics = [#tpu.dimension_semantics<arbitrary>], iteration_bounds = array<i64: 1>, scalar_prefetch = 1 : i64, scratch_operands = 0 : i64, tpu.core_type = #tpu.core_type<tc>, window_params = [{pipeline_mode = #tpu.pipeline_mode<synchronous>, transform_indices = @transform_0, window_bounds = array<i64: 8, 1>}, {transform_indices = @transform_1, window_bounds = array<i64: 8, 8, 768>}, {pipeline_mode = #tpu.pipeline_mode<synchronous>, transform_indices = @transform_2, window_bounds = array<i64: 256, 768>}, {pipeline_mode = #tpu.pipeline_mode<synchronous>, transform_indices = @transform_3, window_bounds = array<i64: 1, 768>}, {pipeline_mode = #tpu.pipeline_mode<synchronous>, transform_indices = @transform_4, window_bounds = array<i64: 8, 256>}]} {
    %c0_i32 = arith.constant 0 : i32
    %0 = arith.cmpi eq, %arg0, %c0_i32 : i32
    %1 = arith.extui %0 : i1 to i32
    %c0_i32_0 = arith.constant 0 : i32
    %2 = arith.cmpi ne, %1, %c0_i32_0 : i32
    scf.if %2 {
      %cst = arith.constant 0.000000e+00 : f32
      %8 = vector.broadcast %cst : f32 to vector<8x256xf32>
      %c0_2 = arith.constant 0 : index
      %c0_3 = arith.constant 0 : index
      %9 = vector.load %arg6[%c0_2, %c0_3] : memref<8x256xf32, #tpu.memory_space<vmem>>, vector<8x256xf32>
      tpu.vector_store %arg6[%c0_2, %c0_3], %8 {strides = array<i32>} : memref<8x256xf32, #tpu.memory_space<vmem>>, vector<8x256xf32>,
    } else {
    }
    %c8_i32 = arith.constant 8 : i32
    %3 = arith.muli %arg0, %c8_i32 : i32
    %c0 = arith.constant 0 : index
    %4 = memref.load %arg1[%c0] : memref<1xi32, #tpu.memory_space<smem>>
    %5 = arith.cmpi slt, %3, %4 : i32
    %6 = arith.extui %5 : i1 to i32
    %c0_i32_1 = arith.constant 0 : i32
    %7 = arith.cmpi ne, %6, %c0_i32_1 : i32
    scf.if %7 {
      %c0_2 = arith.constant 0 : index
      %c0_3 = arith.constant 0 : index
      %8 = vector.load %arg2[%c0_2, %c0_3] : memref<8x1xi32, #tpu.memory_space<vmem>>, vector<8x1xi32>
      %c0_4 = arith.constant 0 : index
      %c0_5 = arith.constant 0 : index
      %9 = vector.load %arg4[%c0_4, %c0_5] : memref<256x768xbf16, #tpu.memory_space<vmem>>, vector<256x768xbf16>
      %c0_6 = arith.constant 0 : index
      %c0_7 = arith.constant 0 : index
      %10 = vector.load %arg5[%c0_6, %c0_7] : memref<1x768xf32, #tpu.memory_space<vmem>>, vector<1x768xf32>
      %c0_8 = arith.constant 0 : index
      %c0_9 = arith.constant 0 : index
      %11 = vector.load %arg6[%c0_8, %c0_9] : memref<8x256xf32, #tpu.memory_space<vmem>>, vector<8x256xf32>
      %c0_i32_10 = arith.constant 0 : i32
      %12 = arith.index_cast %c0_i32_10 : i32 to index
      %c0_11 = arith.constant 0 : index
      %c0_12 = arith.constant 0 : index
      %13 = vector.load %arg3[%12, %c0_11, %c0_12] : memref<8x8x768xf32, #tpu.memory_space<vmem>>, vector<1x8x768xf32>
      %14 = vector.shape_cast %13 : vector<1x8x768xf32> to vector<8x768xf32>
      %15 = arith.truncf %11 : vector<8x256xf32> to vector<8x256xbf16>
      %cst = arith.constant dense<0.000000e+00> : vector<8x768xf32>
      %16 = tpu.matmul %15, %9, %cst {dimension_numbers = #tpu.dot_dimension_numbers<[1], [0], [0], [1], [0, 0, 1, 1], [], []>} : vector<8x256xbf16>, vector<256x768xbf16>, vector<8x768xf32> -> vector<8x768xf32>
      %17 = vector.broadcast %10 : vector<1x768xf32> to vector<8x768xf32>
      %18 = arith.addf %16, %17 : vector<8x768xf32>
      %19 = vector.extract_strided_slice %14 {offsets = [0, 0], sizes = [8, 256], strides = [1, 1]} : vector<8x768xf32> to vector<8x256xf32>
      %20 = vector.extract_strided_slice %14 {offsets = [0, 256], sizes = [8, 256], strides = [1, 1]} : vector<8x768xf32> to vector<8x256xf32>
      %21 = vector.extract_strided_slice %14 {offsets = [0, 512], sizes = [8, 256], strides = [1, 1]} : vector<8x768xf32> to vector<8x256xf32>
      %22 = vector.extract_strided_slice %18 {offsets = [0, 0], sizes = [8, 256], strides = [1, 1]} : vector<8x768xf32> to vector<8x256xf32>
      %23 = vector.extract_strided_slice %18 {offsets = [0, 256], sizes = [8, 256], strides = [1, 1]} : vector<8x768xf32> to vector<8x256xf32>
      %24 = vector.extract_strided_slice %18 {offsets = [0, 512], sizes = [8, 256], strides = [1, 1]} : vector<8x768xf32> to vector<8x256xf32>
      %25 = arith.addf %19, %22 : vector<8x256xf32>
      %26 = arith.negf %25 : vector<8x256xf32>
      %27 = math.exp %26 : vector<8x256xf32>
      %cst_13 = arith.constant 1.000000e+00 : f32
      %28 = vector.broadcast %cst_13 : f32 to vector<8x256xf32>
      %29 = arith.addf %28, %27 : vector<8x256xf32>
      %30 = arith.divf %28, %29 : vector<8x256xf32>
      %31 = arith.addf %20, %23 : vector<8x256xf32>
      %32 = arith.negf %31 : vector<8x256xf32>
      %33 = math.exp %32 : vector<8x256xf32>
      %cst_14 = arith.constant 1.000000e+00 : f32
      %34 = vector.broadcast %cst_14 : f32 to vector<8x256xf32>
      %35 = arith.addf %34, %33 : vector<8x256xf32>
      %36 = arith.divf %34, %35 : vector<8x256xf32>
      %37 = arith.mulf %30, %24 : vector<8x256xf32>
      %38 = arith.addf %21, %37 : vector<8x256xf32>
      %39 = math.tanh %38 : vector<8x256xf32>
      %cst_15 = arith.constant 1.000000e+00 : f32
      %40 = vector.broadcast %cst_15 : f32 to vector<8x256xf32>
      %41 = arith.subf %40, %36 : vector<8x256xf32>
      %42 = arith.mulf %41, %39 : vector<8x256xf32>
      %43 = arith.mulf %36, %11 : vector<8x256xf32>
      %44 = arith.addf %42, %43 : vector<8x256xf32>
      %45 = arith.addi %3, %c0_i32_10 : i32
      %46 = vector.broadcast %45 : i32 to vector<8x1xi32>
      %47 = arith.cmpi slt, %46, %8 : vector<8x1xi32>
      %48 = vector.shape_cast %47 : vector<8x1xi1> to vector<8x1xi1>
      %49 = vector.broadcast %48 : vector<8x1xi1> to vector<8x256xi1>
      %50 = arith.select %49, %44, %11 : vector<8x256xi1>, vector<8x256xf32>
      %c1_i32 = arith.constant 1 : i32
      %51 = arith.index_cast %c1_i32 : i32 to index
      %c0_16 = arith.constant 0 : index
      %c0_17 = arith.constant 0 : index
      %52 = vector.load %arg3[%51, %c0_16, %c0_17] : memref<8x8x768xf32, #tpu.memory_space<vmem>>, vector<1x8x768xf32>
      %53 = vector.shape_cast %52 : vector<1x8x768xf32> to vector<8x768xf32>
      %54 = arith.truncf %50 : vector<8x256xf32> to vector<8x256xbf16>
      %cst_18 = arith.constant dense<0.000000e+00> : vector<8x768xf32>
      %55 = tpu.matmul %54, %9, %cst_18 {dimension_numbers = #tpu.dot_dimension_numbers<[1], [0], [0], [1], [0, 0, 1, 1], [], []>} : vector<8x256xbf16>, vector<256x768xbf16>, vector<8x768xf32> -> vector<8x768xf32>
      %56 = vector.broadcast %10 : vector<1x768xf32> to vector<8x768xf32>
      %57 = arith.addf %55, %56 : vector<8x768xf32>
      %58 = vector.extract_strided_slice %53 {offsets = [0, 0], sizes = [8, 256], strides = [1, 1]} : vector<8x768xf32> to vector<8x256xf32>
      %59 = vector.extract_strided_slice %53 {offsets = [0, 256], sizes = [8, 256], strides = [1, 1]} : vector<8x768xf32> to vector<8x256xf32>
      %60 = vector.extract_strided_slice %53 {offsets = [0, 512], sizes = [8, 256], strides = [1, 1]} : vector<8x768xf32> to vector<8x256xf32>
      %61 = vector.extract_strided_slice %57 {offsets = [0, 0], sizes = [8, 256], strides = [1, 1]} : vector<8x768xf32> to vector<8x256xf32>
      %62 = vector.extract_strided_slice %57 {offsets = [0, 256], sizes = [8, 256], strides = [1, 1]} : vector<8x768xf32> to vector<8x256xf32>
      %63 = vector.extract_strided_slice %57 {offsets = [0, 512], sizes = [8, 256], strides = [1, 1]} : vector<8x768xf32> to vector<8x256xf32>
      %64 = arith.addf %58, %61 : vector<8x256xf32>
      %65 = arith.negf %64 : vector<8x256xf32>
      %66 = math.exp %65 : vector<8x256xf32>
      %cst_19 = arith.constant 1.000000e+00 : f32
      %67 = vector.broadcast %cst_19 : f32 to vector<8x256xf32>
      %68 = arith.addf %67, %66 : vector<8x256xf32>
      %69 = arith.divf %67, %68 : vector<8x256xf32>
      %70 = arith.addf %59, %62 : vector<8x256xf32>
      %71 = arith.negf %70 : vector<8x256xf32>
      %72 = math.exp %71 : vector<8x256xf32>
      %cst_20 = arith.constant 1.000000e+00 : f32
      %73 = vector.broadcast %cst_20 : f32 to vector<8x256xf32>
      %74 = arith.addf %73, %72 : vector<8x256xf32>
      %75 = arith.divf %73, %74 : vector<8x256xf32>
      %76 = arith.mulf %69, %63 : vector<8x256xf32>
      %77 = arith.addf %60, %76 : vector<8x256xf32>
      %78 = math.tanh %77 : vector<8x256xf32>
      %cst_21 = arith.constant 1.000000e+00 : f32
      %79 = vector.broadcast %cst_21 : f32 to vector<8x256xf32>
      %80 = arith.subf %79, %75 : vector<8x256xf32>
      %81 = arith.mulf %80, %78 : vector<8x256xf32>
      %82 = arith.mulf %75, %50 : vector<8x256xf32>
      %83 = arith.addf %81, %82 : vector<8x256xf32>
      %84 = arith.addi %3, %c1_i32 : i32
      %85 = vector.broadcast %84 : i32 to vector<8x1xi32>
      %86 = arith.cmpi slt, %85, %8 : vector<8x1xi32>
      %87 = vector.shape_cast %86 : vector<8x1xi1> to vector<8x1xi1>
      %88 = vector.broadcast %87 : vector<8x1xi1> to vector<8x256xi1>
      %89 = arith.select %88, %83, %50 : vector<8x256xi1>, vector<8x256xf32>
      %c2_i32 = arith.constant 2 : i32
      %90 = arith.index_cast %c2_i32 : i32 to index
      %c0_22 = arith.constant 0 : index
      %c0_23 = arith.constant 0 : index
      %91 = vector.load %arg3[%90, %c0_22, %c0_23] : memref<8x8x768xf32, #tpu.memory_space<vmem>>, vector<1x8x768xf32>
      %92 = vector.shape_cast %91 : vector<1x8x768xf32> to vector<8x768xf32>
      %93 = arith.truncf %89 : vector<8x256xf32> to vector<8x256xbf16>
      %cst_24 = arith.constant dense<0.000000e+00> : vector<8x768xf32>
      %94 = tpu.matmul %93, %9, %cst_24 {dimension_numbers = #tpu.dot_dimension_numbers<[1], [0], [0], [1], [0, 0, 1, 1], [], []>} : vector<8x256xbf16>, vector<256x768xbf16>, vector<8x768xf32> -> vector<8x768xf32>
      %95 = vector.broadcast %10 : vector<1x768xf32> to vector<8x768xf32>
      %96 = arith.addf %94, %95 : vector<8x768xf32>
      %97 = vector.extract_strided_slice %92 {offsets = [0, 0], sizes = [8, 256], strides = [1, 1]} : vector<8x768xf32> to vector<8x256xf32>
      %98 = vector.extract_strided_slice %92 {offsets = [0, 256], sizes = [8, 256], strides = [1, 1]} : vector<8x768xf32> to vector<8x256xf32>
      %99 = vector.extract_strided_slice %92 {offsets = [0, 512], sizes = [8, 256], strides = [1, 1]} : vector<8x768xf32> to vector<8x256xf32>
      %100 = vector.extract_strided_slice %96 {offsets = [0, 0], sizes = [8, 256], strides = [1, 1]} : vector<8x768xf32> to vector<8x256xf32>
      %101 = vector.extract_strided_slice %96 {offsets = [0, 256], sizes = [8, 256], strides = [1, 1]} : vector<8x768xf32> to vector<8x256xf32>
      %102 = vector.extract_strided_slice %96 {offsets = [0, 512], sizes = [8, 256], strides = [1, 1]} : vector<8x768xf32> to vector<8x256xf32>
      %103 = arith.addf %97, %100 : vector<8x256xf32>
      %104 = arith.negf %103 : vector<8x256xf32>
      %105 = math.exp %104 : vector<8x256xf32>
      %cst_25 = arith.constant 1.000000e+00 : f32
      %106 = vector.broadcast %cst_25 : f32 to vector<8x256xf32>
      %107 = arith.addf %106, %105 : vector<8x256xf32>
      %108 = arith.divf %106, %107 : vector<8x256xf32>
      %109 = arith.addf %98, %101 : vector<8x256xf32>
      %110 = arith.negf %109 : vector<8x256xf32>
      %111 = math.exp %110 : vector<8x256xf32>
      %cst_26 = arith.constant 1.000000e+00 : f32
      %112 = vector.broadcast %cst_26 : f32 to vector<8x256xf32>
      %113 = arith.addf %112, %111 : vector<8x256xf32>
      %114 = arith.divf %112, %113 : vector<8x256xf32>
      %115 = arith.mulf %108, %102 : vector<8x256xf32>
      %116 = arith.addf %99, %115 : vector<8x256xf32>
      %117 = math.tanh %116 : vector<8x256xf32>
      %cst_27 = arith.constant 1.000000e+00 : f32
      %118 = vector.broadcast %cst_27 : f32 to vector<8x256xf32>
      %119 = arith.subf %118, %114 : vector<8x256xf32>
      %120 = arith.mulf %119, %117 : vector<8x256xf32>
      %121 = arith.mulf %114, %89 : vector<8x256xf32>
      %122 = arith.addf %120, %121 : vector<8x256xf32>
      %123 = arith.addi %3, %c2_i32 : i32
      %124 = vector.broadcast %123 : i32 to vector<8x1xi32>
      %125 = arith.cmpi slt, %124, %8 : vector<8x1xi32>
      %126 = vector.shape_cast %125 : vector<8x1xi1> to vector<8x1xi1>
      %127 = vector.broadcast %126 : vector<8x1xi1> to vector<8x256xi1>
      %128 = arith.select %127, %122, %89 : vector<8x256xi1>, vector<8x256xf32>
      %c3_i32 = arith.constant 3 : i32
      %129 = arith.index_cast %c3_i32 : i32 to index
      %c0_28 = arith.constant 0 : index
      %c0_29 = arith.constant 0 : index
      %130 = vector.load %arg3[%129, %c0_28, %c0_29] : memref<8x8x768xf32, #tpu.memory_space<vmem>>, vector<1x8x768xf32>
      %131 = vector.shape_cast %130 : vector<1x8x768xf32> to vector<8x768xf32>
      %132 = arith.truncf %128 : vector<8x256xf32> to vector<8x256xbf16>
      %cst_30 = arith.constant dense<0.000000e+00> : vector<8x768xf32>
      %133 = tpu.matmul %132, %9, %cst_30 {dimension_numbers = #tpu.dot_dimension_numbers<[1], [0], [0], [1], [0, 0, 1, 1], [], []>} : vector<8x256xbf16>, vector<256x768xbf16>, vector<8x768xf32> -> vector<8x768xf32>
      %134 = vector.broadcast %10 : vector<1x768xf32> to vector<8x768xf32>
      %135 = arith.addf %133, %134 : vector<8x768xf32>
      %136 = vector.extract_strided_slice %131 {offsets = [0, 0], sizes = [8, 256], strides = [1, 1]} : vector<8x768xf32> to vector<8x256xf32>
      %137 = vector.extract_strided_slice %131 {offsets = [0, 256], sizes = [8, 256], strides = [1, 1]} : vector<8x768xf32> to vector<8x256xf32>
      %138 = vector.extract_strided_slice %131 {offsets = [0, 512], sizes = [8, 256], strides = [1, 1]} : vector<8x768xf32> to vector<8x256xf32>
      %139 = vector.extract_strided_slice %135 {offsets = [0, 0], sizes = [8, 256], strides = [1, 1]} : vector<8x768xf32> to vector<8x256xf32>
      %140 = vector.extract_strided_slice %135 {offsets = [0, 256], sizes = [8, 256], strides = [1, 1]} : vector<8x768xf32> to vector<8x256xf32>
      %141 = vector.extract_strided_slice %135 {offsets = [0, 512], sizes = [8, 256], strides = [1, 1]} : vector<8x768xf32> to vector<8x256xf32>
      %142 = arith.addf %136, %139 : vector<8x256xf32>
      %143 = arith.negf %142 : vector<8x256xf32>
      %144 = math.exp %143 : vector<8x256xf32>
      %cst_31 = arith.constant 1.000000e+00 : f32
      %145 = vector.broadcast %cst_31 : f32 to vector<8x256xf32>
      %146 = arith.addf %145, %144 : vector<8x256xf32>
      %147 = arith.divf %145, %146 : vector<8x256xf32>
      %148 = arith.addf %137, %140 : vector<8x256xf32>
      %149 = arith.negf %148 : vector<8x256xf32>
      %150 = math.exp %149 : vector<8x256xf32>
      %cst_32 = arith.constant 1.000000e+00 : f32
      %151 = vector.broadcast %cst_32 : f32 to vector<8x256xf32>
      %152 = arith.addf %151, %150 : vector<8x256xf32>
      %153 = arith.divf %151, %152 : vector<8x256xf32>
      %154 = arith.mulf %147, %141 : vector<8x256xf32>
      %155 = arith.addf %138, %154 : vector<8x256xf32>
      %156 = math.tanh %155 : vector<8x256xf32>
      %cst_33 = arith.constant 1.000000e+00 : f32
      %157 = vector.broadcast %cst_33 : f32 to vector<8x256xf32>
      %158 = arith.subf %157, %153 : vector<8x256xf32>
      %159 = arith.mulf %158, %156 : vector<8x256xf32>
      %160 = arith.mulf %153, %128 : vector<8x256xf32>
      %161 = arith.addf %159, %160 : vector<8x256xf32>
      %162 = arith.addi %3, %c3_i32 : i32
      %163 = vector.broadcast %162 : i32 to vector<8x1xi32>
      %164 = arith.cmpi slt, %163, %8 : vector<8x1xi32>
      %165 = vector.shape_cast %164 : vector<8x1xi1> to vector<8x1xi1>
      %166 = vector.broadcast %165 : vector<8x1xi1> to vector<8x256xi1>
      %167 = arith.select %166, %161, %128 : vector<8x256xi1>, vector<8x256xf32>
      %c4_i32 = arith.constant 4 : i32
      %168 = arith.index_cast %c4_i32 : i32 to index
      %c0_34 = arith.constant 0 : index
      %c0_35 = arith.constant 0 : index
      %169 = vector.load %arg3[%168, %c0_34, %c0_35] : memref<8x8x768xf32, #tpu.memory_space<vmem>>, vector<1x8x768xf32>
      %170 = vector.shape_cast %169 : vector<1x8x768xf32> to vector<8x768xf32>
      %171 = arith.truncf %167 : vector<8x256xf32> to vector<8x256xbf16>
      %cst_36 = arith.constant dense<0.000000e+00> : vector<8x768xf32>
      %172 = tpu.matmul %171, %9, %cst_36 {dimension_numbers = #tpu.dot_dimension_numbers<[1], [0], [0], [1], [0, 0, 1, 1], [], []>} : vector<8x256xbf16>, vector<256x768xbf16>, vector<8x768xf32> -> vector<8x768xf32>
      %173 = vector.broadcast %10 : vector<1x768xf32> to vector<8x768xf32>
      %174 = arith.addf %172, %173 : vector<8x768xf32>
      %175 = vector.extract_strided_slice %170 {offsets = [0, 0], sizes = [8, 256], strides = [1, 1]} : vector<8x768xf32> to vector<8x256xf32>
      %176 = vector.extract_strided_slice %170 {offsets = [0, 256], sizes = [8, 256], strides = [1, 1]} : vector<8x768xf32> to vector<8x256xf32>
      %177 = vector.extract_strided_slice %170 {offsets = [0, 512], sizes = [8, 256], strides = [1, 1]} : vector<8x768xf32> to vector<8x256xf32>
      %178 = vector.extract_strided_slice %174 {offsets = [0, 0], sizes = [8, 256], strides = [1, 1]} : vector<8x768xf32> to vector<8x256xf32>
      %179 = vector.extract_strided_slice %174 {offsets = [0, 256], sizes = [8, 256], strides = [1, 1]} : vector<8x768xf32> to vector<8x256xf32>
      %180 = vector.extract_strided_slice %174 {offsets = [0, 512], sizes = [8, 256], strides = [1, 1]} : vector<8x768xf32> to vector<8x256xf32>
      %181 = arith.addf %175, %178 : vector<8x256xf32>
      %182 = arith.negf %181 : vector<8x256xf32>
      %183 = math.exp %182 : vector<8x256xf32>
      %cst_37 = arith.constant 1.000000e+00 : f32
      %184 = vector.broadcast %cst_37 : f32 to vector<8x256xf32>
      %185 = arith.addf %184, %183 : vector<8x256xf32>
      %186 = arith.divf %184, %185 : vector<8x256xf32>
      %187 = arith.addf %176, %179 : vector<8x256xf32>
      %188 = arith.negf %187 : vector<8x256xf32>
      %189 = math.exp %188 : vector<8x256xf32>
      %cst_38 = arith.constant 1.000000e+00 : f32
      %190 = vector.broadcast %cst_38 : f32 to vector<8x256xf32>
      %191 = arith.addf %190, %189 : vector<8x256xf32>
      %192 = arith.divf %190, %191 : vector<8x256xf32>
      %193 = arith.mulf %186, %180 : vector<8x256xf32>
      %194 = arith.addf %177, %193 : vector<8x256xf32>
      %195 = math.tanh %194 : vector<8x256xf32>
      %cst_39 = arith.constant 1.000000e+00 : f32
      %196 = vector.broadcast %cst_39 : f32 to vector<8x256xf32>
      %197 = arith.subf %196, %192 : vector<8x256xf32>
      %198 = arith.mulf %197, %195 : vector<8x256xf32>
      %199 = arith.mulf %192, %167 : vector<8x256xf32>
      %200 = arith.addf %198, %199 : vector<8x256xf32>
      %201 = arith.addi %3, %c4_i32 : i32
      %202 = vector.broadcast %201 : i32 to vector<8x1xi32>
      %203 = arith.cmpi slt, %202, %8 : vector<8x1xi32>
      %204 = vector.shape_cast %203 : vector<8x1xi1> to vector<8x1xi1>
      %205 = vector.broadcast %204 : vector<8x1xi1> to vector<8x256xi1>
      %206 = arith.select %205, %200, %167 : vector<8x256xi1>, vector<8x256xf32>
      %c5_i32 = arith.constant 5 : i32
      %207 = arith.index_cast %c5_i32 : i32 to index
      %c0_40 = arith.constant 0 : index
      %c0_41 = arith.constant 0 : index
      %208 = vector.load %arg3[%207, %c0_40, %c0_41] : memref<8x8x768xf32, #tpu.memory_space<vmem>>, vector<1x8x768xf32>
      %209 = vector.shape_cast %208 : vector<1x8x768xf32> to vector<8x768xf32>
      %210 = arith.truncf %206 : vector<8x256xf32> to vector<8x256xbf16>
      %cst_42 = arith.constant dense<0.000000e+00> : vector<8x768xf32>
      %211 = tpu.matmul %210, %9, %cst_42 {dimension_numbers = #tpu.dot_dimension_numbers<[1], [0], [0], [1], [0, 0, 1, 1], [], []>} : vector<8x256xbf16>, vector<256x768xbf16>, vector<8x768xf32> -> vector<8x768xf32>
      %212 = vector.broadcast %10 : vector<1x768xf32> to vector<8x768xf32>
      %213 = arith.addf %211, %212 : vector<8x768xf32>
      %214 = vector.extract_strided_slice %209 {offsets = [0, 0], sizes = [8, 256], strides = [1, 1]} : vector<8x768xf32> to vector<8x256xf32>
      %215 = vector.extract_strided_slice %209 {offsets = [0, 256], sizes = [8, 256], strides = [1, 1]} : vector<8x768xf32> to vector<8x256xf32>
      %216 = vector.extract_strided_slice %209 {offsets = [0, 512], sizes = [8, 256], strides = [1, 1]} : vector<8x768xf32> to vector<8x256xf32>
      %217 = vector.extract_strided_slice %213 {offsets = [0, 0], sizes = [8, 256], strides = [1, 1]} : vector<8x768xf32> to vector<8x256xf32>
      %218 = vector.extract_strided_slice %213 {offsets = [0, 256], sizes = [8, 256], strides = [1, 1]} : vector<8x768xf32> to vector<8x256xf32>
      %219 = vector.extract_strided_slice %213 {offsets = [0, 512], sizes = [8, 256], strides = [1, 1]} : vector<8x768xf32> to vector<8x256xf32>
      %220 = arith.addf %214, %217 : vector<8x256xf32>
      %221 = arith.negf %220 : vector<8x256xf32>
      %222 = math.exp %221 : vector<8x256xf32>
      %cst_43 = arith.constant 1.000000e+00 : f32
      %223 = vector.broadcast %cst_43 : f32 to vector<8x256xf32>
      %224 = arith.addf %223, %222 : vector<8x256xf32>
      %225 = arith.divf %223, %224 : vector<8x256xf32>
      %226 = arith.addf %215, %218 : vector<8x256xf32>
      %227 = arith.negf %226 : vector<8x256xf32>
      %228 = math.exp %227 : vector<8x256xf32>
      %cst_44 = arith.constant 1.000000e+00 : f32
      %229 = vector.broadcast %cst_44 : f32 to vector<8x256xf32>
      %230 = arith.addf %229, %228 : vector<8x256xf32>
      %231 = arith.divf %229, %230 : vector<8x256xf32>
      %232 = arith.mulf %225, %219 : vector<8x256xf32>
      %233 = arith.addf %216, %232 : vector<8x256xf32>
      %234 = math.tanh %233 : vector<8x256xf32>
      %cst_45 = arith.constant 1.000000e+00 : f32
      %235 = vector.broadcast %cst_45 : f32 to vector<8x256xf32>
      %236 = arith.subf %235, %231 : vector<8x256xf32>
      %237 = arith.mulf %236, %234 : vector<8x256xf32>
      %238 = arith.mulf %231, %206 : vector<8x256xf32>
      %239 = arith.addf %237, %238 : vector<8x256xf32>
      %240 = arith.addi %3, %c5_i32 : i32
      %241 = vector.broadcast %240 : i32 to vector<8x1xi32>
      %242 = arith.cmpi slt, %241, %8 : vector<8x1xi32>
      %243 = vector.shape_cast %242 : vector<8x1xi1> to vector<8x1xi1>
      %244 = vector.broadcast %243 : vector<8x1xi1> to vector<8x256xi1>
      %245 = arith.select %244, %239, %206 : vector<8x256xi1>, vector<8x256xf32>
      %c6_i32 = arith.constant 6 : i32
      %246 = arith.index_cast %c6_i32 : i32 to index
      %c0_46 = arith.constant 0 : index
      %c0_47 = arith.constant 0 : index
      %247 = vector.load %arg3[%246, %c0_46, %c0_47] : memref<8x8x768xf32, #tpu.memory_space<vmem>>, vector<1x8x768xf32>
      %248 = vector.shape_cast %247 : vector<1x8x768xf32> to vector<8x768xf32>
      %249 = arith.truncf %245 : vector<8x256xf32> to vector<8x256xbf16>
      %cst_48 = arith.constant dense<0.000000e+00> : vector<8x768xf32>
      %250 = tpu.matmul %249, %9, %cst_48 {dimension_numbers = #tpu.dot_dimension_numbers<[1], [0], [0], [1], [0, 0, 1, 1], [], []>} : vector<8x256xbf16>, vector<256x768xbf16>, vector<8x768xf32> -> vector<8x768xf32>
      %251 = vector.broadcast %10 : vector<1x768xf32> to vector<8x768xf32>
      %252 = arith.addf %250, %251 : vector<8x768xf32>
      %253 = vector.extract_strided_slice %248 {offsets = [0, 0], sizes = [8, 256], strides = [1, 1]} : vector<8x768xf32> to vector<8x256xf32>
      %254 = vector.extract_strided_slice %248 {offsets = [0, 256], sizes = [8, 256], strides = [1, 1]} : vector<8x768xf32> to vector<8x256xf32>
      %255 = vector.extract_strided_slice %248 {offsets = [0, 512], sizes = [8, 256], strides = [1, 1]} : vector<8x768xf32> to vector<8x256xf32>
      %256 = vector.extract_strided_slice %252 {offsets = [0, 0], sizes = [8, 256], strides = [1, 1]} : vector<8x768xf32> to vector<8x256xf32>
      %257 = vector.extract_strided_slice %252 {offsets = [0, 256], sizes = [8, 256], strides = [1, 1]} : vector<8x768xf32> to vector<8x256xf32>
      %258 = vector.extract_strided_slice %252 {offsets = [0, 512], sizes = [8, 256], strides = [1, 1]} : vector<8x768xf32> to vector<8x256xf32>
      %259 = arith.addf %253, %256 : vector<8x256xf32>
      %260 = arith.negf %259 : vector<8x256xf32>
      %261 = math.exp %260 : vector<8x256xf32>
      %cst_49 = arith.constant 1.000000e+00 : f32
      %262 = vector.broadcast %cst_49 : f32 to vector<8x256xf32>
      %263 = arith.addf %262, %261 : vector<8x256xf32>
      %264 = arith.divf %262, %263 : vector<8x256xf32>
      %265 = arith.addf %254, %257 : vector<8x256xf32>
      %266 = arith.negf %265 : vector<8x256xf32>
      %267 = math.exp %266 : vector<8x256xf32>
      %cst_50 = arith.constant 1.000000e+00 : f32
      %268 = vector.broadcast %cst_50 : f32 to vector<8x256xf32>
      %269 = arith.addf %268, %267 : vector<8x256xf32>
      %270 = arith.divf %268, %269 : vector<8x256xf32>
      %271 = arith.mulf %264, %258 : vector<8x256xf32>
      %272 = arith.addf %255, %271 : vector<8x256xf32>
      %273 = math.tanh %272 : vector<8x256xf32>
      %cst_51 = arith.constant 1.000000e+00 : f32
      %274 = vector.broadcast %cst_51 : f32 to vector<8x256xf32>
      %275 = arith.subf %274, %270 : vector<8x256xf32>
      %276 = arith.mulf %275, %273 : vector<8x256xf32>
      %277 = arith.mulf %270, %245 : vector<8x256xf32>
      %278 = arith.addf %276, %277 : vector<8x256xf32>
      %279 = arith.addi %3, %c6_i32 : i32
      %280 = vector.broadcast %279 : i32 to vector<8x1xi32>
      %281 = arith.cmpi slt, %280, %8 : vector<8x1xi32>
      %282 = vector.shape_cast %281 : vector<8x1xi1> to vector<8x1xi1>
      %283 = vector.broadcast %282 : vector<8x1xi1> to vector<8x256xi1>
      %284 = arith.select %283, %278, %245 : vector<8x256xi1>, vector<8x256xf32>
      %c7_i32 = arith.constant 7 : i32
      %285 = arith.index_cast %c7_i32 : i32 to index
      %c0_52 = arith.constant 0 : index
      %c0_53 = arith.constant 0 : index
      %286 = vector.load %arg3[%285, %c0_52, %c0_53] : memref<8x8x768xf32, #tpu.memory_space<vmem>>, vector<1x8x768xf32>
      %287 = vector.shape_cast %286 : vector<1x8x768xf32> to vector<8x768xf32>
      %288 = arith.truncf %284 : vector<8x256xf32> to vector<8x256xbf16>
      %cst_54 = arith.constant dense<0.000000e+00> : vector<8x768xf32>
      %289 = tpu.matmul %288, %9, %cst_54 {dimension_numbers = #tpu.dot_dimension_numbers<[1], [0], [0], [1], [0, 0, 1, 1], [], []>} : vector<8x256xbf16>, vector<256x768xbf16>, vector<8x768xf32> -> vector<8x768xf32>
      %290 = vector.broadcast %10 : vector<1x768xf32> to vector<8x768xf32>
      %291 = arith.addf %289, %290 : vector<8x768xf32>
      %292 = vector.extract_strided_slice %287 {offsets = [0, 0], sizes = [8, 256], strides = [1, 1]} : vector<8x768xf32> to vector<8x256xf32>
      %293 = vector.extract_strided_slice %287 {offsets = [0, 256], sizes = [8, 256], strides = [1, 1]} : vector<8x768xf32> to vector<8x256xf32>
      %294 = vector.extract_strided_slice %287 {offsets = [0, 512], sizes = [8, 256], strides = [1, 1]} : vector<8x768xf32> to vector<8x256xf32>
      %295 = vector.extract_strided_slice %291 {offsets = [0, 0], sizes = [8, 256], strides = [1, 1]} : vector<8x768xf32> to vector<8x256xf32>
      %296 = vector.extract_strided_slice %291 {offsets = [0, 256], sizes = [8, 256], strides = [1, 1]} : vector<8x768xf32> to vector<8x256xf32>
      %297 = vector.extract_strided_slice %291 {offsets = [0, 512], sizes = [8, 256], strides = [1, 1]} : vector<8x768xf32> to vector<8x256xf32>
      %298 = arith.addf %292, %295 : vector<8x256xf32>
      %299 = arith.negf %298 : vector<8x256xf32>
      %300 = math.exp %299 : vector<8x256xf32>
      %cst_55 = arith.constant 1.000000e+00 : f32
      %301 = vector.broadcast %cst_55 : f32 to vector<8x256xf32>
      %302 = arith.addf %301, %300 : vector<8x256xf32>
      %303 = arith.divf %301, %302 : vector<8x256xf32>
      %304 = arith.addf %293, %296 : vector<8x256xf32>
      %305 = arith.negf %304 : vector<8x256xf32>
      %306 = math.exp %305 : vector<8x256xf32>
      %cst_56 = arith.constant 1.000000e+00 : f32
      %307 = vector.broadcast %cst_56 : f32 to vector<8x256xf32>
      %308 = arith.addf %307, %306 : vector<8x256xf32>
      %309 = arith.divf %307, %308 : vector<8x256xf32>
      %310 = arith.mulf %303, %297 : vector<8x256xf32>
      %311 = arith.addf %294, %310 : vector<8x256xf32>
      %312 = math.tanh %311 : vector<8x256xf32>
      %cst_57 = arith.constant 1.000000e+00 : f32
      %313 = vector.broadcast %cst_57 : f32 to vector<8x256xf32>
      %314 = arith.subf %313, %309 : vector<8x256xf32>
      %315 = arith.mulf %314, %312 : vector<8x256xf32>
      %316 = arith.mulf %309, %284 : vector<8x256xf32>
      %317 = arith.addf %315, %316 : vector<8x256xf32>
      %318 = arith.addi %3, %c7_i32 : i32
      %319 = vector.broadcast %318 : i32 to vector<8x1xi32>
      %320 = arith.cmpi slt, %319, %8 : vector<8x1xi32>
      %321 = vector.shape_cast %320 : vector<8x1xi1> to vector<8x1xi1>
      %322 = vector.broadcast %321 : vector<8x1xi1> to vector<8x256xi1>
      %323 = arith.select %322, %317, %284 : vector<8x256xi1>, vector<8x256xf32>
      %c8_i32_58 = arith.constant 8 : i32
      %c0_59 = arith.constant 0 : index
      %c0_60 = arith.constant 0 : index
      %324 = vector.load %arg6[%c0_59, %c0_60] : memref<8x256xf32, #tpu.memory_space<vmem>>, vector<8x256xf32>
      tpu.vector_store %arg6[%c0_59, %c0_60], %323 {strides = array<i32>} : memref<8x256xf32, #tpu.memory_space<vmem>>, vector<8x256xf32>,
    } else {
    }
    return
  }
  func.func @transform_0(%arg0: i32, %arg1: memref<1xi32, #tpu.memory_space<smem>>) -> (i32, i32) {
    %c0_i32 = arith.constant 0 : i32
    %c0_i32_0 = arith.constant 0 : i32
    %c0_i32_1 = arith.constant 0 : i32
    return %c0_i32, %c0_i32_0 : i32, i32
  }
  func.func @transform_1(%arg0: i32, %arg1: memref<1xi32, #tpu.memory_space<smem>>) -> (i32, i32, i32) {
    %c0_i32 = arith.constant 0 : i32
    %c0_i32_0 = arith.constant 0 : i32
    %c0_i32_1 = arith.constant 0 : i32
    return %arg0, %c0_i32, %c0_i32_0 : i32, i32, i32
  }
  func.func @transform_2(%arg0: i32, %arg1: memref<1xi32, #tpu.memory_space<smem>>) -> (i32, i32) {
    %c0_i32 = arith.constant 0 : i32
    %c0_i32_0 = arith.constant 0 : i32
    %c0_i32_1 = arith.constant 0 : i32
    return %c0_i32, %c0_i32_0 : i32, i32
  }
  func.func @transform_3(%arg0: i32, %arg1: memref<1xi32, #tpu.memory_space<smem>>) -> (i32, i32) {
    %c0_i32 = arith.constant 0 : i32
    %c0_i32_0 = arith.constant 0 : i32
    %c0_i32_1 = arith.constant 0 : i32
    return %c0_i32, %c0_i32_0 : i32, i32
  }
  func.func @transform_4(%arg0: i32, %arg1: memref<1xi32, #tpu.memory_space<smem>>) -> (i32, i32) {
    %c0_i32 = arith.constant 0 : i32
    %c0_i32_0 = arith.constant 0 : i32
    %c0_i32_1 = arith.constant 0 : i32
    return %c0_i32, %c0_i32_0 : i32, i32
  }
}

</mosaic_0001>

<bundles_post_ra>
// kernel: tpu_custom_call.1
= control target key start
LH: loop header
LB: loop body
LE: loop exit
PB: predicated region body
PF: predicated region fallthrough
CT: control target
= control target key end

     0   :  { %11 = vsyncpa [#allocation5], 0  ;;  %s4869_s0 = inlined_call_operand.<no memory space> [shape: s32[1], index: 0, kind: input, shape index: {}]   ;;  %s4870_s1 = inlined_call_operand.vmem [shape: s32[8,1], index: 1, kind: input, shape index: {}]   ;;  %s4871_s2 = inlined_call_operand.hbm [shape: f32[8,8,768], index: 2, kind: input, shape index: {}]   ;;  %s4872_s3 = inlined_call_operand.hbm [shape: bf16[256,768], index: 3, kind: input, shape index: {}]   ;;  %s4873_s4 = inlined_call_operand.vmem [shape: f32[1,768], index: 4, kind: input, shape index: {}]   ;;  %s4874_s5 = inlined_call_operand.hbm [shape: f32[8,256], index: 5, kind: output, shape index: {}]  }
   0x1   :  { %12 = vsyncpa [#allocation8], 0 }
   0x2   :  { %13 = vsyncpa [#allocation6], 0  ;;  %s20_s20 = sshll.u32 %s4871_s2, 4  ;;  %s3601_s21 = smov [#allocation4]   ;;  %s21_s20 = int_to_ptr.hbm [resolvable:$true] %s20_s20 }
   0x3   :  { %s22_s22 = sshll.u32 %s3601_s21, 4  ;;  %s33_s25 = sshll.u32 %s4872_s3, 4  ;;  %s23_s22 = int_to_ptr.vmem [resolvable:$true] %s22_s22  ;;  %s34_s25 = int_to_ptr.hbm [resolvable:$true] %s33_s25 }
   0x4   :  { %s3602_s26 = smov 768   ;;  %s3603_s27 = smov 48  }
   0x5   :  { %28 = dma.hbm_to_vmem [thread:$0]  %s21_s20, 6144, %s23_s22, [#allocation5], %s3602_s26, %s3602_s26, %s3603_s27  }
   0x6   :  { %s3604_s28 = smov [#allocation7]   ;;  %s3605_s30 = smov 384  }
   0x7   :  { %s35_s29 = sshll.u32 %s3604_s28, 4  ;;  %s3606_s6 = smov 24   ;;  %s36_s29 = int_to_ptr.vmem [resolvable:$true] %s35_s29 }
   0x8   :  { %41 = dma.hbm_to_vmem [thread:$0]  %s34_s25, 12288, %s36_s29, [#allocation8], %s3605_s30, %s3605_s30, %s3606_s6  }
   0x9   :  { %3595 = dma.done.wait [#allocation5], 6144  }
   0xa   :  { %3596 = vsyncadd [#allocation5], 4294961152 }
   0xb   :  { %3597 = dma.done.wait [#allocation8], 12288  }
   0xc   :  { %3598 = vsyncadd [#allocation8], 4294955008  ;;  %v3607_v0 = vmov 0.0   ;;  %p2828_p0 = scmp.le.s32.totalorder %s4869_s0, 0 }
   0xd   :  { %56 = vst [vmem:[#allocation9] sm:$0xff] %v3607_v0 }
   0xe   :  { %57 = vst [vmem:[#allocation9 + $0x8] sm:$0xff] %v3607_v0  ;;  %63 = sbr.rel (%p2828_p0) target bundleno = 1596 (0x63c), region = 33 }
  0x13   :  { %v2999_v1 = vld [vmem:[#allocation7 + $0x150] sm:$0xf]  ;;  %v3298_v2 = vld [vmem:[#allocation7 + $0x164] sm:$0xf0]  ;;  %v3295_v6 = vld [vmem:[#allocation7 + $0x154] sm:$0xf] }
  0x14   :  { %v3191_v3 = vld [vmem:[#allocation7 + $0x2d0] sm:$0xf]  ;;  %v3649_v4 = vor.u32 %v3298_v2, %v2999_v1  ;;  %v3346_v5 = vld [vmem:[#allocation7 + $0x2e4] sm:$0xf0]  ;;  %v3001_v7 = vld [vmem:[#allocation7 + $0x168] sm:$0xf0] }
  0x15   :  { %v3651_v8 = vor.u32 %v3346_v5, %v3191_v3  ;;  %v3653_v9 = vor.u32 %v3295_v6, %v3001_v7  ;;  %v3343_v10 = vld [vmem:[#allocation7 + $0x2d4] sm:$0xf]  ;;  %v3193_v11 = vld [vmem:[#allocation7 + $0x2e8] sm:$0xf0]  ;;  %v2975_v12 = vld [vmem:[#allocation7 + $0x120] sm:$0xf] }
  0x16   :  { %665 = vmatpush.bf16.msra.mxu0 %v3649_v4  ;;  %v3656_v13 = vor.u32 %v3343_v10, %v3193_v11  ;;  %v3292_v14 = vld [vmem:[#allocation7 + $0x134] sm:$0xf0]  ;;  %v3167_v15 = vld [vmem:[#allocation7 + $0x2a0] sm:$0xf]  ;;  %v3289_v19 = vld [vmem:[#allocation7 + $0x124] sm:$0xf] }
  0x17   :  { %5060 = vst [vmem:[#allocation13_spill] sm:$0xff] %v3651_v8  ;;  %v3340_v16 = vld [vmem:[#allocation7 + $0x2b4] sm:$0xf0]  ;;  %678 = vmatpush.bf16.msra.mxu1 %v3651_v8  ;;  %691 = vmatpush.bf16.msra.mxu2 %v3653_v9  ;;  %v3660_v17 = vor.u32 %v3292_v14, %v2975_v12  ;;  %v2977_v20 = vld [vmem:[#allocation7 + $0x138] sm:$0xf0] }
  0x18   :  { %5061 = vst [vmem:[#allocation14_spill] sm:$0xff] %v3656_v13  ;;  %v3662_v18 = vor.u32 %v3340_v16, %v3167_v15  ;;  %v3337_v21 = vld [vmem:[#allocation7 + $0x2a4] sm:$0xf]  ;;  %704 = vmatpush.bf16.msra.mxu3 %v3656_v13  ;;  %v3665_v22 = vor.u32 %v3289_v19, %v2977_v20  ;;  %v3169_v23 = vld [vmem:[#allocation7 + $0x2b8] sm:$0xf0] }
  0x19   :  { %v2951_v24 = vld [vmem:[#allocation7 + $0xf0] sm:$0xf]  ;;  %v3286_v25 = vld [vmem:[#allocation7 + $0x104] sm:$0xf0]  ;;  %v3667_v26 = vor.u32 %v3337_v21, %v3169_v23  ;;  %v3283_v29 = vld [vmem:[#allocation7 + $0xf4] sm:$0xf] }
  0x1a   :  { %5062 = vst [vmem:[#allocation15_spill] sm:$0xff] %v3662_v18  ;;  %v3143_v27 = vld [vmem:[#allocation7 + $0x270] sm:$0xf]  ;;  %v3334_v28 = vld [vmem:[#allocation7 + $0x284] sm:$0xf0]  ;;  %666 = vmatpush.bf16.msra.mxu0 %v3660_v17  ;;  %v3670_v30 = vor.u32 %v3286_v25, %v2951_v24 }
  0x1b   :  { %5063 = vst [vmem:[#allocation16_spill] sm:$0xff] %v3667_v26  ;;  %v2953_v31 = vld [vmem:[#allocation7 + $0x108] sm:$0xf0]  ;;  %v3331_v32 = vld [vmem:[#allocation7 + $0x274] sm:$0xf]  ;;  %679 = vmatpush.bf16.msra.mxu1 %v3662_v18  ;;  %692 = vmatpush.bf16.msra.mxu2 %v3665_v22  ;;  %v3674_v34 = vor.u32 %v3334_v28, %v3143_v27 }
  0x1c   :  { %5064 = vst [vmem:[#allocation17_spill] sm:$0xff] %v3670_v30  ;;  %v3145_v33 = vld [vmem:[#allocation7 + $0x288] sm:$0xf0]  ;;  %v3676_v35 = vor.u32 %v3283_v29, %v2953_v31  ;;  %v2927_v36 = vld [vmem:[#allocation7 + $0xc0] sm:$0xf]  ;;  %705 = vmatpush.bf16.msra.mxu3 %v3667_v26 }
  0x1d   :  { %5065 = vst [vmem:[#allocation18_spill] sm:$0xff] %v3674_v34  ;;  %v3280_v37 = vld [vmem:[#allocation7 + $0xd4] sm:$0xf0]  ;;  %v3119_v38 = vld [vmem:[#allocation7 + $0x240] sm:$0xf]  ;;  %v3679_v39 = vor.u32 %v3331_v32, %v3145_v33 }
  0x1e   :  { %5066 = vst [vmem:[#allocation19_spill] sm:$0xff] %v3676_v35  ;;  %v3328_v40 = vld [vmem:[#allocation7 + $0x254] sm:$0xf0]  ;;  %v3277_v41 = vld [vmem:[#allocation7 + $0xc4] sm:$0xf]  ;;  %667 = vmatpush.bf16.msra.mxu0 %v3670_v30  ;;  %v3682_v45 = vor.u32 %v3280_v37, %v2927_v36 }
  0x1f   :  { %5067 = vst [vmem:[#allocation20_spill] sm:$0xff] %v3679_v39  ;;  %v2929_v42 = vld [vmem:[#allocation7 + $0xd8] sm:$0xf0]  ;;  %v3325_v43 = vld [vmem:[#allocation7 + $0x244] sm:$0xf]  ;;  %680 = vmatpush.bf16.msra.mxu1 %v3674_v34  ;;  %693 = vmatpush.bf16.msra.mxu2 %v3676_v35  ;;  %v3686_v46 = vor.u32 %v3328_v40, %v3119_v38 }
  0x20   :  { %v3121_v44 = vld [vmem:[#allocation7 + $0x258] sm:$0xf0]  ;;  %5068 = vst [vmem:[#allocation21_spill] sm:$0xff] %v3682_v45  ;;  %v3688_v47 = vor.u32 %v3277_v41, %v2929_v42  ;;  %v2903_v48 = vld [vmem:[#allocation7 + $0x90] sm:$0xf]  ;;  %706 = vmatpush.bf16.msra.mxu3 %v3679_v39 }
  0x21   :  { %5069 = vst [vmem:[#allocation22_spill] sm:$0xff] %v3686_v46  ;;  %v3274_v49 = vld [vmem:[#allocation7 + $0xa4] sm:$0xf0]  ;;  %v3095_v50 = vld [vmem:[#allocation7 + $0x210] sm:$0xf]  ;;  %v3691_v51 = vor.u32 %v3325_v43, %v3121_v44 }
  0x22   :  { %5070 = vst [vmem:[#allocation23_spill] sm:$0xff] %v3688_v47  ;;  %v3322_v52 = vld [vmem:[#allocation7 + $0x224] sm:$0xf0]  ;;  %v3271_v53 = vld [vmem:[#allocation7 + $0x94] sm:$0xf]  ;;  %668 = vmatpush.bf16.msra.mxu0 %v3682_v45  ;;  %v3694_v57 = vor.u32 %v3274_v49, %v2903_v48 }
  0x23   :  { %5071 = vst [vmem:[#allocation24_spill] sm:$0xff] %v3691_v51  ;;  %v2905_v54 = vld [vmem:[#allocation7 + $0xa8] sm:$0xf0]  ;;  %v3319_v55 = vld [vmem:[#allocation7 + $0x214] sm:$0xf]  ;;  %681 = vmatpush.bf16.msra.mxu1 %v3686_v46  ;;  %694 = vmatpush.bf16.msra.mxu2 %v3688_v47  ;;  %v3698_v58 = vor.u32 %v3322_v52, %v3095_v50 }
  0x24   :  { %v3097_v56 = vld [vmem:[#allocation7 + $0x228] sm:$0xf0]  ;;  %5072 = vst [vmem:[#allocation25_spill] sm:$0xff] %v3694_v57  ;;  %v3700_v59 = vor.u32 %v3271_v53, %v2905_v54  ;;  %v2879_v60 = vld [vmem:[#allocation7 + $0x60] sm:$0xf]  ;;  %707 = vmatpush.bf16.msra.mxu3 %v3691_v51 }
  0x25   :  { %5073 = vst [vmem:[#allocation26_spill] sm:$0xff] %v3698_v58  ;;  %v3268_v61 = vld [vmem:[#allocation7 + $0x74] sm:$0xf0]  ;;  %v3071_v62 = vld [vmem:[#allocation7 + $0x1e0] sm:$0xf]  ;;  %v3703_v63 = vor.u32 %v3319_v55, %v3097_v56 }
  0x26   :  { %5074 = vst [vmem:[#allocation27_spill] sm:$0xff] %v3700_v59  ;;  %v3316_v0 = vld [vmem:[#allocation7 + $0x1f4] sm:$0xf0]  ;;  %v3265_v1 = vld [vmem:[#allocation7 + $0x64] sm:$0xf]  ;;  %669 = vmatpush.bf16.msra.mxu0 %v3694_v57  ;;  %v3706_v6 = vor.u32 %v3268_v61, %v2879_v60 }
  0x27   :  { %5075 = vst [vmem:[#allocation28_spill] sm:$0xff] %v3703_v63  ;;  %v2881_v2 = vld [vmem:[#allocation7 + $0x78] sm:$0xf0]  ;;  %v3313_v3 = vld [vmem:[#allocation7 + $0x1e4] sm:$0xf]  ;;  %682 = vmatpush.bf16.msra.mxu1 %v3698_v58  ;;  %695 = vmatpush.bf16.msra.mxu2 %v3700_v59  ;;  %v3710_v7 = vor.u32 %v3316_v0, %v3071_v62  ;;  %v3745_v62 = vld [vmem:[#allocation9 + $0x8] sm:$0xff] }
  0x28   :  { %v3073_v5 = vld [vmem:[#allocation7 + $0x1f8] sm:$0xf0]  ;;  %5076 = vst [vmem:[#allocation29_spill] sm:$0xff] %v3706_v6  ;;  %v3712_v10 = vor.u32 %v3265_v1, %v2881_v2  ;;  %v2855_v11 = vld [vmem:[#allocation7 + $0x30] sm:$0xf]  ;;  %708 = vmatpush.bf16.msra.mxu3 %v3703_v63  ;;  %v3743_v61 = vld [vmem:[#allocation9] sm:$0xff] }
  0x29   :  { %5077 = vst [vmem:[#allocation30_spill] sm:$0xff] %v3710_v7  ;;  %v3262_v12 = vld [vmem:[#allocation7 + $0x44] sm:$0xf0]  ;;  %v3047_v14 = vld [vmem:[#allocation7 + $0x1b0] sm:$0xf]  ;;  %v3715_v15 = vor.u32 %v3313_v3, %v3073_v5 }
  0x2a   :  { %5078 = vst [vmem:[#allocation31_spill] sm:$0xff] %v3712_v10  ;;  %v3310_v16 = vld [vmem:[#allocation7 + $0x1c4] sm:$0xf0]  ;;  %v3259_v19 = vld [vmem:[#allocation7 + $0x34] sm:$0xf]  ;;  %670 = vmatpush.bf16.msra.mxu0 %v3706_v6  ;;  %v3718_v24 = vor.u32 %v3262_v12, %v2855_v11 }
  0x2b   :  { %5079 = vst [vmem:[#allocation32_spill] sm:$0xff] %v3715_v15  ;;  %v2857_v20 = vld [vmem:[#allocation7 + $0x48] sm:$0xf0]  ;;  %v3307_v21 = vld [vmem:[#allocation7 + $0x1b4] sm:$0xf]  ;;  %683 = vmatpush.bf16.msra.mxu1 %v3710_v7  ;;  %696 = vmatpush.bf16.msra.mxu2 %v3712_v10  ;;  %v3722_v28 = vor.u32 %v3310_v16, %v3047_v14 }
  0x2c   :  { %v3049_v23 = vld [vmem:[#allocation7 + $0x1c8] sm:$0xf0]  ;;  %5080 = vst [vmem:[#allocation33_spill] sm:$0xff] %v3718_v24  ;;  %v2831_v25 = vld [vmem:[#allocation7] sm:$0xf]  ;;  %v3724_v29 = vor.u32 %v3259_v19, %v2857_v20  ;;  %709 = vmatpush.bf16.msra.mxu3 %v3715_v15  ;;  %v3756_v19 = vpack.c.bf16 %v3743_v61, %v3743_v61 }
  0x2d   :  { %v3256_v27 = vld [vmem:[#allocation7 + $0x14] sm:$0xf0]  ;;  %5081 = vst [vmem:[#allocation34_spill] sm:$0xff] %v3722_v28  ;;  %v3023_v31 = vld [vmem:[#allocation7 + $0x180] sm:$0xf]  ;;  %v3727_v36 = vor.u32 %v3307_v21, %v3049_v23  ;;  %v3762_v23 = vpack.c.bf16 %v3745_v62, %v3745_v62 }
  0x2e   :  { %5082 = vst [vmem:[#allocation35_spill] sm:$0xff] %v3724_v29  ;;  %v3304_v32 = vld [vmem:[#allocation7 + $0x194] sm:$0xf0]  ;;  %v3253_v33 = vld [vmem:[#allocation7 + $0x4] sm:$0xf]  ;;  %671 = vmatpush.bf16.msra.mxu0 %v3718_v24  ;;  %v3730_v44 = vor.u32 %v3256_v27, %v2831_v25 }
  0x2f   :  { %5083 = vst [vmem:[#allocation36_spill] sm:$0xff] %v3727_v36  ;;  %v2833_v37 = vld [vmem:[#allocation7 + $0x18] sm:$0xf0]  ;;  %v3301_v38 = vld [vmem:[#allocation7 + $0x184] sm:$0xf]  ;;  %684 = vmatpush.bf16.msra.mxu1 %v3722_v28  ;;  %697 = vmatpush.bf16.msra.mxu2 %v3724_v29  ;;  %v3734_v52 = vor.u32 %v3304_v32, %v3023_v31 }
  0x30   :  { %v3025_v40 = vld [vmem:[#allocation7 + $0x198] sm:$0xf0]  ;;  %v3007_v41 = vld [vmem:[#allocation7 + $0x158] sm:$0xf]  ;;  %v3299_v42 = vld [vmem:[#allocation7 + $0x16c] sm:$0xf0]  ;;  %v3736_v53 = vor.u32 %v3253_v33, %v2833_v37  ;;  %710 = vmatpush.bf16.msra.mxu3 %v3727_v36 }
  0x31   :  { %v3199_v43 = vld [vmem:[#allocation7 + $0x2d8] sm:$0xf]  ;;  %5084 = vst [vmem:[#allocation37_spill] sm:$0xff] %v3730_v44  ;;  %v3347_v48 = vld [vmem:[#allocation7 + $0x2ec] sm:$0xf0]  ;;  %v3739_v56 = vor.u32 %v3301_v38, %v3025_v40  ;;  %v3741_v60 = vor.u32 %v3299_v42, %v3007_v41 }
  0x32   :  { %v3296_v49 = vld [vmem:[#allocation7 + $0x15c] sm:$0xf]  ;;  %v3009_v50 = vld [vmem:[#allocation7 + $0x170] sm:$0xf0]  ;;  %5085 = vst [vmem:[#allocation38_spill] sm:$0xff] %v3734_v52  ;;  %v3747_v0 = vor.u32 %v3347_v48, %v3199_v43  ;;  %672 = vmatpush.bf16.msra.mxu0 %v3730_v44 }
  0x33   :  { %5086 = vst [vmem:[#allocation39_spill] sm:$0xff] %v3736_v53  ;;  %v3344_v54 = vld [vmem:[#allocation7 + $0x2dc] sm:$0xf]  ;;  %v3201_v55 = vld [vmem:[#allocation7 + $0x2f0] sm:$0xf0]  ;;  %v3749_v1 = vor.u32 %v3296_v49, %v3009_v50  ;;  %685 = vmatpush.bf16.msra.mxu1 %v3734_v52  ;;  %698 = vmatpush.bf16.msra.mxu2 %v3736_v53 }
  0x34   :  { %5087 = vst [vmem:[#allocation40_spill] sm:$0xff] %v3739_v56  ;;  %v2983_v2 = vld [vmem:[#allocation7 + $0x128] sm:$0xf]  ;;  %v3293_v3 = vld [vmem:[#allocation7 + $0x13c] sm:$0xf0]  ;;  %v3752_v11 = vor.u32 %v3344_v54, %v3201_v55  ;;  %711 = vmatpush.bf16.msra.mxu3 %v3739_v56 }
  0x35   :  { %5088 = vst [vmem:[#allocation41_spill] sm:$0xff] %v3741_v60  ;;  %v3175_v5 = vld [vmem:[#allocation7 + $0x2a8] sm:$0xf]  ;;  %v3341_v12 = vld [vmem:[#allocation7 + $0x2bc] sm:$0xf0]  ;;  %v3766_v25 = vor.u32 %v3293_v3, %v2983_v2  ;;  %673 = vmatmul.bf16.vlgmr.msra.gmra.mxu0 %v3756_v19 }
  0x36   :  { %5089 = vst [vmem:[#allocation42_spill] sm:$0xff] %v3743_v61  ;;  %v3290_v14 = vld [vmem:[#allocation7 + $0x12c] sm:$0xf]  ;;  %v2985_v16 = vld [vmem:[#allocation7 + $0x140] sm:$0xf0]  ;;  %717 = vmatpush.bf16.msrb.mxu0 %v3741_v60  ;;  %v3770_v27 = vor.u32 %v3341_v12, %v3175_v5  ;;  %699 = vmatmul.bf16.vlgmr.msra.gmra.mxu2 %v3756_v19 }
  0x37   :  { %5090 = vst [vmem:[#allocation43_spill] sm:$0xff] %v3745_v62  ;;  %v3338_v20 = vld [vmem:[#allocation7 + $0x2ac] sm:$0xf]  ;;  %v3177_v21 = vld [vmem:[#allocation7 + $0x2c0] sm:$0xf0]  ;;  %730 = vmatpush.bf16.msrb.mxu1 %v3747_v0  ;;  %743 = vmatpush.bf16.msrb.mxu2 %v3749_v1  ;;  %v3772_v31 = vor.u32 %v3290_v14, %v2985_v16 }
  0x38   :  { %5091 = vst [vmem:[#allocation44_spill] sm:$0xff] %v3747_v0  ;;  %v2959_v32 = vld [vmem:[#allocation7 + $0xf8] sm:$0xf]  ;;  %v3287_v33 = vld [vmem:[#allocation7 + $0x10c] sm:$0xf0]  ;;  %756 = vmatpush.bf16.msrb.mxu3 %v3752_v11  ;;  %v3775_v38 = vor.u32 %v3338_v20, %v3177_v21  ;;  %686 = vmatmul.bf16.vlgmr.msra.gmra.mxu1 %v3762_v23 }
  0x39   :  { %5092 = vst [vmem:[#allocation45_spill] sm:$0xff] %v3749_v1  ;;  %v3151_v37 = vld [vmem:[#allocation7 + $0x278] sm:$0xf]  ;;  %v3335_v40 = vld [vmem:[#allocation7 + $0x28c] sm:$0xf0]  ;;  %712 = vmatmul.bf16.vlgmr.msra.gmra.mxu3 %v3762_v23  ;;  %v3781_v49 = vor.u32 %v3287_v33, %v2959_v32 }
  0x3a   :  { %5093 = vst [vmem:[#allocation46_spill] sm:$0xff] %v3752_v11  ;;  %v3284_v41 = vld [vmem:[#allocation7 + $0xfc] sm:$0xf]  ;;  %v2961_v42 = vld [vmem:[#allocation7 + $0x110] sm:$0xf0]  ;;  %718 = vmatpush.bf16.msrb.mxu0 %v3766_v25  ;;  %v3786_v50 = vor.u32 %v3335_v40, %v3151_v37 }
  0x3b   :  { %5094 = vst [vmem:[#allocation47_spill] sm:$0xff] %v3766_v25  ;;  %v3332_v43 = vld [vmem:[#allocation7 + $0x27c] sm:$0xf]  ;;  %v3153_v48 = vld [vmem:[#allocation7 + $0x290] sm:$0xf0]  ;;  %731 = vmatpush.bf16.msrb.mxu1 %v3770_v27  ;;  %744 = vmatpush.bf16.msrb.mxu2 %v3772_v31  ;;  %v3788_v54 = vor.u32 %v3284_v41, %v2961_v42 }
  0x3c   :  { %5095 = vst [vmem:[#allocation48_spill] sm:$0xff] %v3770_v27  ;;  %v2935_v55 = vld [vmem:[#allocation7 + $0xc8] sm:$0xf]  ;;  %v3281_v2 = vld [vmem:[#allocation7 + $0xdc] sm:$0xf0]  ;;  %757 = vmatpush.bf16.msrb.mxu3 %v3775_v38  ;;  %v3791_v5 = vor.u32 %v3332_v43, %v3153_v48 }
  0x3d   :  { %5096 = vst [vmem:[#allocation49_spill] sm:$0xff] %v3772_v31  ;;  %v3127_v3 = vld [vmem:[#allocation7 + $0x248] sm:$0xf]  ;;  %v3329_v12 = vld [vmem:[#allocation7 + $0x25c] sm:$0xf0]  ;;  %v3794_v32 = vor.u32 %v3281_v2, %v2935_v55 }
  0x3e   :  { %5097 = vst [vmem:[#allocation50_spill] sm:$0xff] %v3775_v38  ;;  %v3278_v14 = vld [vmem:[#allocation7 + $0xcc] sm:$0xf]  ;;  %v2937_v16 = vld [vmem:[#allocation7 + $0xe0] sm:$0xf0]  ;;  %719 = vmatpush.bf16.msrb.mxu0 %v3781_v49  ;;  %v3798_v33 = vor.u32 %v3329_v12, %v3127_v3 }
  0x3f   :  { %5098 = vst [vmem:[#allocation51_spill] sm:$0xff] %v3781_v49  ;;  %v3326_v20 = vld [vmem:[#allocation7 + $0x24c] sm:$0xf]  ;;  %v3129_v21 = vld [vmem:[#allocation7 + $0x260] sm:$0xf0]  ;;  %732 = vmatpush.bf16.msrb.mxu1 %v3786_v50  ;;  %745 = vmatpush.bf16.msrb.mxu2 %v3788_v54  ;;  %v3800_v37 = vor.u32 %v3278_v14, %v2937_v16 }
  0x40   :  { %5099 = vst [vmem:[#allocation52_spill] sm:$0xff] %v3786_v50  ;;  %v2911_v40 = vld [vmem:[#allocation7 + $0x98] sm:$0xf]  ;;  %v3275_v41 = vld [vmem:[#allocation7 + $0xac] sm:$0xf0]  ;;  %758 = vmatpush.bf16.msrb.mxu3 %v3791_v5  ;;  %v3803_v43 = vor.u32 %v3326_v20, %v3129_v21 }
  0x41   :  { %5100 = vst [vmem:[#allocation53_spill] sm:$0xff] %v3788_v54  ;;  %v3103_v42 = vld [vmem:[#allocation7 + $0x218] sm:$0xf]  ;;  %v3323_v48 = vld [vmem:[#allocation7 + $0x22c] sm:$0xf0]  ;;  %v3806_v50 = vor.u32 %v3275_v41, %v2911_v40 }
  0x42   :  { %5101 = vst [vmem:[#allocation54_spill] sm:$0xff] %v3791_v5  ;;  %v3272_v62 = vld [vmem:[#allocation7 + $0x9c] sm:$0xf]  ;;  %v2913_v61 = vld [vmem:[#allocation7 + $0xb0] sm:$0xf0]  ;;  %720 = vmatpush.bf16.msrb.mxu0 %v3794_v32  ;;  %v3810_v3 = vor.u32 %v3323_v48, %v3103_v42 }
  0x43   :  { %5102 = vst [vmem:[#allocation55_spill] sm:$0xff] %v3794_v32  ;;  %v3320_v55 = vld [vmem:[#allocation7 + $0x21c] sm:$0xf]  ;;  %v3105_v2 = vld [vmem:[#allocation7 + $0x230] sm:$0xf0]  ;;  %733 = vmatpush.bf16.msrb.mxu1 %v3798_v33  ;;  %746 = vmatpush.bf16.msrb.mxu2 %v3800_v37  ;;  %v3812_v12 = vor.u32 %v3272_v62, %v2913_v61 }
  0x44   :  { %5103 = vst [vmem:[#allocation56_spill] sm:$0xff] %v3798_v33  ;;  %v2887_v14 = vld [vmem:[#allocation7 + $0x68] sm:$0xf]  ;;  %v3269_v16 = vld [vmem:[#allocation7 + $0x7c] sm:$0xf0]  ;;  %759 = vmatpush.bf16.msrb.mxu3 %v3803_v43  ;;  %v3815_v21 = vor.u32 %v3320_v55, %v3105_v2 }
  0x45   :  { %5104 = vst [vmem:[#allocation57_spill] sm:$0xff] %v3800_v37  ;;  %v3079_v20 = vld [vmem:[#allocation7 + $0x1e8] sm:$0xf]  ;;  %v3317_v5 = vld [vmem:[#allocation7 + $0x1fc] sm:$0xf0]  ;;  %v3818_v33 = vor.u32 %v3269_v16, %v2887_v14 }
  0x46   :  { %5105 = vst [vmem:[#allocation58_spill] sm:$0xff] %v3803_v43  ;;  %v3266_v54 = vld [vmem:[#allocation7 + $0x6c] sm:$0xf]  ;;  %v2889_v32 = vld [vmem:[#allocation7 + $0x80] sm:$0xf0]  ;;  %721 = vmatpush.bf16.msrb.mxu0 %v3806_v50  ;;  %v3822_v61 = vor.u32 %v3317_v5, %v3079_v20 }
  0x47   :  { %5106 = vst [vmem:[#allocation59_spill] sm:$0xff] %v3806_v50  ;;  %v3314_v40 = vld [vmem:[#allocation7 + $0x1ec] sm:$0xf]  ;;  %v3081_v41 = vld [vmem:[#allocation7 + $0x200] sm:$0xf0]  ;;  %734 = vmatpush.bf16.msrb.mxu1 %v3810_v3  ;;  %747 = vmatpush.bf16.msrb.mxu2 %v3812_v12  ;;  %v3824_v62 = vor.u32 %v3266_v54, %v2889_v32 }
  0x48   :  { %5107 = vst [vmem:[#allocation60_spill] sm:$0xff] %v3810_v3  ;;  %v2863_v42 = vld [vmem:[#allocation7 + $0x38] sm:$0xf]  ;;  %v3263_v48 = vld [vmem:[#allocation7 + $0x4c] sm:$0xf0]  ;;  %760 = vmatpush.bf16.msrb.mxu3 %v3815_v21  ;;  %v3827_v2 = vor.u32 %v3314_v40, %v3081_v41 }
  0x49   :  { %5108 = vst [vmem:[#allocation61_spill] sm:$0xff] %v3812_v12  ;;  %v3055_v55 = vld [vmem:[#allocation7 + $0x1b8] sm:$0xf]  ;;  %v3311_v43 = vld [vmem:[#allocation7 + $0x1cc] sm:$0xf0]  ;;  %v3830_v3 = vor.u32 %v3263_v48, %v2863_v42 }
  0x4a   :  { %5109 = vst [vmem:[#allocation62_spill] sm:$0xff] %v3815_v21  ;;  %v3260_v37 = vld [vmem:[#allocation7 + $0x3c] sm:$0xf]  ;;  %v2865_v50 = vld [vmem:[#allocation7 + $0x50] sm:$0xf0]  ;;  %722 = vmatpush.bf16.msrb.mxu0 %v3818_v33  ;;  %v3834_v54 = vor.u32 %v3311_v43, %v3055_v55 }
  0x4b   :  { %5110 = vst [vmem:[#allocation63_spill] sm:$0xff] %v3818_v33  ;;  %v3308_v14 = vld [vmem:[#allocation7 + $0x1bc] sm:$0xf]  ;;  %v3057_v16 = vld [vmem:[#allocation7 + $0x1d0] sm:$0xf0]  ;;  %735 = vmatpush.bf16.msrb.mxu1 %v3822_v61  ;;  %748 = vmatpush.bf16.msrb.mxu2 %v3824_v62  ;;  %v3836_v32 = vor.u32 %v3260_v37, %v2865_v50 }
  0x4c   :  { %5111 = vst [vmem:[#allocation64_spill] sm:$0xff] %v3822_v61  ;;  %v2839_v5 = vld [vmem:[#allocation7 + $0x8] sm:$0xf]  ;;  %v3257_v20 = vld [vmem:[#allocation7 + $0x1c] sm:$0xf0]  ;;  %761 = vmatpush.bf16.msrb.mxu3 %v3827_v2  ;;  %v3839_v12 = vor.u32 %v3308_v14, %v3057_v16 }
  0x4d   :  { %5112 = vst [vmem:[#allocation65_spill] sm:$0xff] %v3824_v62  ;;  %v3031_v40 = vld [vmem:[#allocation7 + $0x188] sm:$0xf]  ;;  %v3305_v41 = vld [vmem:[#allocation7 + $0x19c] sm:$0xf0]  ;;  %v3842_v61 = vor.u32 %v3257_v20, %v2839_v5 }
  0x4e   :  { %5113 = vst [vmem:[#allocation66_spill] sm:$0xff] %v3827_v2  ;;  %v3254_v21 = vld [vmem:[#allocation7 + $0xc] sm:$0xf]  ;;  %v2841_v33 = vld [vmem:[#allocation7 + $0x20] sm:$0xf0]  ;;  %723 = vmatpush.bf16.msrb.mxu0 %v3830_v3  ;;  %v3846_v55 = vor.u32 %v3305_v41, %v3031_v40 }
  0x4f   :  { %5114 = vst [vmem:[#allocation67_spill] sm:$0xff] %v3830_v3  ;;  %v3302_v42 = vld [vmem:[#allocation7 + $0x18c] sm:$0xf]  ;;  %v3033_v48 = vld [vmem:[#allocation7 + $0x1a0] sm:$0xf0]  ;;  %736 = vmatpush.bf16.msrb.mxu1 %v3834_v54  ;;  %749 = vmatpush.bf16.msrb.mxu2 %v3836_v32  ;;  %v3848_v14 = vor.u32 %v3254_v21, %v2841_v33 }
  0x50   :  { %5115 = vst [vmem:[#allocation68_spill] sm:$0xff] %v3834_v54  ;;  %v3015_v38 = vld [vmem:[#allocation7 + $0x160] sm:$0xf]  ;;  %v3300_v49 = vld [vmem:[#allocation7 + $0x174] sm:$0xf0]  ;;  %762 = vmatpush.bf16.msrb.mxu3 %v3839_v12  ;;  %v3851_v62 = vor.u32 %v3302_v42, %v3033_v48 }
  0x51   :  { %5116 = vst [vmem:[#allocation69_spill] sm:$0xff] %v3836_v32  ;;  %v3207_v27 = vld [vmem:[#allocation7 + $0x2e0] sm:$0xf]  ;;  %v3348_v43 = vld [vmem:[#allocation7 + $0x2f4] sm:$0xf0]  ;;  %v3853_v3 = vor.u32 %v3300_v49, %v3015_v38 }
  0x52   :  { %5117 = vst [vmem:[#allocation70_spill] sm:$0xff] %v3839_v12  ;;  %v3297_v50 = vld [vmem:[#allocation7 + $0x164] sm:$0xf]  ;;  %v3017_v37 = vld [vmem:[#allocation7 + $0x178] sm:$0xf0]  ;;  %v3855_v5 = vor.u32 %v3348_v43, %v3207_v27  ;;  %724 = vmatpush.bf16.msrb.mxu0 %v3842_v61 }
  0x53   :  { %5118 = vst [vmem:[#allocation71_spill] sm:$0xff] %v3842_v61  ;;  %v3345_v16 = vld [vmem:[#allocation7 + $0x2e4] sm:$0xf]  ;;  %v3209_v2 = vld [vmem:[#allocation7 + $0x2f8] sm:$0xf0]  ;;  %v3857_v20 = vor.u32 %v3297_v50, %v3017_v37  ;;  %737 = vmatpush.bf16.msrb.mxu1 %v3846_v55  ;;  %750 = vmatpush.bf16.msrb.mxu2 %v3848_v14 }
  0x54   :  { %5119 = vst [vmem:[#allocation72_spill] sm:$0xff] %v3846_v55  ;;  %v2991_v31 = vld [vmem:[#allocation7 + $0x130] sm:$0xf]  ;;  %v3294_v54 = vld [vmem:[#allocation7 + $0x144] sm:$0xf0]  ;;  %v3860_v40 = vor.u32 %v3345_v16, %v3209_v2  ;;  %763 = vmatpush.bf16.msrb.mxu3 %v3851_v62  ;;  %v3877_v16 = vld [vmem:[%s4870_s1] sm:$0xff] }
  0x55   :  { %5120 = vst [vmem:[#allocation73_spill] sm:$0xff] %v3848_v14  ;;  %v3183_v11 = vld [vmem:[#allocation7 + $0x2b0] sm:$0xf]  ;;  %v3342_v33 = vld [vmem:[#allocation7 + $0x2c4] sm:$0xf0]  ;;  %v3866_v27 = vor.u32 %v3294_v54, %v2991_v31  ;;  %725 = vmatmul.bf16.vlgmr.msrb.gmra.mxu0 %v3756_v19  ;;  %vm3217_vm0 = vcmp.gt.s32.totalorder %v3877_v16, 0 }
  0x56   :  { %5121 = vst [vmem:[#allocation74_spill] sm:$0xff] %v3851_v62  ;;  %v3291_v21 = vld [vmem:[#allocation7 + $0x134] sm:$0xf]  ;;  %v2993_v41 = vld [vmem:[#allocation7 + $0x148] sm:$0xf0]  ;;  %769 = vmatpush.bf16.msra.mxu0 %v3853_v3  ;;  %v3870_v2 = vor.u32 %v3342_v33, %v3183_v11  ;;  %751 = vmatmul.bf16.vlgmr.msrb.gmra.mxu2 %v3756_v19  ;;  %vm3222_vm1 = vcmp.gt.s32.totalorder %v3877_v16, 1 }
  0x57   :  { %5122 = vst [vmem:[#allocation75_spill] sm:$0xff] %v3853_v3  ;;  %v3339_v38 = vld [vmem:[#allocation7 + $0x2b4] sm:$0xf]  ;;  %v3185_v49 = vld [vmem:[#allocation7 + $0x2c8] sm:$0xf0]  ;;  %782 = vmatpush.bf16.msra.mxu1 %v3855_v5  ;;  %795 = vmatpush.bf16.msra.mxu2 %v3857_v20  ;;  %v3872_v43 = vor.u32 %v3291_v21, %v2993_v41  ;;  %v4943_v41 = vmov 0  }
  0x58   :  { %5123 = vst [vmem:[#allocation76_spill] sm:$0xff] %v3855_v5  ;;  %v2967_v42 = vld [vmem:[#allocation7 + $0x100] sm:$0xf]  ;;  %v3288_v48 = vld [vmem:[#allocation7 + $0x114] sm:$0xf0]  ;;  %808 = vmatpush.bf16.msra.mxu3 %v3860_v40  ;;  %v3881_v31 = vor.u32 %v3339_v38, %v3185_v49  ;;  %738 = vmatmul.bf16.vlgmr.msrb.gmra.mxu1 %v3762_v23  ;;  %v917_v38 = vsel %vm3217_vm0, 1, %v4943_v41 }
  0x59   :  { %5124 = vst [vmem:[#allocation77_spill] sm:$0xff] %v3857_v20  ;;  %v3159_v50 = vld [vmem:[#allocation7 + $0x280] sm:$0xf]  ;;  %v3336_v37 = vld [vmem:[#allocation7 + $0x294] sm:$0xf0]  ;;  %764 = vmatmul.bf16.vlgmr.msrb.gmra.mxu3 %v3762_v23  ;;  %v3888_v21 = vor.u32 %v3288_v48, %v2967_v42  ;;  %3358 = vset.pattern.permute.xlu0 %v4943_v41  ;;  %vm3247_vm2 = vcmp.gt.s32.totalorder %v3877_v16, 6 }
  0x5a   :  { %5125 = vst [vmem:[#allocation78_spill] sm:$0xff] %v3860_v40  ;;  %v3285_v54 = vld [vmem:[#allocation7 + $0x104] sm:$0xf]  ;;  %v2969_v5 = vld [vmem:[#allocation7 + $0x118] sm:$0xf0]  ;;  %770 = vmatpush.bf16.msra.mxu0 %v3866_v27  ;;  %v3893_v49 = vor.u32 %v3336_v37, %v3159_v50  ;;  %919 = vperm.xlu0 %3358, %v917_v38  }
  0x5b   :  { %5126 = vst [vmem:[#allocation79_spill] sm:$0xff] %v3866_v27  ;;  %v3333_v11 = vld [vmem:[#allocation7 + $0x284] sm:$0xf]  ;;  %v3161_v33 = vld [vmem:[#allocation7 + $0x298] sm:$0xf0]  ;;  %783 = vmatpush.bf16.msra.mxu1 %v3870_v2  ;;  %796 = vmatpush.bf16.msra.mxu2 %v3872_v43  ;;  %v3895_v40 = vor.u32 %v3285_v54, %v2969_v5 }
  0x5c   :  { %5127 = vst [vmem:[#allocation80_spill] sm:$0xff] %v3870_v2  ;;  %v2943_v20 = vld [vmem:[#allocation7 + $0xd0] sm:$0xf]  ;;  %v3282_v3 = vld [vmem:[#allocation7 + $0xe4] sm:$0xf0]  ;;  %809 = vmatpush.bf16.msra.mxu3 %v3881_v31  ;;  %v3898_v55 = vor.u32 %v3333_v11, %v3161_v33  ;;  %3359 = vset.pattern.permute.xlu1 %v4943_v41 }
  0x5d   :  { %5128 = vst [vmem:[#allocation81_spill] sm:$0xff] %v3872_v43  ;;  %v3135_v62 = vld [vmem:[#allocation7 + $0x250] sm:$0xf]  ;;  %v3330_v42 = vld [vmem:[#allocation7 + $0x264] sm:$0xf0]  ;;  %v3903_v5 = vor.u32 %v3282_v3, %v2943_v20  ;;  %3360 = vset.pattern.permute.xlu2 %v4943_v41 }
  0x5e   :  { %5129 = vst [vmem:[#allocation82_spill] sm:$0xff] %v3881_v31  ;;  %v3279_v48 = vld [vmem:[#allocation7 + $0xd4] sm:$0xf]  ;;  %v2945_v27 = vld [vmem:[#allocation7 + $0xe8] sm:$0xf0]  ;;  %771 = vmatpush.bf16.msra.mxu0 %v3888_v21  ;;  %v3908_v37 = vor.u32 %v3330_v42, %v3135_v62  ;;  %v5138_v62 = vmov 0  }
  0x5f   :  { %5130 = vst [vmem:[#allocation83_spill] sm:$0xff] %v3888_v21  ;;  %v3327_v14 = vld [vmem:[#allocation7 + $0x254] sm:$0xf]  ;;  %v3137_v2 = vld [vmem:[#allocation7 + $0x268] sm:$0xf0]  ;;  %784 = vmatpush.bf16.msra.mxu1 %v3893_v49  ;;  %797 = vmatpush.bf16.msra.mxu2 %v3895_v40  ;;  %v3910_v54 = vor.u32 %v3279_v48, %v2945_v27  ;;  %v1186_v27 = vsel %vm3222_vm1, 1, %v5138_v62 }
  0x60   :  { %5131 = vst [vmem:[#allocation84_spill] sm:$0xff] %v3893_v49  ;;  %v2919_v50 = vld [vmem:[#allocation7 + $0xa0] sm:$0xf]  ;;  %v3276_v11 = vld [vmem:[#allocation7 + $0xb4] sm:$0xf0]  ;;  %810 = vmatpush.bf16.msra.mxu3 %v3898_v55  ;;  %v3914_v38 = vor.u32 %v3327_v14, %v3137_v2 }
  0x61   :  { %5132 = vst [vmem:[#allocation85_spill] sm:$0xff] %v3895_v40  ;;  %v3111_v33 = vld [vmem:[#allocation7 + $0x220] sm:$0xf]  ;;  %v3324_v3 = vld [vmem:[#allocation7 + $0x234] sm:$0xf0]  ;;  %v3917_v49 = vor.u32 %v3276_v11, %v2919_v50 }
  0x62   :  { %5133 = vst [vmem:[#allocation86_spill] sm:$0xff] %v3898_v55  ;;  %v3273_v20 = vld [vmem:[#allocation7 + $0xa4] sm:$0xf]  ;;  %v2921_v31 = vld [vmem:[#allocation7 + $0xb8] sm:$0xf0]  ;;  %772 = vmatpush.bf16.msra.mxu0 %v3903_v5  ;;  %v3922_v42 = vor.u32 %v3324_v3, %v3111_v33  ;;  %1188 = vperm.xlu0 %3358, %v1186_v27  }
  0x63   :  { %5134 = vst [vmem:[#allocation87_spill] sm:$0xff] %v3903_v5  ;;  %v3321_v41 = vld [vmem:[#allocation7 + $0x224] sm:$0xf]  ;;  %v3113_v21 = vld [vmem:[#allocation7 + $0x238] sm:$0xf0]  ;;  %785 = vmatpush.bf16.msra.mxu1 %v3908_v37  ;;  %798 = vmatpush.bf16.msra.mxu2 %v3910_v54  ;;  %v3924_v48 = vor.u32 %v3273_v20, %v2921_v31 }
  0x64   :  { %5135 = vst [vmem:[#allocation88_spill] sm:$0xff] %v3908_v37  ;;  %v2895_v14 = vld [vmem:[#allocation7 + $0x70] sm:$0xf]  ;;  %v3270_v2 = vld [vmem:[#allocation7 + $0x84] sm:$0xf0]  ;;  %811 = vmatpush.bf16.msra.mxu3 %v3914_v38  ;;  %v3927_v40 = vor.u32 %v3321_v41, %v3113_v21 }
  0x65   :  { %5136 = vst [vmem:[#allocation89_spill] sm:$0xff] %v3914_v38  ;;  %v3087_v55 = vld [vmem:[#allocation7 + $0x1f0] sm:$0xf]  ;;  %v3318_v5 = vld [vmem:[#allocation7 + $0x204] sm:$0xf0]  ;;  %v3930_v37 = vor.u32 %v3270_v2, %v2895_v14 }
  0x66   :  { %5137 = vst [vmem:[#allocation90_spill] sm:$0xff] %v3917_v49  ;;  %v3267_v50 = vld [vmem:[#allocation7 + $0x74] sm:$0xf]  ;;  %v2897_v11 = vld [vmem:[#allocation7 + $0x88] sm:$0xf0]  ;;  %773 = vmatpush.bf16.msra.mxu0 %v3917_v49  ;;  %v3934_v31 = vor.u32 %v3318_v5, %v3087_v55  ;;  %v2531_v55 = vsel %vm3247_vm2, 1, %v5138_v62 }
  0x67   :  { %5139 = vst [vmem:[#allocation91_spill] sm:$0xff] %v3922_v42  ;;  %v3315_v43 = vld [vmem:[#allocation7 + $0x1f4] sm:$0xf]  ;;  %v3089_v12 = vld [vmem:[#allocation7 + $0x208] sm:$0xf0]  ;;  %786 = vmatpush.bf16.msra.mxu1 %v3922_v42  ;;  %799 = vmatpush.bf16.msra.mxu2 %v3924_v48  ;;  %v3936_v3 = vor.u32 %v3267_v50, %v2897_v11 }
  0x68   :  { %5140 = vst [vmem:[#allocation92_spill] sm:$0xff] %v3927_v40  ;;  %v2871_v33 = vld [vmem:[#allocation7 + $0x40] sm:$0xf]  ;;  %v3264_v21 = vld [vmem:[#allocation7 + $0x54] sm:$0xf0]  ;;  %812 = vmatpush.bf16.msra.mxu3 %v3927_v40  ;;  %v3940_v20 = vor.u32 %v3315_v43, %v3089_v12 }
  0x69   :  { %5141 = vst [vmem:[#allocation93_spill] sm:$0xff] %v3930_v37  ;;  %v3063_v41 = vld [vmem:[#allocation7 + $0x1c0] sm:$0xf]  ;;  %v3312_v27 = vld [vmem:[#allocation7 + $0x1d4] sm:$0xf0]  ;;  %v3943_v42 = vor.u32 %v3264_v21, %v2871_v33 }
  0x6a   :  { %5142 = vst [vmem:[#allocation94_spill] sm:$0xff] %v3934_v31  ;;  %v3261_v14 = vld [vmem:[#allocation7 + $0x44] sm:$0xf]  ;;  %v2873_v2 = vld [vmem:[#allocation7 + $0x58] sm:$0xf0]  ;;  %774 = vmatpush.bf16.msra.mxu0 %v3930_v37  ;;  %v3948_v16 = vor.u32 %v3312_v27, %v3063_v41  ;;  %2533 = vperm.xlu0 %3358, %v2531_v55  }
  0x6b   :  { %v3309_v38 = vld [vmem:[#allocation7 + $0x1c4] sm:$0xf]  ;;  %v3065_v49 = vld [vmem:[#allocation7 + $0x1d8] sm:$0xf0]  ;;  %787 = vmatpush.bf16.msra.mxu1 %v3934_v31  ;;  %800 = vmatpush.bf16.msra.mxu2 %v3936_v3  ;;  %v3950_v5 = vor.u32 %v3261_v14, %v2873_v2  ;;  %v2847_v12 = vld [vmem:[#allocation7 + $0x10] sm:$0xf] }
  0x6c   :  { %v3258_v43 = vld [vmem:[#allocation7 + $0x24] sm:$0xf0]  ;;  %v3039_v50 = vld [vmem:[#allocation7 + $0x190] sm:$0xf]  ;;  %813 = vmatpush.bf16.msra.mxu3 %v3940_v20  ;;  %v3953_v11 = vor.u32 %v3309_v38, %v3065_v49  ;;  %v3255_v33 = vld [vmem:[#allocation7 + $0x14] sm:$0xf] }
  0x6d   :  { %v3306_v40 = vld [vmem:[#allocation7 + $0x1a4] sm:$0xf0]  ;;  %v2849_v21 = vld [vmem:[#allocation7 + $0x28] sm:$0xf0]  ;;  %v3303_v37 = vld [vmem:[#allocation7 + $0x194] sm:$0xf]  ;;  %v3956_v31 = vor.u32 %v3258_v43, %v2847_v12 }
  0x6e   :  { %v3041_v62 = vld [vmem:[#allocation7 + $0x1a8] sm:$0xf0]  ;;  %775 = vmatpush.bf16.msra.mxu0 %v3943_v42  ;;  %v3960_v41 = vor.u32 %v3306_v40, %v3039_v50  ;;  %v3962_v27 = vor.u32 %v3255_v33, %v2849_v21  ;;  %v5149_v38 = vld [vmem:[#allocation50_spill] sm:$0xff]  ;;  %v5152_v2 = vld [vmem:[#allocation55_spill] sm:$0xff] }
  0x6f   :  { %788 = vmatpush.bf16.msra.mxu1 %v3948_v16  ;;  %801 = vmatpush.bf16.msra.mxu2 %v3950_v5  ;;  %v3965_v49 = vor.u32 %v3303_v37, %v3041_v62  ;;  %v5147_v40 = vld [vmem:[#allocation48_spill] sm:$0xff]  ;;  %v5148_v37 = vld [vmem:[#allocation51_spill] sm:$0xff]  ;;  %v5150_v62 = vld [vmem:[#allocation53_spill] sm:$0xff] }
  0x70   :  { %5143 = vst [vmem:[#allocation95_spill] sm:$0xff] %v3960_v41  ;;  %814 = vmatpush.bf16.msra.mxu3 %v3953_v11  ;;  %v5151_v14 = vld [vmem:[#allocation52_spill] sm:$0xff]  ;;  %v5153_v55 = vld [vmem:[#allocation54_spill] sm:$0xff]  ;;  %v5154_v12 = vld [vmem:[#allocation57_spill] sm:$0xff] }
  0x71   :  { %5144 = vst [vmem:[#allocation96_spill] sm:$0xff] %v3965_v49  ;;  %v5155_v43 = vld [vmem:[#allocation56_spill] sm:$0xff]  ;;  %v5156_v50 = vld [vmem:[#allocation59_spill] sm:$0xff]  ;;  %v5157_v33 = vld [vmem:[#allocation58_spill] sm:$0xff] }
  0x72   :  { %776 = vmatpush.bf16.msra.mxu0 %v3956_v31  ;;  %v5158_v21 = vld [vmem:[#allocation61_spill] sm:$0xff] }
  0x73   :  { %789 = vmatpush.bf16.msra.mxu1 %v3960_v41  ;;  %802 = vmatpush.bf16.msra.mxu2 %v3962_v27 }
  0x74   :  { %815 = vmatpush.bf16.msra.mxu3 %v3965_v49 }
  0x75   :  { %777 = vmatmul.bf16.vlgmr.msra.gmra.mxu0 %v3756_v19 }
  0x76   :  { %933 = vmatpush.bf16.msrb.mxu0 %v3649_v4  ;;  %790 = vmatmul.bf16.vlgmr.msra.gmra.mxu1 %v3762_v23 }
  0x77   :  { %959 = vmatpush.bf16.msrb.mxu2 %v3653_v9  ;;  %816 = vmatmul.bf16.vlgmr.msra.gmra.mxu3 %v3762_v23  ;;  %v5146_v23 = vld [vmem:[#allocation49_spill] sm:$0xff] }
  0x78   :  { %803 = vmatmul.bf16.vlgmr.msra.gmra.mxu2 %v3756_v19  ;;  %946 = vmatpush.bf16.msrb.mxu1 %v3651_v8  ;;  %v5145_v19 = vld [vmem:[#allocation46_spill] sm:$0xff] }
  0x79   :  { %972 = vmatpush.bf16.msrb.mxu3 %v3656_v13 }
  0x7a   :  { %934 = vmatpush.bf16.msrb.mxu0 %v3660_v17 }
  0x7b   :  { %960 = vmatpush.bf16.msrb.mxu2 %v3665_v22 }
  0x7c   :  { %947 = vmatpush.bf16.msrb.mxu1 %v3662_v18 }
  0x7d   :  { %973 = vmatpush.bf16.msrb.mxu3 %v3667_v26 }
  0x7e   :  { %935 = vmatpush.bf16.msrb.mxu0 %v3670_v30 }
  0x7f   :  { %961 = vmatpush.bf16.msrb.mxu2 %v3676_v35 }
  0x80   :  { %948 = vmatpush.bf16.msrb.mxu1 %v3674_v34 }
  0x81   :  { %974 = vmatpush.bf16.msrb.mxu3 %v3679_v39 }
  0x82   :  { %936 = vmatpush.bf16.msrb.mxu0 %v3682_v45 }
  0x83   :  { %962 = vmatpush.bf16.msrb.mxu2 %v3688_v47 }
  0x84   :  { %949 = vmatpush.bf16.msrb.mxu1 %v3686_v46 }
  0x85   :  { %975 = vmatpush.bf16.msrb.mxu3 %v3691_v51 }
  0x86   :  { %937 = vmatpush.bf16.msrb.mxu0 %v3694_v57 }
  0x87   :  { %963 = vmatpush.bf16.msrb.mxu2 %v3700_v59 }
  0x88   :  { %950 = vmatpush.bf16.msrb.mxu1 %v3698_v58 }
  0x89   :  { %976 = vmatpush.bf16.msrb.mxu3 %v3703_v63 }
  0x8a   :  { %938 = vmatpush.bf16.msrb.mxu0 %v3706_v6 }
  0x8b   :  { %964 = vmatpush.bf16.msrb.mxu2 %v3712_v10 }
  0x8c   :  { %951 = vmatpush.bf16.msrb.mxu1 %v3710_v7 }
  0x8d   :  { %977 = vmatpush.bf16.msrb.mxu3 %v3715_v15 }
  0x8e   :  { %939 = vmatpush.bf16.msrb.mxu0 %v3718_v24 }
  0x8f   :  { %965 = vmatpush.bf16.msrb.mxu2 %v3724_v29 }
  0x90   :  { %952 = vmatpush.bf16.msrb.mxu1 %v3722_v28 }
  0x91   :  { %978 = vmatpush.bf16.msrb.mxu3 %v3727_v36 }
  0x92   :  { %940 = vmatpush.bf16.msrb.mxu0 %v3730_v44 }
  0x93   :  { %966 = vmatpush.bf16.msrb.mxu2 %v3736_v53 }
  0x94   :  { %953 = vmatpush.bf16.msrb.mxu1 %v3734_v52  ;;  %v165_v52 = vld [vmem:[#allocation4 + $0x8] sm:$0xff] }
  0x95   :  { %979 = vmatpush.bf16.msrb.mxu3 %v3739_v56 }
  0x96   :  { %985 = vmatpush.bf16.msra.mxu0 %v3741_v60  ;;  %v168_v60 = vld [vmem:[#allocation4 + $0x20] sm:$0xff] }
  0x97   :  { %1011 = vmatpush.bf16.msra.mxu2 %v3749_v1 }
  0x98   :  { %998 = vmatpush.bf16.msra.mxu1 %v3747_v0 }
  0x99   :  { %1024 = vmatpush.bf16.msra.mxu3 %v5145_v19 }
  0x9a   :  { %986 = vmatpush.bf16.msra.mxu0 %v3766_v25 }
  0x9b   :  { %1012 = vmatpush.bf16.msra.mxu2 %v5146_v23 }
  0x9c   :  { %999 = vmatpush.bf16.msra.mxu1 %v5147_v40  ;;  %v5159_v40 = vld [vmem:[#allocation60_spill] sm:$0xff] }
  0x9d   :  { %1025 = vmatpush.bf16.msra.mxu3 %v5149_v38  ;;  %v5160_v38 = vld [vmem:[#allocation63_spill] sm:$0xff] }
  0x9e   :  { %987 = vmatpush.bf16.msra.mxu0 %v5148_v37 }
  0x9f   :  { %1013 = vmatpush.bf16.msra.mxu2 %v5150_v62  ;;  %v5161_v62 = vld [vmem:[#allocation62_spill] sm:$0xff] }
  0xa0   :  { %1000 = vmatpush.bf16.msra.mxu1 %v5151_v14  ;;  %v5162_v14 = vld [vmem:[#allocation65_spill] sm:$0xff] }
  0xa1   :  { %1026 = vmatpush.bf16.msra.mxu3 %v5153_v55  ;;  %v5164_v55 = vld [vmem:[#allocation67_spill] sm:$0xff] }
  0xa2   :  { %988 = vmatpush.bf16.msra.mxu0 %v5152_v2  ;;  %v5163_v2 = vld [vmem:[#allocation64_spill] sm:$0xff] }
  0xa3   :  { %1014 = vmatpush.bf16.msra.mxu2 %v5154_v12  ;;  %v5165_v12 = vld [vmem:[#allocation66_spill] sm:$0xff] }
  0xa4   :  { %1001 = vmatpush.bf16.msra.mxu1 %v5155_v43  ;;  %v5166_v43 = vld [vmem:[#allocation68_spill] sm:$0xff] }
  0xa5   :  { %1027 = vmatpush.bf16.msra.mxu3 %v5157_v33  ;;  %v5167_v33 = vld [vmem:[#allocation70_spill] sm:$0xff] }
  0xa6   :  { %989 = vmatpush.bf16.msra.mxu0 %v5156_v50 }
  0xa7   :  { %1015 = vmatpush.bf16.msra.mxu2 %v5158_v21  ;;  %v164_v21 = vld [vmem:[#allocation4] sm:$0xff] }
  0xa8   :  { %1002 = vmatpush.bf16.msra.mxu1 %v5159_v40  ;;  %v5168_v40 = vld [vmem:[#allocation73_spill] sm:$0xff] }
  0xa9   :  { %1028 = vmatpush.bf16.msra.mxu3 %v5161_v62  ;;  %v5170_v62 = vld [vmem:[#allocation74_spill] sm:$0xff] }
  0xaa   :  { %990 = vmatpush.bf16.msra.mxu0 %v5160_v38  ;;  %v5169_v38 = vld [vmem:[#allocation72_spill] sm:$0xff] }
  0xab   :  { %1016 = vmatpush.bf16.msra.mxu2 %v5162_v14 }
  0xac   :  { %1003 = vmatpush.bf16.msra.mxu1 %v5163_v2  ;;  %v4042_v2 = vld [vmem:[%s4873_s4] sm:$0x3f] }
  0xad   :  { %1029 = vmatpush.bf16.msra.mxu3 %v5165_v12 }
  0xae   :  { %991 = vmatpush.bf16.msra.mxu0 %v5164_v55 }
  0xaf   :  { %1017 = vmatpush.bf16.msra.mxu2 %v3836_v32  ;;  %v4045_v32 = vperm.slane %v4042_v2, 0 }
  0xb0   :  { %1004 = vmatpush.bf16.msra.mxu1 %v5166_v43 }
  0xb1   :  { %1030 = vmatpush.bf16.msra.mxu3 %v5167_v33  ;;  %5171 = vst [vmem:[#allocation97_spill] sm:$0xff] %v4045_v32 }
  0xb2   :  { %992 = vmatpush.bf16.msra.mxu0 %v3842_v61  ;;  %v674_v12 = vpop.f32.mrf.mxu0 }
  0xb3   :  { %1018 = vmatpush.bf16.msra.mxu2 %v5168_v40  ;;  %v675_v61 = vadd.f32 %v674_v12, %v4045_v32  ;;  %v4049_v40 = vperm.slane %v4042_v2, 1  ;;  %v4053_v32 = vperm.slane %v4042_v2, 2 }
  0xb4   :  { %1005 = vmatpush.bf16.msra.mxu1 %v5169_v38 }
  0xb5   :  { %1031 = vmatpush.bf16.msra.mxu3 %v5170_v62  ;;  %v687_v43 = vpop.f32.mrf.mxu1  ;;  %5172 = vst [vmem:[#allocation98_spill] sm:$0xff] %v4049_v40 }
  0xb6   :  { %v688_v14 = vadd.f32 %v687_v43, %v675_v61  ;;  %5173 = vst [vmem:[#allocation99_spill] sm:$0xff] %v4053_v32 }
  0xb8   :  { %v821_v37 = vadd.f32 %v688_v14, %v164_v21 }
  0xb9   :  { %v700_v55 = vpop.f32.mrf.mxu2 }
  0xba   :  { %v676_v38 = vpop.f32.mrf.mxu0  ;;  %v701_v50 = vadd.f32 %v700_v55, %v4049_v40  ;;  %v3213_v23 = vmul.f32 -1.442695, %v821_v37  ;;  %v166_v55 = vld [vmem:[#allocation4 + $0x10] sm:$0xff] }
  0xbc   :  { %v713_v33 = vpop.f32.mrf.mxu3  ;;  %3361 = vpow2.f32 %v3213_v23 }
  0xbd   :  { %v689_v62 = vpop.f32.mrf.mxu1  ;;  %v714_v56 = vadd.f32 %v713_v33, %v701_v50 }
  0xbf   :  { %v822_v25 = vadd.f32 %v714_v56, %v165_v52 }
  0xc1   :  { %v702_v19 = vpop.f32.mrf.mxu2  ;;  %v3214_v12 = vmul.f32 -1.442695, %v822_v25 }
  0xc2   :  { %v3362_v36 = vpop.eup %3361 }
  0xc3   :  { %3363 = vpow2.f32 %v3214_v12  ;;  %v829_v61 = vadd.f32 1.0, %v3362_v36  ;;  %v167_v36 = vld [vmem:[#allocation4 + $0x18] sm:$0xff] }
  0xc4   :  { %v715_v0 = vpop.f32.mrf.mxu3 }
  0xc5   :  { %v4057_v0 = vperm.slane %v4042_v2, 3  ;;  %3365 = vrcp.f32 %v829_v61  ;;  %vm836_vm3 = vweird.f32 %v829_v61 }
  0xc7   :  { %5174 = vst [vmem:[#allocation100_spill] sm:$0xff] %v4057_v0 }
  0xc9   :  { %v3364_v19 = vpop.eup %3363 }
  0xca   :  { %v4059_v56 = vadd.f32 1.0, %v3364_v19 }
  0xcc   :  { %vm851_vm7 = vweird.f32 %v4059_v56 }
  0xd2   :  { %v726_v38 = vpop.f32.mrf.mxu0 }
  0xd3   :  { %v727_v62 = vadd.f32 %v726_v38, %v4053_v32  ;;  %v3366_v38 = vpop.eup %3365 }
  0xd4   :  { %v832_v32 = vmul.f32 %v3366_v38, %v829_v61  ;;  %vm837_vm4 = vweird.f32 %v3366_v38 }
  0xd5   :  { %v739_v43 = vpop.f32.mrf.mxu1  ;;  %vm4073_vm5 = vmor %vm836_vm3, %vm837_vm4 }
  0xd6   :  { %v740_v14 = vadd.f32 %v739_v43, %v727_v62 }
  0xd8   :  { %v861_v52 = vadd.f32 %v740_v14, %v166_v55 }
  0xd9   :  { %v752_v23 = vpop.f32.mrf.mxu2 }
  0xda   :  { %v3215_v25 = vmul.f32 -1.442695, %v861_v52  ;;  %v753_v37 = vadd.f32 %v752_v23, %v4057_v0  ;;  %v728_v33 = vpop.f32.mrf.mxu0  ;;  %v833_v23 = vsub.f32 1.0, %v832_v32 }
  0xdc   :  { %v765_v50 = vpop.f32.mrf.mxu3  ;;  %3367 = vpow2.f32 %v3215_v25 }
  0xdd   :  { %v741_v21 = vpop.f32.mrf.mxu1  ;;  %v766_v12 = vadd.f32 %v765_v50, %v753_v37  ;;  %3369 = vrcp.f32 %v4059_v56  ;;  %v834_v37 = vmul.f32 %v3366_v38, %v833_v23 }
  0xdf   :  { %v862_v62 = vadd.f32 %v766_v12, %v167_v36  ;;  %v835_v32 = vadd.f32 %v3366_v38, %v834_v37 }
  0xe1   :  { %v3216_v43 = vmul.f32 -1.442695, %v862_v62  ;;  %v754_v55 = vpop.f32.mrf.mxu2  ;;  %v842_v62 = vand.u32 2147483648, %v829_v61  ;;  %v839_v37 = vsel %vm4073_vm5, %v3366_v38, %v835_v32  ;;  %v4094_v32 = vperm.slane %v4042_v2, 5 }
  0xe2   :  { %v3368_v40 = vpop.eup %3367 }
  0xe3   :  { %v869_v14 = vadd.f32 1.0, %v3368_v40  ;;  %3371 = vpow2.f32 %v3216_v43  ;;  %v4063_v52 = vpop.eup %3369  ;;  %v840_v40 = vand.u32 2147483647, %v829_v61  ;;  %v4071_v43 = vperm.slane %v4042_v2, 4  ;;  %5180 = vst [vmem:[#allocation102_spill] sm:$0xff] %v4094_v32 }
  0xe4   :  { %v767_v19 = vpop.f32.mrf.mxu3  ;;  %v847_v25 = vmul.f32 %v4063_v52, %v4059_v56  ;;  %vm852_vm8 = vweird.f32 %v4063_v52 }
  0xe5   :  { %3373 = vrcp.f32 %v869_v14  ;;  %5175 = vst [vmem:[#allocation101_spill] sm:$0xff] %v4071_v43  ;;  %vm4078_vm6 = vcmp.eq.f32.partialorder %v840_v40, 8.507059e+37  ;;  %v857_v40 = vand.u32 2147483648, %v4059_v56  ;;  %vm876_vm9 = vweird.f32 %v869_v14  ;;  %vm4096_vm11 = vmor %vm851_vm7, %vm852_vm8 }
  0xe6   :  { %v848_v36 = vsub.f32 1.0, %v847_v25  ;;  %v843_v25 = vor.u32 1.1754944e-38, %v842_v62  ;;  %v880_v53 = vand.u32 2147483647, %v869_v14 }
  0xe8   :  { %v849_v23 = vmul.f32 %v4063_v52, %v848_v36  ;;  %v855_v36 = vand.u32 2147483647, %v4059_v56  ;;  %v844_v38 = vsel %vm4078_vm6, %v843_v25, %v839_v37  ;;  %vm881_vm14 = vcmp.eq.f32.partialorder %v880_v53, 8.507059e+37 }
  0xe9   :  { %v3372_v33 = vpop.eup %3371 }
  0xea   :  { %v4067_v50 = vadd.f32 1.0, %v3372_v33  ;;  %vm856_vm13 = vcmp.eq.f32.partialorder %v855_v36, 8.507059e+37 }
  0xeb   :  { %v3374_v21 = vpop.eup %3373 }
  0xec   :  { %v872_v12 = vmul.f32 %v3374_v21, %v869_v14  ;;  %3375 = vrcp.f32 %v4067_v50  ;;  %vm877_vm10 = vweird.f32 %v3374_v21  ;;  %vm891_vm15 = vweird.f32 %v4067_v50 }
  0xed   :  { %vm4100_vm12 = vmor %vm876_vm9, %vm877_vm10 }
  0xee   :  { %v873_v55 = vsub.f32 1.0, %v872_v12 }
  0xf0   :  { %v874_v28 = vmul.f32 %v3374_v21, %v873_v55 }
  0xf2   :  { %v778_v33 = vpop.f32.mrf.mxu0  ;;  %v3376_v12 = vpop.eup %3375  ;;  %v875_v56 = vadd.f32 %v3374_v21, %v874_v28 }
  0xf3   :  { %v779_v61 = vadd.f32 %v778_v33, %v4071_v43  ;;  %v791_v1 = vpop.f32.mrf.mxu1  ;;  %v887_v62 = vmul.f32 %v3376_v12, %v4067_v50  ;;  %v850_v33 = vadd.f32 %v4063_v52, %v849_v23  ;;  %v882_v43 = vand.u32 2147483648, %v869_v14 }
  0xf4   :  { %v858_v23 = vor.u32 1.1754944e-38, %v857_v40  ;;  %v879_v14 = vsel %vm4100_vm12, %v3374_v21, %v875_v56  ;;  %vm892_vm0 = vweird.f32 %v3376_v12 }
  0xf5   :  { %v792_v55 = vadd.f32 %v791_v1, %v779_v61  ;;  %v888_v44 = vsub.f32 1.0, %v887_v62  ;;  %v854_v2 = vsel %vm4096_vm11, %v4063_v52, %v850_v33  ;;  %v883_v25 = vor.u32 1.1754944e-38, %v882_v43  ;;  %vm893_vm1 = vmor %vm891_vm15, %vm892_vm0 }
  0xf6   :  { %v859_v40 = vsel %vm856_vm13, %v858_v23, %v854_v2  ;;  %v895_v43 = vand.u32 2147483647, %v4067_v50  ;;  %v5185_v23 = vld [vmem:[#allocation42_spill] sm:$0xff] }
  0xf7   :  { %v901_v15 = vmul.f32 %v844_v38, %v792_v55  ;;  %v889_v37 = vmul.f32 %v3376_v12, %v888_v44  ;;  %v897_v44 = vand.u32 2147483648, %v4067_v50 }
  0xf8   :  { %vm896_vm2 = vcmp.eq.f32.partialorder %v895_v43, 8.507059e+37  ;;  %v5190_v43 = vld [vmem:[#allocation81_spill] sm:$0xff] }
  0xf9   :  { %v903_v61 = vadd.f32 %v901_v15, %v168_v60  ;;  %v169_v15 = vld [vmem:[#allocation4 + $0x28] sm:$0xff]  ;;  %v884_v60 = vsel %vm881_vm14, %v883_v25, %v879_v14  ;;  %v890_v38 = vadd.f32 %v3376_v12, %v889_v37 }
  0xfa   :  { %v817_v28 = vpop.f32.mrf.mxu3  ;;  %v780_v62 = vpop.f32.mrf.mxu0  ;;  %v907_v21 = vsub.f32 1.0, %v884_v60 }
  0xfb   :  { %v804_v0 = vpop.f32.mrf.mxu2  ;;  %3377 = vtanh.f32 %v903_v61  ;;  %v793_v55 = vpop.f32.mrf.mxu1  ;;  %v894_v19 = vsel %vm893_vm1, %v3376_v12, %v890_v38  ;;  %v911_v61 = vmul.f32 %v884_v60, %v5185_v23 }
  0xfc   :  { %v805_v7 = vadd.f32 %v804_v0, %v4094_v32  ;;  %v920_v0 = vpop.permute.xlu0 %919  ;;  %v5186_v55 = vld [vmem:[#allocation43_spill] sm:$0xff] }
  0xfd   :  { %vm921_vm3 = vcmp.eq.s32.totalorder %v920_v0, 1  ;;  %v5200_v0 = vld [vmem:[#allocation90_spill] sm:$0xff] }
  0xfe   :  { %v818_v36 = vadd.f32 %v817_v28, %v805_v7  ;;  %v898_v7 = vor.u32 1.1754944e-38, %v897_v44  ;;  %v5189_v44 = vld [vmem:[#allocation79_spill] sm:$0xff] }
 0x100   :  { %v902_v52 = vmul.f32 %v859_v40, %v818_v36  ;;  %v899_v25 = vsel %vm896_vm2, %v898_v7, %v894_v19  ;;  %v5187_v40 = vld [vmem:[#allocation75_spill] sm:$0xff]  ;;  %v5194_v19 = vld [vmem:[#allocation85_spill] sm:$0xff]  ;;  %v5196_v7 = vld [vmem:[#allocation82_spill] sm:$0xff] }
 0x101   :  { %v3378_v53 = vpop.eup %3377  ;;  %v908_v50 = vsub.f32 1.0, %v899_v25  ;;  %v912_v36 = vmul.f32 %v899_v25, %v5186_v55  ;;  %v5202_v25 = vld [vmem:[#allocation89_spill] sm:$0xff] }
 0x102   :  { %v904_v33 = vadd.f32 %v902_v52, %v169_v15  ;;  %v909_v1 = vmul.f32 %v3378_v53, %v907_v21  ;;  %v819_v2 = vpop.f32.mrf.mxu3  ;;  %v5188_v15 = vld [vmem:[#allocation77_spill] sm:$0xff]  ;;  %v5192_v21 = vld [vmem:[#allocation78_spill] sm:$0xff]  ;;  %v5193_v53 = vld [vmem:[#allocation83_spill] sm:$0xff] }
 0x103   :  { %v806_v56 = vpop.f32.mrf.mxu2  ;;  %v5201_v2 = vld [vmem:[#allocation88_spill] sm:$0xff] }
 0x104   :  { %3379 = vtanh.f32 %v904_v33  ;;  %v913_v37 = vadd.f32 %v911_v61, %v909_v1  ;;  %v5191_v33 = vld [vmem:[#allocation76_spill] sm:$0xff]  ;;  %v5197_v1 = vld [vmem:[#allocation87_spill] sm:$0xff]  ;;  %v5199_v61 = vld [vmem:[#allocation86_spill] sm:$0xff] }
 0x105   :  { %v5195_v56 = vld [vmem:[#allocation80_spill] sm:$0xff] }
 0x106   :  { %v4115_v28 = vsel %vm921_vm3, %v913_v37, %v5185_v23  ;;  %v5198_v23 = vld [vmem:[#allocation84_spill] sm:$0xff]  ;;  %v5203_v37 = vld [vmem:[#allocation93_spill] sm:$0xff] }
 0x107   :  { %v931_v14 = vpack.c.bf16 %v4115_v28, %v4115_v28 }
 0x109   :  { %941 = vmatmul.bf16.vlgmr.msrb.gmra.mxu0 %v931_v14  ;;  %967 = vmatmul.bf16.vlgmr.msrb.gmra.mxu2 %v931_v14 }
 0x10a   :  { %v3380_v12 = vpop.eup %3379  ;;  %1037 = vmatpush.bf16.msrb.mxu0 %v5187_v40  ;;  %1063 = vmatpush.bf16.msrb.mxu2 %v5188_v15 }
 0x10b   :  { %v910_v62 = vmul.f32 %v3380_v12, %v908_v50  ;;  %v5204_v50 = vld [vmem:[#allocation91_spill] sm:$0xff]  ;;  %v5205_v12 = vld [vmem:[#allocation92_spill] sm:$0xff] }
 0x10d   :  { %v914_v60 = vadd.f32 %v912_v36, %v910_v62  ;;  %v5206_v62 = vld [vmem:[#allocation94_spill] sm:$0xff]  ;;  %v5209_v36 = vld [vmem:[#allocation37_spill] sm:$0xff] }
 0x10e   :  { %1038 = vmatpush.bf16.msrb.mxu0 %v5189_v44  ;;  %1064 = vmatpush.bf16.msrb.mxu2 %v5190_v43 }
 0x10f   :  { %v4123_v38 = vsel %vm921_vm3, %v914_v60, %v5186_v55  ;;  %v5208_v55 = vld [vmem:[#allocation32_spill] sm:$0xff]  ;;  %v5210_v60 = vld [vmem:[#allocation39_spill] sm:$0xff] }
 0x110   :  { %v932_v52 = vpack.c.bf16 %v4123_v38, %v4123_v38 }
 0x112   :  { %954 = vmatmul.bf16.vlgmr.msrb.gmra.mxu1 %v932_v52  ;;  %980 = vmatmul.bf16.vlgmr.msrb.gmra.mxu3 %v932_v52 }
 0x113   :  { %1050 = vmatpush.bf16.msrb.mxu1 %v5191_v33  ;;  %1076 = vmatpush.bf16.msrb.mxu3 %v5192_v21 }
 0x114   :  { %1039 = vmatpush.bf16.msrb.mxu0 %v5193_v53  ;;  %1065 = vmatpush.bf16.msrb.mxu2 %v5194_v19 }
 0x117   :  { %1051 = vmatpush.bf16.msrb.mxu1 %v5195_v56  ;;  %1077 = vmatpush.bf16.msrb.mxu3 %v5196_v7 }
 0x118   :  { %1040 = vmatpush.bf16.msrb.mxu0 %v5197_v1  ;;  %1066 = vmatpush.bf16.msrb.mxu2 %v3910_v54 }
 0x119   :  { %993 = vmatmul.bf16.vlgmr.msra.gmra.mxu0 %v931_v14  ;;  %1019 = vmatmul.bf16.vlgmr.msra.gmra.mxu2 %v931_v14 }
 0x11b   :  { %1052 = vmatpush.bf16.msrb.mxu1 %v5198_v23  ;;  %1078 = vmatpush.bf16.msrb.mxu3 %v5199_v61 }
 0x11c   :  { %1041 = vmatpush.bf16.msrb.mxu0 %v5200_v0  ;;  %1067 = vmatpush.bf16.msrb.mxu2 %v3924_v48 }
 0x11f   :  { %1053 = vmatpush.bf16.msrb.mxu1 %v5201_v2  ;;  %1079 = vmatpush.bf16.msrb.mxu3 %v5202_v25 }
 0x120   :  { %1042 = vmatpush.bf16.msrb.mxu0 %v5203_v37  ;;  %1068 = vmatpush.bf16.msrb.mxu2 %v3936_v3 }
 0x122   :  { %1006 = vmatmul.bf16.vlgmr.msra.gmra.mxu1 %v932_v52  ;;  %1032 = vmatmul.bf16.vlgmr.msra.gmra.mxu3 %v932_v52 }
 0x123   :  { %1054 = vmatpush.bf16.msrb.mxu1 %v5204_v50  ;;  %1080 = vmatpush.bf16.msrb.mxu3 %v5205_v12 }
 0x124   :  { %1043 = vmatpush.bf16.msrb.mxu0 %v3943_v42  ;;  %1069 = vmatpush.bf16.msrb.mxu2 %v3950_v5 }
 0x127   :  { %1055 = vmatpush.bf16.msrb.mxu1 %v5206_v62  ;;  %1081 = vmatpush.bf16.msrb.mxu3 %v3940_v20 }
 0x128   :  { %1044 = vmatpush.bf16.msrb.mxu0 %v3956_v31  ;;  %1070 = vmatpush.bf16.msrb.mxu2 %v3962_v27 }
 0x12b   :  { %1056 = vmatpush.bf16.msrb.mxu1 %v3948_v16  ;;  %1082 = vmatpush.bf16.msrb.mxu3 %v3953_v11 }
 0x12c   :  { %1202 = vmatpush.bf16.msra.mxu0 %v3649_v4  ;;  %1228 = vmatpush.bf16.msra.mxu2 %v3653_v9 }
 0x12d   :  { %1045 = vmatmul.bf16.vlgmr.msrb.gmra.mxu0 %v931_v14  ;;  %1071 = vmatmul.bf16.vlgmr.msrb.gmra.mxu2 %v931_v14  ;;  %v5207_v14 = vld [vmem:[#allocation30_spill] sm:$0xff] }
 0x12f   :  { %1057 = vmatpush.bf16.msrb.mxu1 %v3960_v41  ;;  %1083 = vmatpush.bf16.msrb.mxu3 %v3965_v49 }
 0x130   :  { %1203 = vmatpush.bf16.msra.mxu0 %v3660_v17  ;;  %1229 = vmatpush.bf16.msra.mxu2 %v3665_v22 }
 0x132   :  { %1058 = vmatmul.bf16.vlgmr.msrb.gmra.mxu1 %v932_v52  ;;  %1084 = vmatmul.bf16.vlgmr.msrb.gmra.mxu3 %v932_v52  ;;  %v5211_v52 = vld [vmem:[#allocation41_spill] sm:$0xff] }
 0x133   :  { %1215 = vmatpush.bf16.msra.mxu1 %v3651_v8  ;;  %1241 = vmatpush.bf16.msra.mxu3 %v3656_v13 }
 0x134   :  { %1204 = vmatpush.bf16.msra.mxu0 %v3670_v30  ;;  %1230 = vmatpush.bf16.msra.mxu2 %v3676_v35  ;;  %v5249_v35 = vld [vmem:[#allocation99_spill] sm:$0xff] }
 0x137   :  { %1216 = vmatpush.bf16.msra.mxu1 %v3662_v18  ;;  %1242 = vmatpush.bf16.msra.mxu3 %v3667_v26 }
 0x138   :  { %1205 = vmatpush.bf16.msra.mxu0 %v3682_v45  ;;  %1231 = vmatpush.bf16.msra.mxu2 %v3688_v47 }
 0x13b   :  { %1217 = vmatpush.bf16.msra.mxu1 %v3674_v34  ;;  %1243 = vmatpush.bf16.msra.mxu3 %v3679_v39  ;;  %v5248_v39 = vld [vmem:[#allocation98_spill] sm:$0xff] }
 0x13c   :  { %1206 = vmatpush.bf16.msra.mxu0 %v3694_v57  ;;  %1232 = vmatpush.bf16.msra.mxu2 %v3700_v59  ;;  %v926_v34 = vld [vmem:[#allocation4 + $0x38] sm:$0xff] }
 0x13f   :  { %1218 = vmatpush.bf16.msra.mxu1 %v3686_v46  ;;  %1244 = vmatpush.bf16.msra.mxu3 %v3691_v51  ;;  %v925_v46 = vld [vmem:[#allocation4 + $0x30] sm:$0xff] }
 0x140   :  { %1207 = vmatpush.bf16.msra.mxu0 %v3706_v6  ;;  %1233 = vmatpush.bf16.msra.mxu2 %v3712_v10  ;;  %v5212_v6 = vld [vmem:[#allocation45_spill] sm:$0xff]  ;;  %v5213_v10 = vld [vmem:[#allocation34_spill] sm:$0xff] }
 0x143   :  { %1219 = vmatpush.bf16.msra.mxu1 %v3698_v58  ;;  %1245 = vmatpush.bf16.msra.mxu3 %v3703_v63  ;;  %v5214_v58 = vld [vmem:[#allocation36_spill] sm:$0xff]  ;;  %v5215_v63 = vld [vmem:[#allocation47_spill] sm:$0xff] }
 0x144   :  { %1208 = vmatpush.bf16.msra.mxu0 %v3718_v24  ;;  %1234 = vmatpush.bf16.msra.mxu2 %v3724_v29  ;;  %v5216_v24 = vld [vmem:[#allocation49_spill] sm:$0xff]  ;;  %v5217_v29 = vld [vmem:[#allocation38_spill] sm:$0xff] }
 0x147   :  { %1220 = vmatpush.bf16.msra.mxu1 %v5207_v14  ;;  %1246 = vmatpush.bf16.msra.mxu3 %v5208_v55  ;;  %v5218_v14 = vld [vmem:[#allocation40_spill] sm:$0xff] }
 0x148   :  { %1209 = vmatpush.bf16.msra.mxu0 %v5209_v36  ;;  %1235 = vmatpush.bf16.msra.mxu2 %v5210_v60  ;;  %v5219_v55 = vld [vmem:[#allocation44_spill] sm:$0xff]  ;;  %v5220_v36 = vld [vmem:[#allocation46_spill] sm:$0xff]  ;;  %v5221_v60 = vld [vmem:[#allocation51_spill] sm:$0xff] }
 0x14b   :  { %1221 = vmatpush.bf16.msra.mxu1 %v5213_v10  ;;  %1247 = vmatpush.bf16.msra.mxu3 %v5214_v58  ;;  %v5224_v10 = vld [vmem:[#allocation50_spill] sm:$0xff]  ;;  %v5225_v58 = vld [vmem:[#allocation55_spill] sm:$0xff] }
 0x14c   :  { %1254 = vmatpush.bf16.msrb.mxu0 %v5211_v52  ;;  %1280 = vmatpush.bf16.msrb.mxu2 %v5212_v6  ;;  %v5222_v52 = vld [vmem:[#allocation53_spill] sm:$0xff]  ;;  %v5223_v6 = vld [vmem:[#allocation48_spill] sm:$0xff] }
 0x14f   :  { %1222 = vmatpush.bf16.msra.mxu1 %v5217_v29  ;;  %1248 = vmatpush.bf16.msra.mxu3 %v5218_v14  ;;  %v5228_v29 = vld [vmem:[#allocation54_spill] sm:$0xff]  ;;  %v5229_v14 = vld [vmem:[#allocation59_spill] sm:$0xff] }
 0x150   :  { %1255 = vmatpush.bf16.msrb.mxu0 %v5215_v63  ;;  %1281 = vmatpush.bf16.msrb.mxu2 %v5216_v24  ;;  %v5226_v63 = vld [vmem:[#allocation57_spill] sm:$0xff]  ;;  %v5227_v24 = vld [vmem:[#allocation52_spill] sm:$0xff] }
 0x153   :  { %1267 = vmatpush.bf16.msrb.mxu1 %v5219_v55  ;;  %1293 = vmatpush.bf16.msrb.mxu3 %v5220_v36  ;;  %v5230_v55 = vld [vmem:[#allocation61_spill] sm:$0xff]  ;;  %v5231_v36 = vld [vmem:[#allocation56_spill] sm:$0xff] }
 0x154   :  { %1256 = vmatpush.bf16.msrb.mxu0 %v5221_v60  ;;  %1282 = vmatpush.bf16.msrb.mxu2 %v5222_v52  ;;  %v5232_v60 = vld [vmem:[#allocation58_spill] sm:$0xff]  ;;  %v5233_v52 = vld [vmem:[#allocation63_spill] sm:$0xff] }
 0x157   :  { %1268 = vmatpush.bf16.msrb.mxu1 %v5223_v6  ;;  %1294 = vmatpush.bf16.msrb.mxu3 %v5224_v10  ;;  %v5234_v6 = vld [vmem:[#allocation65_spill] sm:$0xff]  ;;  %v5235_v10 = vld [vmem:[#allocation60_spill] sm:$0xff] }
 0x158   :  { %1257 = vmatpush.bf16.msrb.mxu0 %v5225_v58  ;;  %1283 = vmatpush.bf16.msrb.mxu2 %v5226_v63  ;;  %v5236_v58 = vld [vmem:[#allocation62_spill] sm:$0xff]  ;;  %v5237_v63 = vld [vmem:[#allocation67_spill] sm:$0xff] }
 0x15b   :  { %1269 = vmatpush.bf16.msrb.mxu1 %v5227_v24  ;;  %1295 = vmatpush.bf16.msrb.mxu3 %v5228_v29  ;;  %v5238_v24 = vld [vmem:[#allocation69_spill] sm:$0xff]  ;;  %v5239_v29 = vld [vmem:[#allocation64_spill] sm:$0xff] }
 0x15c   :  { %1258 = vmatpush.bf16.msrb.mxu0 %v5229_v14  ;;  %1284 = vmatpush.bf16.msrb.mxu2 %v5230_v55  ;;  %v5240_v14 = vld [vmem:[#allocation66_spill] sm:$0xff]  ;;  %v5241_v55 = vld [vmem:[#allocation71_spill] sm:$0xff] }
 0x15f   :  { %1270 = vmatpush.bf16.msrb.mxu1 %v5231_v36  ;;  %1296 = vmatpush.bf16.msrb.mxu3 %v5232_v60  ;;  %v5242_v36 = vld [vmem:[#allocation73_spill] sm:$0xff]  ;;  %v5243_v60 = vld [vmem:[#allocation68_spill] sm:$0xff] }
 0x160   :  { %1259 = vmatpush.bf16.msrb.mxu0 %v5233_v52  ;;  %1285 = vmatpush.bf16.msrb.mxu2 %v5234_v6  ;;  %v5244_v52 = vld [vmem:[#allocation70_spill] sm:$0xff]  ;;  %v5245_v6 = vld [vmem:[#allocation72_spill] sm:$0xff] }
 0x163   :  { %1271 = vmatpush.bf16.msrb.mxu1 %v5235_v10  ;;  %1297 = vmatpush.bf16.msrb.mxu3 %v5236_v58  ;;  %v5246_v10 = vld [vmem:[#allocation74_spill] sm:$0xff] }
 0x164   :  { %1260 = vmatpush.bf16.msrb.mxu0 %v5237_v63  ;;  %1286 = vmatpush.bf16.msrb.mxu2 %v5238_v24  ;;  %v5247_v63 = vld [vmem:[#allocation97_spill] sm:$0xff] }
 0x167   :  { %1272 = vmatpush.bf16.msrb.mxu1 %v5239_v29  ;;  %1298 = vmatpush.bf16.msrb.mxu3 %v5240_v14 }
 0x168   :  { %1261 = vmatpush.bf16.msrb.mxu0 %v5241_v55  ;;  %1287 = vmatpush.bf16.msrb.mxu2 %v5242_v36 }
 0x16b   :  { %1273 = vmatpush.bf16.msrb.mxu1 %v5243_v60  ;;  %1299 = vmatpush.bf16.msrb.mxu3 %v5244_v52 }
 0x16f   :  { %1274 = vmatpush.bf16.msrb.mxu1 %v5245_v6  ;;  %1300 = vmatpush.bf16.msrb.mxu3 %v5246_v10 }
 0x186   :  { %v942_v58 = vpop.f32.mrf.mxu0 }
 0x187   :  { %v943_v51 = vadd.f32 %v942_v58, %v5247_v63 }
 0x18c   :  { %v968_v24 = vpop.f32.mrf.mxu2 }
 0x18d   :  { %v969_v36 = vadd.f32 %v968_v24, %v5248_v39 }
 0x18e   :  { %v944_v14 = vpop.f32.mrf.mxu0 }
 0x18f   :  { %v955_v29 = vpop.f32.mrf.mxu1 }
 0x190   :  { %v956_v59 = vadd.f32 %v955_v29, %v943_v51 }
 0x192   :  { %v1089_v57 = vadd.f32 %v956_v59, %v925_v46  ;;  %v927_v46 = vld [vmem:[#allocation4 + $0x40] sm:$0xff] }
 0x194   :  { %v3218_v55 = vmul.f32 -1.442695, %v1089_v57  ;;  %v970_v47 = vpop.f32.mrf.mxu2 }
 0x195   :  { %v981_v60 = vpop.f32.mrf.mxu3 }
 0x196   :  { %3381 = vpow2.f32 %v3218_v55  ;;  %v982_v52 = vadd.f32 %v981_v60, %v969_v36  ;;  %v994_v10 = vpop.f32.mrf.mxu0 }
 0x197   :  { %v957_v6 = vpop.f32.mrf.mxu1  ;;  %v995_v51 = vadd.f32 %v994_v10, %v5249_v35 }
 0x198   :  { %v1090_v45 = vadd.f32 %v982_v52, %v926_v34  ;;  %v5250_v6 = vld [vmem:[#allocation100_spill] sm:$0xff] }
 0x19a   :  { %v3219_v26 = vmul.f32 -1.442695, %v1090_v45  ;;  %v928_v45 = vld [vmem:[#allocation4 + $0x48] sm:$0xff] }
 0x19c   :  { %v3382_v18 = vpop.eup %3381  ;;  %3383 = vpow2.f32 %v3219_v26  ;;  %v1020_v59 = vpop.f32.mrf.mxu2 }
 0x19d   :  { %v1097_v58 = vadd.f32 1.0, %v3382_v18  ;;  %v983_v63 = vpop.f32.mrf.mxu3  ;;  %v1021_v34 = vadd.f32 %v1020_v59, %v5250_v6 }
 0x19e   :  { %v996_v29 = vpop.f32.mrf.mxu0 }
 0x19f   :  { %3385 = vrcp.f32 %v1097_v58  ;;  %v1007_v57 = vpop.f32.mrf.mxu1  ;;  %v1110_v59 = vand.u32 2147483648, %v1097_v58  ;;  %vm1104_vm5 = vweird.f32 %v1097_v58 }
 0x1a0   :  { %v1008_v24 = vadd.f32 %v1007_v57, %v995_v51 }
 0x1a2   :  { %v3384_v14 = vpop.eup %3383  ;;  %v1129_v55 = vadd.f32 %v1008_v24, %v927_v46 }
 0x1a3   :  { %v1098_v36 = vadd.f32 1.0, %v3384_v14 }
 0x1a4   :  { %v3220_v47 = vmul.f32 -1.442695, %v1129_v55  ;;  %v1022_v52 = vpop.f32.mrf.mxu2 }
 0x1a5   :  { %v3386_v60 = vpop.eup %3385  ;;  %3387 = vrcp.f32 %v1098_v36  ;;  %v1033_v26 = vpop.f32.mrf.mxu3  ;;  %vm1119_vm9 = vweird.f32 %v1098_v36 }
 0x1a6   :  { %3389 = vpow2.f32 %v3220_v47  ;;  %v1034_v18 = vadd.f32 %v1033_v26, %v1021_v34  ;;  %v1100_v63 = vmul.f32 %v3386_v60, %v1097_v58  ;;  %vm1105_vm4 = vweird.f32 %v3386_v60  ;;  %v5251_v34 = vld [vmem:[#allocation101_spill] sm:$0xff] }
 0x1a7   :  { %v1009_v10 = vpop.f32.mrf.mxu1  ;;  %v1108_v47 = vand.u32 2147483647, %v1097_v58  ;;  %vm1106_vm6 = vmor %vm1104_vm5, %vm1105_vm4 }
 0x1a8   :  { %v1130_v35 = vadd.f32 %v1034_v18, %v928_v45  ;;  %v1101_v39 = vsub.f32 1.0, %v1100_v63  ;;  %v1111_v63 = vor.u32 1.1754944e-38, %v1110_v59 }
 0x1a9   :  { %vm1109_vm7 = vcmp.eq.f32.partialorder %v1108_v47, 8.507059e+37 }
 0x1aa   :  { %v1046_v30 = vpop.f32.mrf.mxu0  ;;  %v3221_v51 = vmul.f32 -1.442695, %v1130_v35  ;;  %v1102_v57 = vmul.f32 %v3386_v60, %v1101_v39 }
 0x1ab   :  { %v3388_v29 = vpop.eup %3387  ;;  %v1047_v26 = vadd.f32 %v1046_v30, %v5251_v34  ;;  %v1123_v30 = vand.u32 2147483647, %v1098_v36  ;;  %v929_v34 = vld [vmem:[#allocation4 + $0x50] sm:$0xff] }
 0x1ac   :  { %v3390_v46 = vpop.eup %3389  ;;  %3391 = vpow2.f32 %v3221_v51  ;;  %v1103_v24 = vadd.f32 %v3386_v60, %v1102_v57  ;;  %v1115_v14 = vmul.f32 %v3388_v29, %v1098_v36  ;;  %vm1120_vm8 = vweird.f32 %v3388_v29 }
 0x1ad   :  { %v1137_v55 = vadd.f32 1.0, %v3390_v46  ;;  %v1035_v6 = vpop.f32.mrf.mxu3  ;;  %vm1121_vm10 = vmor %vm1119_vm9, %vm1120_vm8  ;;  %vm1124_vm11 = vcmp.eq.f32.partialorder %v1123_v30, 8.507059e+37 }
 0x1ae   :  { %v1116_v10 = vsub.f32 1.0, %v1115_v14  ;;  %v1107_v18 = vsel %vm1106_vm6, %v3386_v60, %v1103_v24  ;;  %v1125_v6 = vand.u32 2147483648, %v1098_v36 }
 0x1af   :  { %3393 = vrcp.f32 %v1137_v55  ;;  %v1059_v45 = vpop.f32.mrf.mxu1  ;;  %v1112_v13 = vsel %vm1109_vm7, %v1111_v63, %v1107_v18  ;;  %vm1144_vm13 = vweird.f32 %v1137_v55 }
 0x1b0   :  { %v1072_v35 = vpop.f32.mrf.mxu2  ;;  %v1060_v39 = vadd.f32 %v1059_v45, %v1047_v26  ;;  %v1117_v52 = vmul.f32 %v3388_v29, %v1116_v10  ;;  %v1126_v10 = vor.u32 1.1754944e-38, %v1125_v6 }
 0x1b1   :  { %v1073_v14 = vadd.f32 %v1072_v35, %v4094_v32  ;;  %v930_v35 = vld [vmem:[#allocation4 + $0x58] sm:$0xff] }
 0x1b2   :  { %v1048_v51 = vpop.f32.mrf.mxu0  ;;  %v3392_v57 = vpop.eup %3391  ;;  %v1118_v46 = vadd.f32 %v3388_v29, %v1117_v52  ;;  %v1169_v58 = vmul.f32 %v1112_v13, %v1060_v39  ;;  %v1150_v13 = vand.u32 2147483648, %v1137_v55 }
 0x1b3   :  { %v1138_v8 = vadd.f32 1.0, %v3392_v57  ;;  %v1148_v57 = vand.u32 2147483647, %v1137_v55 }
 0x1b4   :  { %v1122_v59 = vsel %vm1121_vm10, %v3388_v29, %v1118_v46  ;;  %v1171_v45 = vadd.f32 %v1169_v58, %v929_v34  ;;  %v1151_v46 = vor.u32 1.1754944e-38, %v1150_v13 }
 0x1b5   :  { %v3394_v60 = vpop.eup %3393  ;;  %3395 = vrcp.f32 %v1138_v8  ;;  %v1085_v24 = vpop.f32.mrf.mxu3  ;;  %v1127_v51 = vsel %vm1124_vm11, %v1126_v10, %v1122_v59  ;;  %vm1149_vm15 = vcmp.eq.f32.partialorder %v1148_v57, 8.507059e+37  ;;  %vm1159_vm1 = vweird.f32 %v1138_v8 }
 0x1b6   :  { %v1140_v26 = vmul.f32 %v3394_v60, %v1137_v55  ;;  %v1086_v47 = vadd.f32 %v1085_v24, %v1073_v14  ;;  %vm1145_vm12 = vweird.f32 %v3394_v60  ;;  %3397 = vtanh.f32 %v1171_v45 }
 0x1b7   :  { %v1061_v18 = vpop.f32.mrf.mxu1  ;;  %vm1146_vm14 = vmor %vm1144_vm13, %vm1145_vm12  ;;  %v1165_v14 = vand.u32 2147483648, %v1138_v8 }
 0x1b8   :  { %v1074_v63 = vpop.f32.mrf.mxu2  ;;  %v1141_v52 = vsub.f32 1.0, %v1140_v26  ;;  %v1170_v39 = vmul.f32 %v1127_v51, %v1086_v47  ;;  %v1163_v47 = vand.u32 2147483647, %v1138_v8 }
 0x1b9   :  { %v1166_v63 = vor.u32 1.1754944e-38, %v1165_v14  ;;  %v5254_v14 = vld [vmem:[#allocation13_spill] sm:$0xff] }
 0x1ba   :  { %v1142_v36 = vmul.f32 %v3394_v60, %v1141_v52  ;;  %v1172_v6 = vadd.f32 %v1170_v39, %v930_v35  ;;  %v1189_v52 = vpop.permute.xlu0 %1188  ;;  %vm1164_vm3 = vcmp.eq.f32.partialorder %v1163_v47, 8.507059e+37  ;;  %v5258_v47 = vld [vmem:[#allocation15_spill] sm:$0xff] }
 0x1bb   :  { %v3396_v32 = vpop.eup %3395  ;;  %vm1190_vm4 = vcmp.eq.s32.totalorder %v1189_v52, 1  ;;  %v5264_v52 = vld [vmem:[#allocation25_spill] sm:$0xff] }
 0x1bc   :  { %v1155_v49 = vmul.f32 %v3396_v32, %v1138_v8  ;;  %v1143_v29 = vadd.f32 %v3394_v60, %v1142_v36  ;;  %vm1160_vm0 = vweird.f32 %v3396_v32  ;;  %v3398_v10 = vpop.eup %3397  ;;  %3399 = vtanh.f32 %v1172_v6 }
 0x1bd   :  { %v1087_v34 = vpop.f32.mrf.mxu3  ;;  %vm1161_vm2 = vmor %vm1159_vm1, %vm1160_vm0 }
 0x1be   :  { %v1156_v58 = vsub.f32 1.0, %v1155_v49  ;;  %v1147_v30 = vsel %vm1146_vm14, %v3394_v60, %v1143_v29 }
 0x1bf   :  { %v1152_v24 = vsel %vm1149_vm15, %v1151_v46, %v1147_v30  ;;  %v3521_v46 = vld [vmem:[%s4870_s1] sm:$0xff]  ;;  %v5253_v30 = vld [vmem:[#allocation96_spill] sm:$0xff] }
 0x1c0   :  { %v1157_v59 = vmul.f32 %v3396_v32, %v1156_v58  ;;  %v1175_v26 = vsub.f32 1.0, %v1152_v24  ;;  %v1179_v55 = vmul.f32 %v1152_v24, %v4115_v28  ;;  %vm3227_vm5 = vcmp.gt.s32.totalorder %v3521_v46, 2  ;;  %v5255_v24 = vld [vmem:[#allocation14_spill] sm:$0xff] }
 0x1c1   :  { %vm3232_vm6 = vcmp.gt.s32.totalorder %v3521_v46, 3  ;;  %vm3252_vm7 = vcmp.gt.s32.totalorder %v3521_v46, 7  ;;  %v5275_v46 = vld [vmem:[#allocation32_spill] sm:$0xff] }
 0x1c2   :  { %v1177_v45 = vmul.f32 %v3398_v10, %v1175_v26  ;;  %v1158_v18 = vadd.f32 %v3396_v32, %v1157_v59  ;;  %v3400_v36 = vpop.eup %3399  ;;  %v5256_v59 = vld [vmem:[#allocation17_spill] sm:$0xff]  ;;  %v5257_v26 = vld [vmem:[#allocation19_spill] sm:$0xff]  ;;  %v5259_v10 = vld [vmem:[#allocation16_spill] sm:$0xff] }
 0x1c4   :  { %v1181_v51 = vadd.f32 %v1179_v55, %v1177_v45  ;;  %v1162_v49 = vsel %vm1161_vm2, %v3396_v32, %v1158_v18  ;;  %v5260_v45 = vld [vmem:[#allocation21_spill] sm:$0xff]  ;;  %v5261_v55 = vld [vmem:[#allocation23_spill] sm:$0xff]  ;;  %v5262_v18 = vld [vmem:[#allocation18_spill] sm:$0xff] }
 0x1c5   :  { %v1167_v60 = vsel %vm1164_vm3, %v1166_v63, %v1162_v49  ;;  %v5263_v63 = vld [vmem:[#allocation20_spill] sm:$0xff]  ;;  %v5266_v49 = vld [vmem:[#allocation22_spill] sm:$0xff] }
 0x1c6   :  { %v4229_v13 = vsel %vm1190_vm4, %v1181_v51, %v4115_v28  ;;  %v1176_v39 = vsub.f32 1.0, %v1167_v60  ;;  %v1180_v35 = vmul.f32 %v1167_v60, %v4123_v38  ;;  %v5265_v51 = vld [vmem:[#allocation27_spill] sm:$0xff]  ;;  %v5267_v60 = vld [vmem:[#allocation24_spill] sm:$0xff] }
 0x1c7   :  { %v1200_v8 = vpack.c.bf16 %v4229_v13, %v4229_v13 }
 0x1c8   :  { %v1178_v57 = vmul.f32 %v3400_v36, %v1176_v39  ;;  %v5268_v39 = vld [vmem:[#allocation29_spill] sm:$0xff]  ;;  %v5269_v36 = vld [vmem:[#allocation31_spill] sm:$0xff] }
 0x1c9   :  { %1210 = vmatmul.bf16.vlgmr.msra.gmra.mxu0 %v1200_v8  ;;  %1236 = vmatmul.bf16.vlgmr.msra.gmra.mxu2 %v1200_v8 }
 0x1ca   :  { %v1182_v29 = vadd.f32 %v1180_v35, %v1178_v57  ;;  %1306 = vmatpush.bf16.msra.mxu0 %v5187_v40  ;;  %1332 = vmatpush.bf16.msra.mxu2 %v5188_v15  ;;  %v5271_v57 = vld [vmem:[#allocation28_spill] sm:$0xff]  ;;  %v5272_v35 = vld [vmem:[#allocation33_spill] sm:$0xff] }
 0x1cc   :  { %v4237_v32 = vsel %vm1190_vm4, %v1182_v29, %v4123_v38  ;;  %v5252_v38 = vmov 0   ;;  %v5273_v29 = vld [vmem:[#allocation35_spill] sm:$0xff] }
 0x1cd   :  { %v1201_v28 = vpack.c.bf16 %v4237_v32, %v4237_v32  ;;  %v1455_v6 = vsel %vm3227_vm5, 1, %v5252_v38  ;;  %v1724_v34 = vsel %vm3232_vm6, 1, %v5252_v38  ;;  %v2800_v58 = vsel %vm3252_vm7, 1, %v5252_v38  ;;  %v5279_v38 = vld [vmem:[#allocation45_spill] sm:$0xff] }
 0x1ce   :  { %1307 = vmatpush.bf16.msra.mxu0 %v5189_v44  ;;  %1333 = vmatpush.bf16.msra.mxu2 %v5190_v43 }
 0x1cf   :  { %1223 = vmatmul.bf16.vlgmr.msra.gmra.mxu1 %v1201_v28  ;;  %1249 = vmatmul.bf16.vlgmr.msra.gmra.mxu3 %v1201_v28 }
 0x1d0   :  { %1319 = vmatpush.bf16.msra.mxu1 %v5191_v33  ;;  %1345 = vmatpush.bf16.msra.mxu3 %v5192_v21 }
 0x1d1   :  { %1457 = vperm.xlu1 %3359, %v1455_v6   ;;  %v5276_v6 = vld [vmem:[#allocation37_spill] sm:$0xff] }
 0x1d2   :  { %1308 = vmatpush.bf16.msra.mxu0 %v5193_v53  ;;  %1334 = vmatpush.bf16.msra.mxu2 %v5194_v19 }
 0x1d4   :  { %1320 = vmatpush.bf16.msra.mxu1 %v5195_v56  ;;  %1346 = vmatpush.bf16.msra.mxu3 %v5196_v7 }
 0x1d6   :  { %1309 = vmatpush.bf16.msra.mxu0 %v5197_v1  ;;  %1335 = vmatpush.bf16.msra.mxu2 %v3910_v54 }
 0x1d8   :  { %1321 = vmatpush.bf16.msra.mxu1 %v5198_v23  ;;  %1347 = vmatpush.bf16.msra.mxu3 %v5199_v61 }
 0x1d9   :  { %1262 = vmatmul.bf16.vlgmr.msrb.gmra.mxu0 %v1200_v8  ;;  %1288 = vmatmul.bf16.vlgmr.msrb.gmra.mxu2 %v1200_v8 }
 0x1da   :  { %1310 = vmatpush.bf16.msra.mxu0 %v5200_v0  ;;  %1336 = vmatpush.bf16.msra.mxu2 %v3924_v48 }
 0x1db   :  { %1726 = vperm.xlu1 %3359, %v1724_v34   ;;  %v5277_v34 = vld [vmem:[#allocation39_spill] sm:$0xff] }
 0x1dc   :  { %1322 = vmatpush.bf16.msra.mxu1 %v5201_v2  ;;  %1348 = vmatpush.bf16.msra.mxu3 %v5202_v25 }
 0x1de   :  { %1311 = vmatpush.bf16.msra.mxu0 %v5203_v37  ;;  %1337 = vmatpush.bf16.msra.mxu2 %v3936_v3 }
 0x1df   :  { %1275 = vmatmul.bf16.vlgmr.msrb.gmra.mxu1 %v1201_v28  ;;  %1301 = vmatmul.bf16.vlgmr.msrb.gmra.mxu3 %v1201_v28 }
 0x1e0   :  { %1323 = vmatpush.bf16.msra.mxu1 %v5204_v50  ;;  %1349 = vmatpush.bf16.msra.mxu3 %v5205_v12 }
 0x1e2   :  { %1312 = vmatpush.bf16.msra.mxu0 %v3943_v42  ;;  %1338 = vmatpush.bf16.msra.mxu2 %v3950_v5 }
 0x1e3   :  { %2802 = vperm.xlu1 %3359, %v2800_v58   ;;  %v5278_v58 = vld [vmem:[#allocation41_spill] sm:$0xff] }
 0x1e4   :  { %1324 = vmatpush.bf16.msra.mxu1 %v5206_v62  ;;  %1350 = vmatpush.bf16.msra.mxu3 %v3940_v20 }
 0x1e6   :  { %1313 = vmatpush.bf16.msra.mxu0 %v3956_v31  ;;  %1339 = vmatpush.bf16.msra.mxu2 %v3962_v27 }
 0x1e8   :  { %1325 = vmatpush.bf16.msra.mxu1 %v3948_v16  ;;  %1351 = vmatpush.bf16.msra.mxu3 %v3953_v11 }
 0x1e9   :  { %1314 = vmatmul.bf16.vlgmr.msra.gmra.mxu0 %v1200_v8  ;;  %1340 = vmatmul.bf16.vlgmr.msra.gmra.mxu2 %v1200_v8  ;;  %v5270_v8 = vld [vmem:[#allocation26_spill] sm:$0xff] }
 0x1ea   :  { %1471 = vmatpush.bf16.msrb.mxu0 %v3649_v4  ;;  %1497 = vmatpush.bf16.msrb.mxu2 %v3653_v9 }
 0x1ec   :  { %1326 = vmatpush.bf16.msra.mxu1 %v3960_v41  ;;  %1352 = vmatpush.bf16.msra.mxu3 %v5253_v30 }
 0x1ee   :  { %1472 = vmatpush.bf16.msrb.mxu0 %v3660_v17  ;;  %1498 = vmatpush.bf16.msrb.mxu2 %v3665_v22 }
 0x1ef   :  { %1327 = vmatmul.bf16.vlgmr.msra.gmra.mxu1 %v1201_v28  ;;  %1353 = vmatmul.bf16.vlgmr.msra.gmra.mxu3 %v1201_v28  ;;  %v5274_v28 = vld [vmem:[#allocation30_spill] sm:$0xff] }
 0x1f0   :  { %1484 = vmatpush.bf16.msrb.mxu1 %v5254_v14  ;;  %1510 = vmatpush.bf16.msrb.mxu3 %v5255_v24 }
 0x1f2   :  { %1473 = vmatpush.bf16.msrb.mxu0 %v5256_v59  ;;  %1499 = vmatpush.bf16.msrb.mxu2 %v5257_v26 }
 0x1f4   :  { %1485 = vmatpush.bf16.msrb.mxu1 %v5258_v47  ;;  %1511 = vmatpush.bf16.msrb.mxu3 %v5259_v10  ;;  %v5316_v47 = vld [vmem:[#allocation99_spill] sm:$0xff] }
 0x1f6   :  { %1474 = vmatpush.bf16.msrb.mxu0 %v5260_v45  ;;  %1500 = vmatpush.bf16.msrb.mxu2 %v5261_v55 }
 0x1f8   :  { %1486 = vmatpush.bf16.msrb.mxu1 %v5262_v18  ;;  %1512 = vmatpush.bf16.msrb.mxu3 %v5263_v63  ;;  %v1195_v63 = vld [vmem:[#allocation4 + $0x68] sm:$0xff] }
 0x1fa   :  { %1475 = vmatpush.bf16.msrb.mxu0 %v5264_v52  ;;  %1501 = vmatpush.bf16.msrb.mxu2 %v5265_v51  ;;  %v5315_v52 = vld [vmem:[#allocation98_spill] sm:$0xff] }
 0x1fc   :  { %1487 = vmatpush.bf16.msrb.mxu1 %v5266_v49  ;;  %1513 = vmatpush.bf16.msrb.mxu3 %v5267_v60 }
 0x1fe   :  { %1476 = vmatpush.bf16.msrb.mxu0 %v5268_v39  ;;  %1502 = vmatpush.bf16.msrb.mxu2 %v5269_v36  ;;  %v5280_v36 = vld [vmem:[#allocation34_spill] sm:$0xff] }
 0x200   :  { %1488 = vmatpush.bf16.msrb.mxu1 %v5270_v8  ;;  %1514 = vmatpush.bf16.msrb.mxu3 %v5271_v57  ;;  %v5281_v8 = vld [vmem:[#allocation36_spill] sm:$0xff]  ;;  %v5282_v57 = vld [vmem:[#allocation47_spill] sm:$0xff] }
 0x202   :  { %1477 = vmatpush.bf16.msrb.mxu0 %v5272_v35  ;;  %1503 = vmatpush.bf16.msrb.mxu2 %v5273_v29  ;;  %v5283_v35 = vld [vmem:[#allocation49_spill] sm:$0xff]  ;;  %v5284_v29 = vld [vmem:[#allocation38_spill] sm:$0xff] }
 0x204   :  { %1489 = vmatpush.bf16.msrb.mxu1 %v5274_v28  ;;  %1515 = vmatpush.bf16.msrb.mxu3 %v5275_v46  ;;  %v5285_v28 = vld [vmem:[#allocation40_spill] sm:$0xff] }
 0x205   :  { %v5286_v46 = vld [vmem:[#allocation44_spill] sm:$0xff] }
 0x206   :  { %1478 = vmatpush.bf16.msrb.mxu0 %v5276_v6  ;;  %1504 = vmatpush.bf16.msrb.mxu2 %v5277_v34  ;;  %v5287_v6 = vld [vmem:[#allocation46_spill] sm:$0xff]  ;;  %v5288_v34 = vld [vmem:[#allocation51_spill] sm:$0xff] }
 0x208   :  { %1490 = vmatpush.bf16.msrb.mxu1 %v5280_v36  ;;  %1516 = vmatpush.bf16.msrb.mxu3 %v5281_v8  ;;  %v5291_v36 = vld [vmem:[#allocation50_spill] sm:$0xff]  ;;  %v5292_v8 = vld [vmem:[#allocation55_spill] sm:$0xff] }
 0x20a   :  { %1523 = vmatpush.bf16.msra.mxu0 %v5278_v58  ;;  %1549 = vmatpush.bf16.msra.mxu2 %v5279_v38  ;;  %v5289_v58 = vld [vmem:[#allocation53_spill] sm:$0xff]  ;;  %v5290_v38 = vld [vmem:[#allocation48_spill] sm:$0xff] }
 0x20c   :  { %1491 = vmatpush.bf16.msrb.mxu1 %v5284_v29  ;;  %1517 = vmatpush.bf16.msrb.mxu3 %v5285_v28  ;;  %v5295_v29 = vld [vmem:[#allocation54_spill] sm:$0xff]  ;;  %v5296_v28 = vld [vmem:[#allocation59_spill] sm:$0xff] }
 0x20e   :  { %1524 = vmatpush.bf16.msra.mxu0 %v5282_v57  ;;  %1550 = vmatpush.bf16.msra.mxu2 %v5283_v35  ;;  %v5293_v57 = vld [vmem:[#allocation57_spill] sm:$0xff]  ;;  %v5294_v35 = vld [vmem:[#allocation52_spill] sm:$0xff] }
 0x210   :  { %1536 = vmatpush.bf16.msra.mxu1 %v5286_v46  ;;  %1562 = vmatpush.bf16.msra.mxu3 %v5287_v6  ;;  %v5297_v46 = vld [vmem:[#allocation61_spill] sm:$0xff]  ;;  %v5298_v6 = vld [vmem:[#allocation56_spill] sm:$0xff] }
 0x212   :  { %1525 = vmatpush.bf16.msra.mxu0 %v5288_v34  ;;  %1551 = vmatpush.bf16.msra.mxu2 %v5289_v58  ;;  %v5299_v34 = vld [vmem:[#allocation58_spill] sm:$0xff]  ;;  %v5300_v58 = vld [vmem:[#allocation63_spill] sm:$0xff] }
 0x214   :  { %1537 = vmatpush.bf16.msra.mxu1 %v5290_v38  ;;  %1563 = vmatpush.bf16.msra.mxu3 %v5291_v36  ;;  %v5301_v38 = vld [vmem:[#allocation65_spill] sm:$0xff]  ;;  %v5302_v36 = vld [vmem:[#allocation60_spill] sm:$0xff] }
 0x216   :  { %1526 = vmatpush.bf16.msra.mxu0 %v5292_v8  ;;  %1552 = vmatpush.bf16.msra.mxu2 %v5293_v57  ;;  %v5303_v8 = vld [vmem:[#allocation62_spill] sm:$0xff]  ;;  %v5304_v57 = vld [vmem:[#allocation67_spill] sm:$0xff] }
 0x218   :  { %1538 = vmatpush.bf16.msra.mxu1 %v5294_v35  ;;  %1564 = vmatpush.bf16.msra.mxu3 %v5295_v29  ;;  %v5305_v35 = vld [vmem:[#allocation69_spill] sm:$0xff]  ;;  %v5306_v29 = vld [vmem:[#allocation64_spill] sm:$0xff] }
 0x21a   :  { %1527 = vmatpush.bf16.msra.mxu0 %v5296_v28  ;;  %1553 = vmatpush.bf16.msra.mxu2 %v5297_v46  ;;  %v5307_v28 = vld [vmem:[#allocation66_spill] sm:$0xff]  ;;  %v5308_v46 = vld [vmem:[#allocation71_spill] sm:$0xff] }
 0x21c   :  { %1539 = vmatpush.bf16.msra.mxu1 %v5298_v6  ;;  %1565 = vmatpush.bf16.msra.mxu3 %v5299_v34  ;;  %v5309_v6 = vld [vmem:[#allocation73_spill] sm:$0xff]  ;;  %v5310_v34 = vld [vmem:[#allocation68_spill] sm:$0xff] }
 0x21e   :  { %1528 = vmatpush.bf16.msra.mxu0 %v5300_v58  ;;  %1554 = vmatpush.bf16.msra.mxu2 %v5301_v38  ;;  %v5311_v58 = vld [vmem:[#allocation70_spill] sm:$0xff]  ;;  %v5312_v38 = vld [vmem:[#allocation72_spill] sm:$0xff] }
 0x220   :  { %1540 = vmatpush.bf16.msra.mxu1 %v5302_v36  ;;  %1566 = vmatpush.bf16.msra.mxu3 %v5303_v8  ;;  %v5313_v36 = vld [vmem:[#allocation74_spill] sm:$0xff] }
 0x222   :  { %1529 = vmatpush.bf16.msra.mxu0 %v5304_v57  ;;  %1555 = vmatpush.bf16.msra.mxu2 %v5305_v35  ;;  %v5314_v57 = vld [vmem:[#allocation97_spill] sm:$0xff]  ;;  %v1194_v35 = vld [vmem:[#allocation4 + $0x60] sm:$0xff] }
 0x224   :  { %1541 = vmatpush.bf16.msra.mxu1 %v5306_v29  ;;  %1567 = vmatpush.bf16.msra.mxu3 %v5307_v28 }
 0x226   :  { %1530 = vmatpush.bf16.msra.mxu0 %v5308_v46  ;;  %1556 = vmatpush.bf16.msra.mxu2 %v5309_v6 }
 0x228   :  { %1542 = vmatpush.bf16.msra.mxu1 %v5310_v34  ;;  %1568 = vmatpush.bf16.msra.mxu3 %v5311_v58 }
 0x22c   :  { %1543 = vmatpush.bf16.msra.mxu1 %v5312_v38  ;;  %1569 = vmatpush.bf16.msra.mxu3 %v5313_v36 }
 0x246   :  { %v1211_v8 = vpop.f32.mrf.mxu0 }
 0x247   :  { %v1212_v39 = vadd.f32 %v1211_v8, %v5314_v57 }
 0x24c   :  { %v1224_v60 = vpop.f32.mrf.mxu1  ;;  %v1237_v29 = vpop.f32.mrf.mxu2 }
 0x24d   :  { %v1225_v49 = vadd.f32 %v1224_v60, %v1212_v39  ;;  %v1238_v6 = vadd.f32 %v1237_v29, %v5315_v52 }
 0x24e   :  { %v1213_v28 = vpop.f32.mrf.mxu0 }
 0x24f   :  { %v1358_v51 = vadd.f32 %v1225_v49, %v1194_v35  ;;  %v1196_v49 = vld [vmem:[#allocation4 + $0x70] sm:$0xff] }
 0x251   :  { %v3223_v46 = vmul.f32 -1.442695, %v1358_v51 }
 0x252   :  { %v1250_v34 = vpop.f32.mrf.mxu3 }
 0x253   :  { %3401 = vpow2.f32 %v3223_v46  ;;  %v1251_v58 = vadd.f32 %v1250_v34, %v1238_v6 }
 0x254   :  { %v1226_v18 = vpop.f32.mrf.mxu1  ;;  %v1239_v38 = vpop.f32.mrf.mxu2 }
 0x255   :  { %v1359_v55 = vadd.f32 %v1251_v58, %v1195_v63  ;;  %v5317_v38 = vld [vmem:[#allocation100_spill] sm:$0xff] }
 0x256   :  { %v1263_v36 = vpop.f32.mrf.mxu0 }
 0x257   :  { %v3224_v45 = vmul.f32 -1.442695, %v1359_v55  ;;  %v1264_v60 = vadd.f32 %v1263_v36, %v5316_v47  ;;  %v1197_v55 = vld [vmem:[#allocation4 + $0x78] sm:$0xff] }
 0x259   :  { %v3402_v10 = vpop.eup %3401  ;;  %3403 = vpow2.f32 %v3224_v45 }
 0x25a   :  { %v1366_v8 = vadd.f32 1.0, %v3402_v10  ;;  %v1252_v57 = vpop.f32.mrf.mxu3 }
 0x25c   :  { %3405 = vrcp.f32 %v1366_v8  ;;  %v1276_v51 = vpop.f32.mrf.mxu1  ;;  %v1289_v39 = vpop.f32.mrf.mxu2  ;;  %vm1373_vm9 = vweird.f32 %v1366_v8 }
 0x25d   :  { %v1277_v35 = vadd.f32 %v1276_v51, %v1264_v60  ;;  %v1290_v63 = vadd.f32 %v1289_v39, %v5317_v38  ;;  %v1379_v39 = vand.u32 2147483648, %v1366_v8 }
 0x25e   :  { %v1265_v29 = vpop.f32.mrf.mxu0 }
 0x25f   :  { %v3404_v28 = vpop.eup %3403  ;;  %v1398_v46 = vadd.f32 %v1277_v35, %v1196_v49 }
 0x260   :  { %v1367_v6 = vadd.f32 1.0, %v3404_v28 }
 0x261   :  { %v3225_v18 = vmul.f32 -1.442695, %v1398_v46 }
 0x262   :  { %v3406_v34 = vpop.eup %3405  ;;  %3407 = vrcp.f32 %v1367_v6  ;;  %v1302_v45 = vpop.f32.mrf.mxu3  ;;  %vm1388_vm13 = vweird.f32 %v1367_v6 }
 0x263   :  { %3409 = vpow2.f32 %v3225_v18  ;;  %v1303_v10 = vadd.f32 %v1302_v45, %v1290_v63  ;;  %v1369_v57 = vmul.f32 %v3406_v34, %v1366_v8  ;;  %vm1374_vm8 = vweird.f32 %v3406_v34  ;;  %v5318_v63 = vld [vmem:[#allocation101_spill] sm:$0xff] }
 0x264   :  { %v1278_v36 = vpop.f32.mrf.mxu1  ;;  %v1291_v58 = vpop.f32.mrf.mxu2  ;;  %v1377_v18 = vand.u32 2147483647, %v1366_v8  ;;  %vm1375_vm10 = vmor %vm1373_vm9, %vm1374_vm8 }
 0x265   :  { %v1399_v47 = vadd.f32 %v1303_v10, %v1197_v55  ;;  %v1370_v52 = vsub.f32 1.0, %v1369_v57  ;;  %v1380_v57 = vor.u32 1.1754944e-38, %v1379_v39 }
 0x266   :  { %v1315_v26 = vpop.f32.mrf.mxu0  ;;  %vm1378_vm11 = vcmp.eq.f32.partialorder %v1377_v18, 8.507059e+37 }
 0x267   :  { %v3226_v60 = vmul.f32 -1.442695, %v1399_v47  ;;  %v1371_v51 = vmul.f32 %v3406_v34, %v1370_v52  ;;  %v1316_v45 = vadd.f32 %v1315_v26, %v5318_v63  ;;  %v1392_v26 = vand.u32 2147483647, %v1367_v6  ;;  %v1198_v63 = vld [vmem:[#allocation4 + $0x80] sm:$0xff] }
 0x268   :  { %v3408_v29 = vpop.eup %3407 }
 0x269   :  { %v3410_v49 = vpop.eup %3409  ;;  %3411 = vpow2.f32 %v3226_v60  ;;  %v1372_v35 = vadd.f32 %v3406_v34, %v1371_v51  ;;  %v1384_v28 = vmul.f32 %v3408_v29, %v1367_v6  ;;  %vm1389_vm12 = vweird.f32 %v3408_v29 }
 0x26a   :  { %v1406_v46 = vadd.f32 1.0, %v3410_v49  ;;  %v1304_v38 = vpop.f32.mrf.mxu3  ;;  %vm1390_vm14 = vmor %vm1388_vm13, %vm1389_vm12  ;;  %vm1393_vm15 = vcmp.eq.f32.partialorder %v1392_v26, 8.507059e+37 }
 0x26b   :  { %v1385_v36 = vsub.f32 1.0, %v1384_v28  ;;  %v1376_v10 = vsel %vm1375_vm10, %v3406_v34, %v1372_v35  ;;  %v1394_v38 = vand.u32 2147483648, %v1367_v6  ;;  %v5319_v28 = vld [vmem:[#allocation102_spill] sm:$0xff]  ;;  %v1199_v6 = vld [vmem:[#allocation4 + $0x88] sm:$0xff] }
 0x26c   :  { %3413 = vrcp.f32 %v1406_v46  ;;  %v1328_v55 = vpop.f32.mrf.mxu1  ;;  %v1341_v47 = vpop.f32.mrf.mxu2  ;;  %v1381_v59 = vsel %vm1378_vm11, %v1380_v57, %v1376_v10  ;;  %vm1413_vm1 = vweird.f32 %v1406_v46 }
 0x26d   :  { %v1329_v52 = vadd.f32 %v1328_v55, %v1316_v45  ;;  %v1386_v58 = vmul.f32 %v3408_v29, %v1385_v36  ;;  %v1342_v14 = vadd.f32 %v1341_v47, %v5319_v28  ;;  %v1395_v36 = vor.u32 1.1754944e-38, %v1394_v38 }
 0x26e   :  { %v1317_v60 = vpop.f32.mrf.mxu0  ;;  %v1417_v47 = vand.u32 2147483647, %v1406_v46 }
 0x26f   :  { %v3412_v51 = vpop.eup %3411  ;;  %v1387_v49 = vadd.f32 %v3408_v29, %v1386_v58  ;;  %v1438_v8 = vmul.f32 %v1381_v59, %v1329_v52  ;;  %v1419_v52 = vand.u32 2147483648, %v1406_v46 }
 0x270   :  { %v1407_v24 = vadd.f32 1.0, %v3412_v51  ;;  %vm1418_vm3 = vcmp.eq.f32.partialorder %v1417_v47, 8.507059e+37  ;;  %v5321_v47 = vld [vmem:[#allocation96_spill] sm:$0xff] }
 0x271   :  { %v1391_v39 = vsel %vm1390_vm14, %v3408_v29, %v1387_v49  ;;  %v1440_v55 = vadd.f32 %v1438_v8, %v1198_v63 }
 0x272   :  { %v3414_v34 = vpop.eup %3413  ;;  %3415 = vrcp.f32 %v1407_v24  ;;  %v1354_v35 = vpop.f32.mrf.mxu3  ;;  %v1396_v60 = vsel %vm1393_vm15, %v1395_v36, %v1391_v39  ;;  %v1434_v26 = vand.u32 2147483648, %v1407_v24  ;;  %v1432_v39 = vand.u32 2147483647, %v1407_v24 }
 0x273   :  { %v1409_v45 = vmul.f32 %v3414_v34, %v1406_v46  ;;  %v1355_v18 = vadd.f32 %v1354_v35, %v1342_v14  ;;  %vm1414_vm0 = vweird.f32 %v3414_v34  ;;  %3417 = vtanh.f32 %v1440_v55  ;;  %v1458_v36 = vpop.permute.xlu1 %1457 }
 0x274   :  { %v1330_v10 = vpop.f32.mrf.mxu1  ;;  %v1343_v57 = vpop.f32.mrf.mxu2  ;;  %vm1415_vm2 = vmor %vm1413_vm1, %vm1414_vm0  ;;  %v1420_v14 = vor.u32 1.1754944e-38, %v1419_v52  ;;  %vm1428_vm5 = vweird.f32 %v1407_v24  ;;  %vm1459_vm7 = vcmp.eq.s32.totalorder %v1458_v36, 1  ;;  %vm1433_vm8 = vcmp.eq.f32.partialorder %v1432_v39, 8.507059e+37  ;;  %v5330_v39 = vld [vmem:[#allocation18_spill] sm:$0xff]  ;;  %v5333_v36 = vld [vmem:[#allocation27_spill] sm:$0xff] }
 0x275   :  { %v1410_v58 = vsub.f32 1.0, %v1409_v45  ;;  %v1439_v59 = vmul.f32 %v1396_v60, %v1355_v18  ;;  %v1435_v57 = vor.u32 1.1754944e-38, %v1434_v26  ;;  %v5328_v26 = vld [vmem:[#allocation21_spill] sm:$0xff] }
 0x277   :  { %v1411_v51 = vmul.f32 %v3414_v34, %v1410_v58  ;;  %v1441_v29 = vadd.f32 %v1439_v59, %v1199_v6 }
 0x278   :  { %v3416_v28 = vpop.eup %3415 }
 0x279   :  { %v1424_v30 = vmul.f32 %v3416_v28, %v1407_v24  ;;  %v1412_v41 = vadd.f32 %v3414_v34, %v1411_v51  ;;  %vm1429_vm4 = vweird.f32 %v3416_v28  ;;  %v3418_v18 = vpop.eup %3417  ;;  %3419 = vtanh.f32 %v1441_v29  ;;  %v5322_v29 = vld [vmem:[#allocation13_spill] sm:$0xff] }
 0x27a   :  { %v1356_v63 = vpop.f32.mrf.mxu3  ;;  %vm1430_vm6 = vmor %vm1428_vm5, %vm1429_vm4 }
 0x27b   :  { %v1425_v49 = vsub.f32 1.0, %v1424_v30  ;;  %v1416_v38 = vsel %vm1415_vm2, %v3414_v34, %v1412_v41  ;;  %v5324_v63 = vld [vmem:[#allocation17_spill] sm:$0xff] }
 0x27c   :  { %v1421_v8 = vsel %vm1418_vm3, %v1420_v14, %v1416_v38  ;;  %v5323_v14 = vld [vmem:[#allocation14_spill] sm:$0xff]  ;;  %v5326_v38 = vld [vmem:[#allocation15_spill] sm:$0xff] }
 0x27d   :  { %v1426_v35 = vmul.f32 %v3416_v28, %v1425_v49  ;;  %v1444_v45 = vsub.f32 1.0, %v1421_v8  ;;  %v1448_v46 = vmul.f32 %v1421_v8, %v4229_v13  ;;  %v5325_v49 = vld [vmem:[#allocation19_spill] sm:$0xff]  ;;  %v5327_v8 = vld [vmem:[#allocation16_spill] sm:$0xff] }
 0x27f   :  { %v1427_v55 = vadd.f32 %v3416_v28, %v1426_v35  ;;  %v1446_v10 = vmul.f32 %v3418_v18, %v1444_v45  ;;  %v3420_v59 = vpop.eup %3419  ;;  %v5329_v35 = vld [vmem:[#allocation23_spill] sm:$0xff]  ;;  %v5331_v45 = vld [vmem:[#allocation20_spill] sm:$0xff]  ;;  %v5332_v18 = vld [vmem:[#allocation25_spill] sm:$0xff] }
 0x281   :  { %v1431_v30 = vsel %vm1430_vm6, %v3416_v28, %v1427_v55  ;;  %v1450_v41 = vadd.f32 %v1448_v46, %v1446_v10  ;;  %v5334_v55 = vld [vmem:[#allocation22_spill] sm:$0xff]  ;;  %v5335_v10 = vld [vmem:[#allocation24_spill] sm:$0xff]  ;;  %v5336_v46 = vld [vmem:[#allocation29_spill] sm:$0xff] }
 0x282   :  { %v1436_v34 = vsel %vm1433_vm8, %v1435_v57, %v1431_v30  ;;  %v5337_v57 = vld [vmem:[#allocation31_spill] sm:$0xff]  ;;  %v5338_v30 = vld [vmem:[#allocation26_spill] sm:$0xff] }
 0x283   :  { %v1445_v58 = vsub.f32 1.0, %v1436_v34  ;;  %v4350_v60 = vsel %vm1459_vm7, %v1450_v41, %v4229_v13  ;;  %v1449_v6 = vmul.f32 %v1436_v34, %v4237_v32  ;;  %v5339_v41 = vld [vmem:[#allocation28_spill] sm:$0xff]  ;;  %v5340_v34 = vld [vmem:[#allocation33_spill] sm:$0xff] }
 0x284   :  { %v1469_v52 = vpack.c.bf16 %v4350_v60, %v4350_v60 }
 0x285   :  { %v1447_v24 = vmul.f32 %v3420_v59, %v1445_v58  ;;  %v5341_v58 = vld [vmem:[#allocation35_spill] sm:$0xff]  ;;  %v5342_v59 = vld [vmem:[#allocation30_spill] sm:$0xff] }
 0x286   :  { %1479 = vmatmul.bf16.vlgmr.msrb.gmra.mxu0 %v1469_v52  ;;  %1505 = vmatmul.bf16.vlgmr.msrb.gmra.mxu2 %v1469_v52 }
 0x287   :  { %v1451_v51 = vadd.f32 %v1449_v6, %v1447_v24  ;;  %1575 = vmatpush.bf16.msrb.mxu0 %v5187_v40  ;;  %1601 = vmatpush.bf16.msrb.mxu2 %v5188_v15  ;;  %v5344_v24 = vld [vmem:[#allocation37_spill] sm:$0xff]  ;;  %v5345_v6 = vld [vmem:[#allocation39_spill] sm:$0xff] }
 0x289   :  { %v4359_v28 = vsel %vm1459_vm7, %v1451_v51, %v4237_v32  ;;  %v5320_v32 = vld [vmem:[#allocation95_spill] sm:$0xff]  ;;  %v5346_v51 = vld [vmem:[#allocation41_spill] sm:$0xff] }
 0x28a   :  { %v1470_v13 = vpack.c.bf16 %v4359_v28, %v4359_v28 }
 0x28b   :  { %1576 = vmatpush.bf16.msrb.mxu0 %v5189_v44  ;;  %1602 = vmatpush.bf16.msrb.mxu2 %v5190_v43 }
 0x28c   :  { %1492 = vmatmul.bf16.vlgmr.msrb.gmra.mxu1 %v1470_v13  ;;  %1518 = vmatmul.bf16.vlgmr.msrb.gmra.mxu3 %v1470_v13 }
 0x28d   :  { %1588 = vmatpush.bf16.msrb.mxu1 %v5191_v33  ;;  %1614 = vmatpush.bf16.msrb.mxu3 %v5192_v21 }
 0x28f   :  { %1577 = vmatpush.bf16.msrb.mxu0 %v5193_v53  ;;  %1603 = vmatpush.bf16.msrb.mxu2 %v5194_v19 }
 0x291   :  { %1589 = vmatpush.bf16.msrb.mxu1 %v5195_v56  ;;  %1615 = vmatpush.bf16.msrb.mxu3 %v5196_v7 }
 0x293   :  { %1578 = vmatpush.bf16.msrb.mxu0 %v5197_v1  ;;  %1604 = vmatpush.bf16.msrb.mxu2 %v3910_v54 }
 0x295   :  { %1590 = vmatpush.bf16.msrb.mxu1 %v5198_v23  ;;  %1616 = vmatpush.bf16.msrb.mxu3 %v5199_v61 }
 0x296   :  { %1531 = vmatmul.bf16.vlgmr.msra.gmra.mxu0 %v1469_v52  ;;  %1557 = vmatmul.bf16.vlgmr.msra.gmra.mxu2 %v1469_v52 }
 0x297   :  { %1579 = vmatpush.bf16.msrb.mxu0 %v5200_v0  ;;  %1605 = vmatpush.bf16.msrb.mxu2 %v3924_v48 }
 0x299   :  { %1591 = vmatpush.bf16.msrb.mxu1 %v5201_v2  ;;  %1617 = vmatpush.bf16.msrb.mxu3 %v5202_v25 }
 0x29b   :  { %1580 = vmatpush.bf16.msrb.mxu0 %v5203_v37  ;;  %1606 = vmatpush.bf16.msrb.mxu2 %v3936_v3 }
 0x29c   :  { %1544 = vmatmul.bf16.vlgmr.msra.gmra.mxu1 %v1470_v13  ;;  %1570 = vmatmul.bf16.vlgmr.msra.gmra.mxu3 %v1470_v13 }
 0x29d   :  { %1592 = vmatpush.bf16.msrb.mxu1 %v5204_v50  ;;  %1618 = vmatpush.bf16.msrb.mxu3 %v5205_v12 }
 0x29f   :  { %1581 = vmatpush.bf16.msrb.mxu0 %v3943_v42  ;;  %1607 = vmatpush.bf16.msrb.mxu2 %v3950_v5 }
 0x2a1   :  { %1593 = vmatpush.bf16.msrb.mxu1 %v5206_v62  ;;  %1619 = vmatpush.bf16.msrb.mxu3 %v3940_v20 }
 0x2a3   :  { %1582 = vmatpush.bf16.msrb.mxu0 %v3956_v31  ;;  %1608 = vmatpush.bf16.msrb.mxu2 %v3962_v27 }
 0x2a5   :  { %1594 = vmatpush.bf16.msrb.mxu1 %v3948_v16  ;;  %1620 = vmatpush.bf16.msrb.mxu3 %v3953_v11 }
 0x2a6   :  { %1583 = vmatmul.bf16.vlgmr.msrb.gmra.mxu0 %v1469_v52  ;;  %1609 = vmatmul.bf16.vlgmr.msrb.gmra.mxu2 %v1469_v52  ;;  %v5343_v52 = vld [vmem:[#allocation32_spill] sm:$0xff] }
 0x2a7   :  { %1740 = vmatpush.bf16.msra.mxu0 %v3649_v4  ;;  %1766 = vmatpush.bf16.msra.mxu2 %v3653_v9 }
 0x2a9   :  { %1595 = vmatpush.bf16.msrb.mxu1 %v5320_v32  ;;  %1621 = vmatpush.bf16.msrb.mxu3 %v5321_v47 }
 0x2ab   :  { %1741 = vmatpush.bf16.msra.mxu0 %v3660_v17  ;;  %1767 = vmatpush.bf16.msra.mxu2 %v3665_v22 }
 0x2ac   :  { %1596 = vmatmul.bf16.vlgmr.msrb.gmra.mxu1 %v1470_v13  ;;  %1622 = vmatmul.bf16.vlgmr.msrb.gmra.mxu3 %v1470_v13  ;;  %v5347_v13 = vld [vmem:[#allocation45_spill] sm:$0xff] }
 0x2ad   :  { %1753 = vmatpush.bf16.msra.mxu1 %v5322_v29  ;;  %1779 = vmatpush.bf16.msra.mxu3 %v5323_v14 }
 0x2af   :  { %1742 = vmatpush.bf16.msra.mxu0 %v5324_v63  ;;  %1768 = vmatpush.bf16.msra.mxu2 %v5325_v49 }
 0x2b1   :  { %1754 = vmatpush.bf16.msra.mxu1 %v5326_v38  ;;  %1780 = vmatpush.bf16.msra.mxu3 %v5327_v8  ;;  %v5384_v38 = vld [vmem:[#allocation99_spill] sm:$0xff] }
 0x2b3   :  { %1743 = vmatpush.bf16.msra.mxu0 %v5328_v26  ;;  %1769 = vmatpush.bf16.msra.mxu2 %v5329_v35 }
 0x2b5   :  { %1755 = vmatpush.bf16.msra.mxu1 %v5330_v39  ;;  %1781 = vmatpush.bf16.msra.mxu3 %v5331_v45  ;;  %v1464_v45 = vld [vmem:[#allocation4 + $0x98] sm:$0xff] }
 0x2b7   :  { %1744 = vmatpush.bf16.msra.mxu0 %v5332_v18  ;;  %1770 = vmatpush.bf16.msra.mxu2 %v5333_v36  ;;  %v5383_v18 = vld [vmem:[#allocation98_spill] sm:$0xff] }
 0x2b9   :  { %1756 = vmatpush.bf16.msra.mxu1 %v5334_v55  ;;  %1782 = vmatpush.bf16.msra.mxu3 %v5335_v10 }
 0x2bb   :  { %1745 = vmatpush.bf16.msra.mxu0 %v5336_v46  ;;  %1771 = vmatpush.bf16.msra.mxu2 %v5337_v57  ;;  %v5348_v57 = vld [vmem:[#allocation34_spill] sm:$0xff] }
 0x2bd   :  { %1757 = vmatpush.bf16.msra.mxu1 %v5338_v30  ;;  %1783 = vmatpush.bf16.msra.mxu3 %v5339_v41  ;;  %v5349_v30 = vld [vmem:[#allocation36_spill] sm:$0xff]  ;;  %v5350_v41 = vld [vmem:[#allocation47_spill] sm:$0xff] }
 0x2bf   :  { %1746 = vmatpush.bf16.msra.mxu0 %v5340_v34  ;;  %1772 = vmatpush.bf16.msra.mxu2 %v5341_v58  ;;  %v5351_v34 = vld [vmem:[#allocation49_spill] sm:$0xff]  ;;  %v5352_v58 = vld [vmem:[#allocation38_spill] sm:$0xff] }
 0x2c1   :  { %1758 = vmatpush.bf16.msra.mxu1 %v5342_v59  ;;  %1784 = vmatpush.bf16.msra.mxu3 %v5343_v52  ;;  %v5353_v59 = vld [vmem:[#allocation40_spill] sm:$0xff] }
 0x2c2   :  { %v5354_v52 = vld [vmem:[#allocation44_spill] sm:$0xff] }
 0x2c3   :  { %1747 = vmatpush.bf16.msra.mxu0 %v5344_v24  ;;  %1773 = vmatpush.bf16.msra.mxu2 %v5345_v6  ;;  %v5355_v24 = vld [vmem:[#allocation46_spill] sm:$0xff]  ;;  %v5356_v6 = vld [vmem:[#allocation51_spill] sm:$0xff] }
 0x2c5   :  { %1759 = vmatpush.bf16.msra.mxu1 %v5348_v57  ;;  %1785 = vmatpush.bf16.msra.mxu3 %v5349_v30  ;;  %v5359_v57 = vld [vmem:[#allocation50_spill] sm:$0xff]  ;;  %v5360_v30 = vld [vmem:[#allocation55_spill] sm:$0xff] }
 0x2c7   :  { %1792 = vmatpush.bf16.msrb.mxu0 %v5346_v51  ;;  %1818 = vmatpush.bf16.msrb.mxu2 %v5347_v13  ;;  %v5357_v51 = vld [vmem:[#allocation53_spill] sm:$0xff]  ;;  %v5358_v13 = vld [vmem:[#allocation48_spill] sm:$0xff] }
 0x2c9   :  { %1760 = vmatpush.bf16.msra.mxu1 %v5352_v58  ;;  %1786 = vmatpush.bf16.msra.mxu3 %v5353_v59  ;;  %v5363_v58 = vld [vmem:[#allocation54_spill] sm:$0xff]  ;;  %v5364_v59 = vld [vmem:[#allocation59_spill] sm:$0xff] }
 0x2cb   :  { %1793 = vmatpush.bf16.msrb.mxu0 %v5350_v41  ;;  %1819 = vmatpush.bf16.msrb.mxu2 %v5351_v34  ;;  %v5361_v41 = vld [vmem:[#allocation57_spill] sm:$0xff]  ;;  %v5362_v34 = vld [vmem:[#allocation52_spill] sm:$0xff] }
 0x2cd   :  { %1805 = vmatpush.bf16.msrb.mxu1 %v5354_v52  ;;  %1831 = vmatpush.bf16.msrb.mxu3 %v5355_v24  ;;  %v5365_v52 = vld [vmem:[#allocation61_spill] sm:$0xff]  ;;  %v5366_v24 = vld [vmem:[#allocation56_spill] sm:$0xff] }
 0x2cf   :  { %1794 = vmatpush.bf16.msrb.mxu0 %v5356_v6  ;;  %1820 = vmatpush.bf16.msrb.mxu2 %v5357_v51  ;;  %v5367_v6 = vld [vmem:[#allocation58_spill] sm:$0xff]  ;;  %v5368_v51 = vld [vmem:[#allocation63_spill] sm:$0xff] }
 0x2d1   :  { %1806 = vmatpush.bf16.msrb.mxu1 %v5358_v13  ;;  %1832 = vmatpush.bf16.msrb.mxu3 %v5359_v57  ;;  %v5369_v13 = vld [vmem:[#allocation65_spill] sm:$0xff]  ;;  %v5370_v57 = vld [vmem:[#allocation60_spill] sm:$0xff] }
 0x2d3   :  { %1795 = vmatpush.bf16.msrb.mxu0 %v5360_v30  ;;  %1821 = vmatpush.bf16.msrb.mxu2 %v5361_v41  ;;  %v5371_v30 = vld [vmem:[#allocation62_spill] sm:$0xff]  ;;  %v5372_v41 = vld [vmem:[#allocation67_spill] sm:$0xff] }
 0x2d5   :  { %1807 = vmatpush.bf16.msrb.mxu1 %v5362_v34  ;;  %1833 = vmatpush.bf16.msrb.mxu3 %v5363_v58  ;;  %v5373_v34 = vld [vmem:[#allocation69_spill] sm:$0xff]  ;;  %v5374_v58 = vld [vmem:[#allocation64_spill] sm:$0xff] }
 0x2d7   :  { %1796 = vmatpush.bf16.msrb.mxu0 %v5364_v59  ;;  %1822 = vmatpush.bf16.msrb.mxu2 %v5365_v52  ;;  %v5375_v59 = vld [vmem:[#allocation66_spill] sm:$0xff]  ;;  %v5376_v52 = vld [vmem:[#allocation71_spill] sm:$0xff] }
 0x2d9   :  { %1808 = vmatpush.bf16.msrb.mxu1 %v5366_v24  ;;  %1834 = vmatpush.bf16.msrb.mxu3 %v5367_v6  ;;  %v5377_v24 = vld [vmem:[#allocation73_spill] sm:$0xff]  ;;  %v5378_v6 = vld [vmem:[#allocation68_spill] sm:$0xff] }
 0x2db   :  { %1797 = vmatpush.bf16.msrb.mxu0 %v5368_v51  ;;  %1823 = vmatpush.bf16.msrb.mxu2 %v5369_v13  ;;  %v5379_v51 = vld [vmem:[#allocation70_spill] sm:$0xff]  ;;  %v5380_v13 = vld [vmem:[#allocation72_spill] sm:$0xff] }
 0x2dd   :  { %1809 = vmatpush.bf16.msrb.mxu1 %v5370_v57  ;;  %1835 = vmatpush.bf16.msrb.mxu3 %v5371_v30  ;;  %v5381_v57 = vld [vmem:[#allocation74_spill] sm:$0xff] }
 0x2df   :  { %1798 = vmatpush.bf16.msrb.mxu0 %v5372_v41  ;;  %1824 = vmatpush.bf16.msrb.mxu2 %v5373_v34  ;;  %v5382_v41 = vld [vmem:[#allocation97_spill] sm:$0xff] }
 0x2e0   :  { %v1463_v34 = vld [vmem:[#allocation4 + $0x90] sm:$0xff] }
 0x2e1   :  { %1810 = vmatpush.bf16.msrb.mxu1 %v5374_v58  ;;  %1836 = vmatpush.bf16.msrb.mxu3 %v5375_v59 }
 0x2e3   :  { %1799 = vmatpush.bf16.msrb.mxu0 %v5376_v52  ;;  %1825 = vmatpush.bf16.msrb.mxu2 %v5377_v24 }
 0x2e5   :  { %1811 = vmatpush.bf16.msrb.mxu1 %v5378_v6  ;;  %1837 = vmatpush.bf16.msrb.mxu3 %v5379_v51 }
 0x2e9   :  { %1812 = vmatpush.bf16.msrb.mxu1 %v5380_v13  ;;  %1838 = vmatpush.bf16.msrb.mxu3 %v5381_v57 }
 0x303   :  { %v1480_v30 = vpop.f32.mrf.mxu0 }
 0x304   :  { %v1481_v46 = vadd.f32 %v1480_v30, %v5382_v41 }
 0x309   :  { %v1493_v10 = vpop.f32.mrf.mxu1  ;;  %v1506_v58 = vpop.f32.mrf.mxu2 }
 0x30a   :  { %v1494_v55 = vadd.f32 %v1493_v10, %v1481_v46  ;;  %v1507_v24 = vadd.f32 %v1506_v58, %v5383_v18 }
 0x30b   :  { %v1482_v59 = vpop.f32.mrf.mxu0 }
 0x30c   :  { %v1627_v36 = vadd.f32 %v1494_v55, %v1463_v34  ;;  %v1465_v55 = vld [vmem:[#allocation4 + $0xa0] sm:$0xff] }
 0x30e   :  { %v3228_v52 = vmul.f32 -1.442695, %v1627_v36 }
 0x30f   :  { %v1519_v6 = vpop.f32.mrf.mxu3 }
 0x310   :  { %3421 = vpow2.f32 %v3228_v52  ;;  %v1520_v51 = vadd.f32 %v1519_v6, %v1507_v24  ;;  %v5385_v6 = vld [vmem:[#allocation100_spill] sm:$0xff] }
 0x311   :  { %v1495_v39 = vpop.f32.mrf.mxu1  ;;  %v1508_v13 = vpop.f32.mrf.mxu2 }
 0x312   :  { %v1628_v35 = vadd.f32 %v1520_v51, %v1464_v45 }
 0x313   :  { %v1532_v57 = vpop.f32.mrf.mxu0 }
 0x314   :  { %v3229_v26 = vmul.f32 -1.442695, %v1628_v35  ;;  %v1533_v10 = vadd.f32 %v1532_v57, %v5384_v38  ;;  %v1466_v35 = vld [vmem:[#allocation4 + $0xa8] sm:$0xff] }
 0x316   :  { %v3422_v8 = vpop.eup %3421  ;;  %3423 = vpow2.f32 %v3229_v26 }
 0x317   :  { %v1635_v30 = vadd.f32 1.0, %v3422_v8  ;;  %v1521_v41 = vpop.f32.mrf.mxu3 }
 0x319   :  { %3425 = vrcp.f32 %v1635_v30  ;;  %v1545_v36 = vpop.f32.mrf.mxu1  ;;  %v1558_v46 = vpop.f32.mrf.mxu2  ;;  %vm1642_vm10 = vweird.f32 %v1635_v30 }
 0x31a   :  { %v1546_v34 = vadd.f32 %v1545_v36, %v1533_v10  ;;  %v1559_v45 = vadd.f32 %v1558_v46, %v5385_v6  ;;  %v1648_v46 = vand.u32 2147483648, %v1635_v30 }
 0x31b   :  { %v1534_v58 = vpop.f32.mrf.mxu0 }
 0x31c   :  { %v3424_v59 = vpop.eup %3423  ;;  %v1667_v52 = vadd.f32 %v1546_v34, %v1465_v55 }
 0x31d   :  { %v1636_v24 = vadd.f32 1.0, %v3424_v59 }
 0x31e   :  { %v3230_v39 = vmul.f32 -1.442695, %v1667_v52 }
 0x31f   :  { %v3426_v51 = vpop.eup %3425  ;;  %3427 = vrcp.f32 %v1636_v24  ;;  %v1571_v26 = vpop.f32.mrf.mxu3  ;;  %vm1657_vm14 = vweird.f32 %v1636_v24 }
 0x320   :  { %3429 = vpow2.f32 %v3230_v39  ;;  %v1572_v8 = vadd.f32 %v1571_v26, %v1559_v45  ;;  %v1638_v41 = vmul.f32 %v3426_v51, %v1635_v30  ;;  %vm1643_vm9 = vweird.f32 %v3426_v51  ;;  %v5386_v45 = vld [vmem:[#allocation101_spill] sm:$0xff] }
 0x321   :  { %v1547_v57 = vpop.f32.mrf.mxu1  ;;  %v1560_v13 = vpop.f32.mrf.mxu2  ;;  %v1646_v39 = vand.u32 2147483647, %v1635_v30  ;;  %vm1644_vm11 = vmor %vm1642_vm10, %vm1643_vm9 }
 0x322   :  { %v1668_v38 = vadd.f32 %v1572_v8, %v1466_v35  ;;  %v1639_v18 = vsub.f32 1.0, %v1638_v41  ;;  %v1649_v41 = vor.u32 1.1754944e-38, %v1648_v46 }
 0x323   :  { %v1584_v49 = vpop.f32.mrf.mxu0  ;;  %vm1647_vm12 = vcmp.eq.f32.partialorder %v1646_v39, 8.507059e+37 }
 0x324   :  { %v3231_v10 = vmul.f32 -1.442695, %v1668_v38  ;;  %v1640_v36 = vmul.f32 %v3426_v51, %v1639_v18  ;;  %v1585_v26 = vadd.f32 %v1584_v49, %v5386_v45  ;;  %v1661_v49 = vand.u32 2147483647, %v1636_v24  ;;  %v1467_v45 = vld [vmem:[#allocation4 + $0xb0] sm:$0xff] }
 0x325   :  { %v3428_v58 = vpop.eup %3427 }
 0x326   :  { %v3430_v55 = vpop.eup %3429  ;;  %3431 = vpow2.f32 %v3231_v10  ;;  %v1641_v34 = vadd.f32 %v3426_v51, %v1640_v36  ;;  %v1653_v59 = vmul.f32 %v3428_v58, %v1636_v24  ;;  %vm1658_vm13 = vweird.f32 %v3428_v58 }
 0x327   :  { %v1675_v52 = vadd.f32 1.0, %v3430_v55  ;;  %v1573_v6 = vpop.f32.mrf.mxu3  ;;  %vm1659_vm15 = vmor %vm1657_vm14, %vm1658_vm13  ;;  %vm1662_vm0 = vcmp.eq.f32.partialorder %v1661_v49, 8.507059e+37 }
 0x328   :  { %v1654_v57 = vsub.f32 1.0, %v1653_v59  ;;  %v1645_v8 = vsel %vm1644_vm11, %v3426_v51, %v1641_v34  ;;  %v1663_v6 = vand.u32 2147483648, %v1636_v24  ;;  %v5387_v59 = vld [vmem:[#allocation102_spill] sm:$0xff] }
 0x329   :  { %3433 = vrcp.f32 %v1675_v52  ;;  %v1597_v35 = vpop.f32.mrf.mxu1  ;;  %v1610_v38 = vpop.f32.mrf.mxu2  ;;  %v1650_v63 = vsel %vm1647_vm12, %v1649_v41, %v1645_v8  ;;  %vm1682_vm2 = vweird.f32 %v1675_v52 }
 0x32a   :  { %v1598_v18 = vadd.f32 %v1597_v35, %v1585_v26  ;;  %v1655_v13 = vmul.f32 %v3428_v58, %v1654_v57  ;;  %v1611_v29 = vadd.f32 %v1610_v38, %v5387_v59  ;;  %v1664_v57 = vor.u32 1.1754944e-38, %v1663_v6  ;;  %v1468_v38 = vld [vmem:[#allocation4 + $0xb8] sm:$0xff] }
 0x32b   :  { %v1586_v10 = vpop.f32.mrf.mxu0 }
 0x32c   :  { %v3432_v36 = vpop.eup %3431  ;;  %v1656_v55 = vadd.f32 %v3428_v58, %v1655_v13  ;;  %v1707_v30 = vmul.f32 %v1650_v63, %v1598_v18  ;;  %v1688_v63 = vand.u32 2147483648, %v1675_v52 }
 0x32d   :  { %v1676_v14 = vadd.f32 1.0, %v3432_v36  ;;  %v1686_v36 = vand.u32 2147483647, %v1675_v52 }
 0x32e   :  { %v1660_v46 = vsel %vm1659_vm15, %v3428_v58, %v1656_v55  ;;  %v1709_v35 = vadd.f32 %v1707_v30, %v1467_v45 }
 0x32f   :  { %v3434_v51 = vpop.eup %3433  ;;  %3435 = vrcp.f32 %v1676_v14  ;;  %v1623_v34 = vpop.f32.mrf.mxu3  ;;  %v1665_v10 = vsel %vm1662_vm0, %v1664_v57, %v1660_v46  ;;  %vm1687_vm4 = vcmp.eq.f32.partialorder %v1686_v36, 8.507059e+37  ;;  %v1703_v49 = vand.u32 2147483648, %v1676_v14 }
 0x330   :  { %v1678_v26 = vmul.f32 %v3434_v51, %v1675_v52  ;;  %v1624_v39 = vadd.f32 %v1623_v34, %v1611_v29  ;;  %vm1683_vm1 = vweird.f32 %v3434_v51  ;;  %3437 = vtanh.f32 %v1709_v35 }
 0x331   :  { %v1599_v8 = vpop.f32.mrf.mxu1  ;;  %v1612_v41 = vpop.f32.mrf.mxu2  ;;  %vm1684_vm3 = vmor %vm1682_vm2, %vm1683_vm1  ;;  %v1689_v29 = vor.u32 1.1754944e-38, %v1688_v63  ;;  %vm1697_vm6 = vweird.f32 %v1676_v14 }
 0x332   :  { %v1679_v13 = vsub.f32 1.0, %v1678_v26  ;;  %v1708_v18 = vmul.f32 %v1665_v10, %v1624_v39  ;;  %v1701_v39 = vand.u32 2147483647, %v1676_v14  ;;  %v1704_v41 = vor.u32 1.1754944e-38, %v1703_v49  ;;  %v5391_v49 = vld [vmem:[#allocation14_spill] sm:$0xff] }
 0x334   :  { %v1680_v24 = vmul.f32 %v3434_v51, %v1679_v13  ;;  %v1710_v55 = vadd.f32 %v1708_v18, %v1468_v38  ;;  %v1727_v13 = vpop.permute.xlu1 %1726  ;;  %vm1702_vm8 = vcmp.eq.f32.partialorder %v1701_v39, 8.507059e+37  ;;  %v5395_v39 = vld [vmem:[#allocation16_spill] sm:$0xff] }
 0x335   :  { %v3436_v59 = vpop.eup %3435  ;;  %vm1728_vm9 = vcmp.eq.s32.totalorder %v1727_v13, 1  ;;  %v5401_v13 = vld [vmem:[#allocation27_spill] sm:$0xff] }
 0x336   :  { %v1693_v47 = vmul.f32 %v3436_v59, %v1676_v14  ;;  %v1681_v58 = vadd.f32 %v3434_v51, %v1680_v24  ;;  %vm1698_vm5 = vweird.f32 %v3436_v59  ;;  %v3438_v57 = vpop.eup %3437  ;;  %3439 = vtanh.f32 %v1710_v55 }
 0x337   :  { %v1625_v45 = vpop.f32.mrf.mxu3  ;;  %vm1699_vm7 = vmor %vm1697_vm6, %vm1698_vm5 }
 0x338   :  { %v1694_v6 = vsub.f32 1.0, %v1693_v47  ;;  %v1685_v30 = vsel %vm1684_vm3, %v3434_v51, %v1681_v58 }
 0x339   :  { %v1690_v34 = vsel %vm1687_vm4, %v1689_v29, %v1685_v30  ;;  %v3522_v29 = vld [vmem:[%s4870_s1] sm:$0xff]  ;;  %v5390_v30 = vld [vmem:[#allocation13_spill] sm:$0xff] }
 0x33a   :  { %v1695_v46 = vmul.f32 %v3436_v59, %v1694_v6  ;;  %v1713_v26 = vsub.f32 1.0, %v1690_v34  ;;  %v1717_v52 = vmul.f32 %v1690_v34, %v4350_v60  ;;  %vm3237_vm10 = vcmp.gt.s32.totalorder %v3522_v29, 4  ;;  %v5389_v6 = vld [vmem:[#allocation96_spill] sm:$0xff]  ;;  %v5392_v34 = vld [vmem:[#allocation17_spill] sm:$0xff] }
 0x33b   :  { %vm3242_vm11 = vcmp.gt.s32.totalorder %v3522_v29, 5  ;;  %v5412_v29 = vld [vmem:[#allocation37_spill] sm:$0xff] }
 0x33c   :  { %v1715_v35 = vmul.f32 %v3438_v57, %v1713_v26  ;;  %v1696_v8 = vadd.f32 %v3436_v59, %v1695_v46  ;;  %v3440_v24 = vpop.eup %3439  ;;  %v5393_v46 = vld [vmem:[#allocation19_spill] sm:$0xff]  ;;  %v5396_v57 = vld [vmem:[#allocation21_spill] sm:$0xff] }
 0x33d   :  { %v5394_v26 = vld [vmem:[#allocation15_spill] sm:$0xff] }
 0x33e   :  { %v1719_v10 = vadd.f32 %v1717_v52, %v1715_v35  ;;  %v1700_v47 = vsel %vm1699_vm7, %v3436_v59, %v1696_v8  ;;  %v5397_v35 = vld [vmem:[#allocation23_spill] sm:$0xff]  ;;  %v5398_v52 = vld [vmem:[#allocation18_spill] sm:$0xff]  ;;  %v5399_v8 = vld [vmem:[#allocation20_spill] sm:$0xff] }
 0x33f   :  { %v1705_v51 = vsel %vm1702_vm8, %v1704_v41, %v1700_v47  ;;  %v5400_v41 = vld [vmem:[#allocation25_spill] sm:$0xff]  ;;  %v5403_v47 = vld [vmem:[#allocation24_spill] sm:$0xff] }
 0x340   :  { %v4465_v63 = vsel %vm1728_vm9, %v1719_v10, %v4350_v60  ;;  %v1714_v18 = vsub.f32 1.0, %v1705_v51  ;;  %v1718_v38 = vmul.f32 %v1705_v51, %v4359_v28  ;;  %v5402_v10 = vld [vmem:[#allocation22_spill] sm:$0xff]  ;;  %v5404_v51 = vld [vmem:[#allocation29_spill] sm:$0xff] }
 0x341   :  { %v1738_v14 = vpack.c.bf16 %v4465_v63, %v4465_v63 }
 0x342   :  { %v1716_v36 = vmul.f32 %v3440_v24, %v1714_v18  ;;  %v5405_v18 = vld [vmem:[#allocation31_spill] sm:$0xff]  ;;  %v5406_v24 = vld [vmem:[#allocation26_spill] sm:$0xff] }
 0x343   :  { %1748 = vmatmul.bf16.vlgmr.msra.gmra.mxu0 %v1738_v14  ;;  %1774 = vmatmul.bf16.vlgmr.msra.gmra.mxu2 %v1738_v14 }
 0x344   :  { %v1720_v58 = vadd.f32 %v1718_v38, %v1716_v36  ;;  %1844 = vmatpush.bf16.msra.mxu0 %v5187_v40  ;;  %1870 = vmatpush.bf16.msra.mxu2 %v5188_v15  ;;  %v5408_v36 = vld [vmem:[#allocation33_spill] sm:$0xff]  ;;  %v5409_v38 = vld [vmem:[#allocation35_spill] sm:$0xff] }
 0x346   :  { %v4473_v59 = vsel %vm1728_vm9, %v1720_v58, %v4359_v28  ;;  %v5388_v28 = vmov 0   ;;  %v5410_v58 = vld [vmem:[#allocation30_spill] sm:$0xff] }
 0x347   :  { %v1739_v60 = vpack.c.bf16 %v4473_v59, %v4473_v59  ;;  %v1993_v55 = vsel %vm3237_vm10, 1, %v5388_v28  ;;  %v2262_v45 = vsel %vm3242_vm11, 1, %v5388_v28  ;;  %v5413_v28 = vld [vmem:[#allocation39_spill] sm:$0xff] }
 0x348   :  { %1845 = vmatpush.bf16.msra.mxu0 %v5189_v44  ;;  %1871 = vmatpush.bf16.msra.mxu2 %v5190_v43 }
 0x349   :  { %1761 = vmatmul.bf16.vlgmr.msra.gmra.mxu1 %v1739_v60  ;;  %1787 = vmatmul.bf16.vlgmr.msra.gmra.mxu3 %v1739_v60 }
 0x34a   :  { %1857 = vmatpush.bf16.msra.mxu1 %v5191_v33  ;;  %1883 = vmatpush.bf16.msra.mxu3 %v5192_v21 }
 0x34b   :  { %1995 = vperm.xlu2 %3360, %v1993_v55   ;;  %v5414_v55 = vld [vmem:[#allocation41_spill] sm:$0xff] }
 0x34c   :  { %1846 = vmatpush.bf16.msra.mxu0 %v5193_v53  ;;  %1872 = vmatpush.bf16.msra.mxu2 %v5194_v19 }
 0x34e   :  { %1858 = vmatpush.bf16.msra.mxu1 %v5195_v56  ;;  %1884 = vmatpush.bf16.msra.mxu3 %v5196_v7 }
 0x350   :  { %1847 = vmatpush.bf16.msra.mxu0 %v5197_v1  ;;  %1873 = vmatpush.bf16.msra.mxu2 %v3910_v54 }
 0x352   :  { %1859 = vmatpush.bf16.msra.mxu1 %v5198_v23  ;;  %1885 = vmatpush.bf16.msra.mxu3 %v5199_v61 }
 0x353   :  { %1800 = vmatmul.bf16.vlgmr.msrb.gmra.mxu0 %v1738_v14  ;;  %1826 = vmatmul.bf16.vlgmr.msrb.gmra.mxu2 %v1738_v14 }
 0x354   :  { %1848 = vmatpush.bf16.msra.mxu0 %v5200_v0  ;;  %1874 = vmatpush.bf16.msra.mxu2 %v3924_v48 }
 0x355   :  { %2264 = vperm.xlu2 %3360, %v2262_v45   ;;  %v5415_v45 = vld [vmem:[#allocation45_spill] sm:$0xff] }
 0x356   :  { %1860 = vmatpush.bf16.msra.mxu1 %v5201_v2  ;;  %1886 = vmatpush.bf16.msra.mxu3 %v5202_v25 }
 0x358   :  { %1849 = vmatpush.bf16.msra.mxu0 %v5203_v37  ;;  %1875 = vmatpush.bf16.msra.mxu2 %v3936_v3 }
 0x359   :  { %1813 = vmatmul.bf16.vlgmr.msrb.gmra.mxu1 %v1739_v60  ;;  %1839 = vmatmul.bf16.vlgmr.msrb.gmra.mxu3 %v1739_v60 }
 0x35a   :  { %1861 = vmatpush.bf16.msra.mxu1 %v5204_v50  ;;  %1887 = vmatpush.bf16.msra.mxu3 %v5205_v12 }
 0x35c   :  { %1850 = vmatpush.bf16.msra.mxu0 %v3943_v42  ;;  %1876 = vmatpush.bf16.msra.mxu2 %v3950_v5 }
 0x35e   :  { %1862 = vmatpush.bf16.msra.mxu1 %v5206_v62  ;;  %1888 = vmatpush.bf16.msra.mxu3 %v3940_v20 }
 0x360   :  { %1851 = vmatpush.bf16.msra.mxu0 %v3956_v31  ;;  %1877 = vmatpush.bf16.msra.mxu2 %v3962_v27 }
 0x362   :  { %1863 = vmatpush.bf16.msra.mxu1 %v3948_v16  ;;  %1889 = vmatpush.bf16.msra.mxu3 %v3953_v11 }
 0x363   :  { %1852 = vmatmul.bf16.vlgmr.msra.gmra.mxu0 %v1738_v14  ;;  %1878 = vmatmul.bf16.vlgmr.msra.gmra.mxu2 %v1738_v14  ;;  %v5407_v14 = vld [vmem:[#allocation28_spill] sm:$0xff] }
 0x364   :  { %2009 = vmatpush.bf16.msrb.mxu0 %v3649_v4  ;;  %2035 = vmatpush.bf16.msrb.mxu2 %v3653_v9 }
 0x366   :  { %1864 = vmatpush.bf16.msra.mxu1 %v5320_v32  ;;  %1890 = vmatpush.bf16.msra.mxu3 %v5389_v6 }
 0x368   :  { %2010 = vmatpush.bf16.msrb.mxu0 %v3660_v17  ;;  %2036 = vmatpush.bf16.msrb.mxu2 %v3665_v22 }
 0x369   :  { %1865 = vmatmul.bf16.vlgmr.msra.gmra.mxu1 %v1739_v60  ;;  %1891 = vmatmul.bf16.vlgmr.msra.gmra.mxu3 %v1739_v60  ;;  %v5411_v60 = vld [vmem:[#allocation32_spill] sm:$0xff] }
 0x36a   :  { %2022 = vmatpush.bf16.msrb.mxu1 %v5390_v30  ;;  %2048 = vmatpush.bf16.msrb.mxu3 %v5391_v49 }
 0x36c   :  { %2011 = vmatpush.bf16.msrb.mxu0 %v5392_v34  ;;  %2037 = vmatpush.bf16.msrb.mxu2 %v5393_v46 }
 0x36e   :  { %2023 = vmatpush.bf16.msrb.mxu1 %v5394_v26  ;;  %2049 = vmatpush.bf16.msrb.mxu3 %v5395_v39  ;;  %v5452_v26 = vld [vmem:[#allocation99_spill] sm:$0xff] }
 0x370   :  { %2012 = vmatpush.bf16.msrb.mxu0 %v5396_v57  ;;  %2038 = vmatpush.bf16.msrb.mxu2 %v5397_v35 }
 0x372   :  { %2024 = vmatpush.bf16.msrb.mxu1 %v5398_v52  ;;  %2050 = vmatpush.bf16.msrb.mxu3 %v5399_v8  ;;  %v1733_v8 = vld [vmem:[#allocation4 + $0xc8] sm:$0xff] }
 0x374   :  { %2013 = vmatpush.bf16.msrb.mxu0 %v5400_v41  ;;  %2039 = vmatpush.bf16.msrb.mxu2 %v5401_v13  ;;  %v5451_v41 = vld [vmem:[#allocation98_spill] sm:$0xff] }
 0x376   :  { %2025 = vmatpush.bf16.msrb.mxu1 %v5402_v10  ;;  %2051 = vmatpush.bf16.msrb.mxu3 %v5403_v47 }
 0x378   :  { %2014 = vmatpush.bf16.msrb.mxu0 %v5404_v51  ;;  %2040 = vmatpush.bf16.msrb.mxu2 %v5405_v18  ;;  %v5416_v18 = vld [vmem:[#allocation34_spill] sm:$0xff] }
 0x37a   :  { %2026 = vmatpush.bf16.msrb.mxu1 %v5406_v24  ;;  %2052 = vmatpush.bf16.msrb.mxu3 %v5407_v14  ;;  %v5417_v24 = vld [vmem:[#allocation36_spill] sm:$0xff]  ;;  %v5418_v14 = vld [vmem:[#allocation47_spill] sm:$0xff] }
 0x37c   :  { %2015 = vmatpush.bf16.msrb.mxu0 %v5408_v36  ;;  %2041 = vmatpush.bf16.msrb.mxu2 %v5409_v38  ;;  %v5419_v36 = vld [vmem:[#allocation49_spill] sm:$0xff]  ;;  %v5420_v38 = vld [vmem:[#allocation38_spill] sm:$0xff] }
 0x37e   :  { %2027 = vmatpush.bf16.msrb.mxu1 %v5410_v58  ;;  %2053 = vmatpush.bf16.msrb.mxu3 %v5411_v60  ;;  %v5421_v58 = vld [vmem:[#allocation40_spill] sm:$0xff] }
 0x37f   :  { %v5422_v60 = vld [vmem:[#allocation44_spill] sm:$0xff] }
 0x380   :  { %2016 = vmatpush.bf16.msrb.mxu0 %v5412_v29  ;;  %2042 = vmatpush.bf16.msrb.mxu2 %v5413_v28  ;;  %v5423_v29 = vld [vmem:[#allocation46_spill] sm:$0xff]  ;;  %v5424_v28 = vld [vmem:[#allocation51_spill] sm:$0xff] }
 0x382   :  { %2028 = vmatpush.bf16.msrb.mxu1 %v5416_v18  ;;  %2054 = vmatpush.bf16.msrb.mxu3 %v5417_v24  ;;  %v5427_v18 = vld [vmem:[#allocation50_spill] sm:$0xff]  ;;  %v5428_v24 = vld [vmem:[#allocation55_spill] sm:$0xff] }
 0x384   :  { %2061 = vmatpush.bf16.msra.mxu0 %v5414_v55  ;;  %2087 = vmatpush.bf16.msra.mxu2 %v5415_v45  ;;  %v5425_v55 = vld [vmem:[#allocation53_spill] sm:$0xff]  ;;  %v5426_v45 = vld [vmem:[#allocation48_spill] sm:$0xff] }
 0x386   :  { %2029 = vmatpush.bf16.msrb.mxu1 %v5420_v38  ;;  %2055 = vmatpush.bf16.msrb.mxu3 %v5421_v58  ;;  %v5431_v38 = vld [vmem:[#allocation54_spill] sm:$0xff]  ;;  %v5432_v58 = vld [vmem:[#allocation59_spill] sm:$0xff] }
 0x388   :  { %2062 = vmatpush.bf16.msra.mxu0 %v5418_v14  ;;  %2088 = vmatpush.bf16.msra.mxu2 %v5419_v36  ;;  %v5429_v14 = vld [vmem:[#allocation57_spill] sm:$0xff]  ;;  %v5430_v36 = vld [vmem:[#allocation52_spill] sm:$0xff] }
 0x38a   :  { %2074 = vmatpush.bf16.msra.mxu1 %v5422_v60  ;;  %2100 = vmatpush.bf16.msra.mxu3 %v5423_v29  ;;  %v5433_v60 = vld [vmem:[#allocation61_spill] sm:$0xff]  ;;  %v5434_v29 = vld [vmem:[#allocation56_spill] sm:$0xff] }
 0x38c   :  { %2063 = vmatpush.bf16.msra.mxu0 %v5424_v28  ;;  %2089 = vmatpush.bf16.msra.mxu2 %v5425_v55  ;;  %v5435_v28 = vld [vmem:[#allocation58_spill] sm:$0xff]  ;;  %v5436_v55 = vld [vmem:[#allocation63_spill] sm:$0xff] }
 0x38e   :  { %2075 = vmatpush.bf16.msra.mxu1 %v5426_v45  ;;  %2101 = vmatpush.bf16.msra.mxu3 %v5427_v18  ;;  %v5437_v45 = vld [vmem:[#allocation65_spill] sm:$0xff]  ;;  %v5438_v18 = vld [vmem:[#allocation60_spill] sm:$0xff] }
 0x390   :  { %2064 = vmatpush.bf16.msra.mxu0 %v5428_v24  ;;  %2090 = vmatpush.bf16.msra.mxu2 %v5429_v14  ;;  %v5439_v24 = vld [vmem:[#allocation62_spill] sm:$0xff]  ;;  %v5440_v14 = vld [vmem:[#allocation67_spill] sm:$0xff] }
 0x392   :  { %2076 = vmatpush.bf16.msra.mxu1 %v5430_v36  ;;  %2102 = vmatpush.bf16.msra.mxu3 %v5431_v38  ;;  %v5441_v36 = vld [vmem:[#allocation69_spill] sm:$0xff]  ;;  %v5442_v38 = vld [vmem:[#allocation64_spill] sm:$0xff] }
 0x394   :  { %2065 = vmatpush.bf16.msra.mxu0 %v5432_v58  ;;  %2091 = vmatpush.bf16.msra.mxu2 %v5433_v60  ;;  %v5443_v58 = vld [vmem:[#allocation66_spill] sm:$0xff]  ;;  %v5444_v60 = vld [vmem:[#allocation71_spill] sm:$0xff] }
 0x396   :  { %2077 = vmatpush.bf16.msra.mxu1 %v5434_v29  ;;  %2103 = vmatpush.bf16.msra.mxu3 %v5435_v28  ;;  %v5445_v29 = vld [vmem:[#allocation73_spill] sm:$0xff]  ;;  %v5446_v28 = vld [vmem:[#allocation68_spill] sm:$0xff] }
 0x398   :  { %2066 = vmatpush.bf16.msra.mxu0 %v5436_v55  ;;  %2092 = vmatpush.bf16.msra.mxu2 %v5437_v45  ;;  %v5447_v55 = vld [vmem:[#allocation70_spill] sm:$0xff]  ;;  %v5448_v45 = vld [vmem:[#allocation72_spill] sm:$0xff] }
 0x39a   :  { %2078 = vmatpush.bf16.msra.mxu1 %v5438_v18  ;;  %2104 = vmatpush.bf16.msra.mxu3 %v5439_v24  ;;  %v5449_v18 = vld [vmem:[#allocation74_spill] sm:$0xff] }
 0x39c   :  { %2067 = vmatpush.bf16.msra.mxu0 %v5440_v14  ;;  %2093 = vmatpush.bf16.msra.mxu2 %v5441_v36  ;;  %v5450_v14 = vld [vmem:[#allocation97_spill] sm:$0xff]  ;;  %v1732_v36 = vld [vmem:[#allocation4 + $0xc0] sm:$0xff] }
 0x39e   :  { %2079 = vmatpush.bf16.msra.mxu1 %v5442_v38  ;;  %2105 = vmatpush.bf16.msra.mxu3 %v5443_v58 }
 0x3a0   :  { %2068 = vmatpush.bf16.msra.mxu0 %v5444_v60  ;;  %2094 = vmatpush.bf16.msra.mxu2 %v5445_v29 }
 0x3a2   :  { %2080 = vmatpush.bf16.msra.mxu1 %v5446_v28  ;;  %2106 = vmatpush.bf16.msra.mxu3 %v5447_v55 }
 0x3a6   :  { %2081 = vmatpush.bf16.msra.mxu1 %v5448_v45  ;;  %2107 = vmatpush.bf16.msra.mxu3 %v5449_v18 }
 0x3c0   :  { %v1749_v24 = vpop.f32.mrf.mxu0 }
 0x3c1   :  { %v1750_v51 = vadd.f32 %v1749_v24, %v5450_v14 }
 0x3c6   :  { %v1762_v47 = vpop.f32.mrf.mxu1  ;;  %v1775_v38 = vpop.f32.mrf.mxu2 }
 0x3c7   :  { %v1763_v10 = vadd.f32 %v1762_v47, %v1750_v51  ;;  %v1776_v29 = vadd.f32 %v1775_v38, %v5451_v41 }
 0x3c8   :  { %v1751_v58 = vpop.f32.mrf.mxu0 }
 0x3c9   :  { %v1896_v13 = vadd.f32 %v1763_v10, %v1732_v36  ;;  %v1734_v10 = vld [vmem:[#allocation4 + $0xd0] sm:$0xff] }
 0x3cb   :  { %v3233_v60 = vmul.f32 -1.442695, %v1896_v13 }
 0x3cc   :  { %v1788_v28 = vpop.f32.mrf.mxu3 }
 0x3cd   :  { %3441 = vpow2.f32 %v3233_v60  ;;  %v1789_v55 = vadd.f32 %v1788_v28, %v1776_v29  ;;  %v5453_v28 = vld [vmem:[#allocation100_spill] sm:$0xff] }
 0x3ce   :  { %v1764_v52 = vpop.f32.mrf.mxu1  ;;  %v1777_v45 = vpop.f32.mrf.mxu2 }
 0x3cf   :  { %v1897_v35 = vadd.f32 %v1789_v55, %v1733_v8 }
 0x3d0   :  { %v1801_v18 = vpop.f32.mrf.mxu0 }
 0x3d1   :  { %v3234_v57 = vmul.f32 -1.442695, %v1897_v35  ;;  %v1802_v47 = vadd.f32 %v1801_v18, %v5452_v26  ;;  %v1735_v35 = vld [vmem:[#allocation4 + $0xd8] sm:$0xff] }
 0x3d3   :  { %v3442_v39 = vpop.eup %3441  ;;  %3443 = vpow2.f32 %v3234_v57 }
 0x3d4   :  { %v1904_v24 = vadd.f32 1.0, %v3442_v39  ;;  %v1790_v14 = vpop.f32.mrf.mxu3 }
 0x3d6   :  { %3445 = vrcp.f32 %v1904_v24  ;;  %v1814_v13 = vpop.f32.mrf.mxu1  ;;  %v1827_v51 = vpop.f32.mrf.mxu2  ;;  %vm1911_vm13 = vweird.f32 %v1904_v24 }
 0x3d7   :  { %v1815_v36 = vadd.f32 %v1814_v13, %v1802_v47  ;;  %v1828_v8 = vadd.f32 %v1827_v51, %v5453_v28  ;;  %v1917_v51 = vand.u32 2147483648, %v1904_v24 }
 0x3d8   :  { %v1803_v38 = vpop.f32.mrf.mxu0 }
 0x3d9   :  { %v3444_v58 = vpop.eup %3443  ;;  %v1936_v60 = vadd.f32 %v1815_v36, %v1734_v10 }
 0x3da   :  { %v1905_v29 = vadd.f32 1.0, %v3444_v58 }
 0x3db   :  { %v3235_v52 = vmul.f32 -1.442695, %v1936_v60 }
 0x3dc   :  { %v3446_v55 = vpop.eup %3445  ;;  %3447 = vrcp.f32 %v1905_v29  ;;  %v1840_v57 = vpop.f32.mrf.mxu3  ;;  %vm1926_vm1 = vweird.f32 %v1905_v29 }
 0x3dd   :  { %3449 = vpow2.f32 %v3235_v52  ;;  %v1841_v39 = vadd.f32 %v1840_v57, %v1828_v8  ;;  %v1907_v14 = vmul.f32 %v3446_v55, %v1904_v24  ;;  %vm1912_vm12 = vweird.f32 %v3446_v55  ;;  %v5454_v8 = vld [vmem:[#allocation101_spill] sm:$0xff] }
 0x3de   :  { %v1816_v18 = vpop.f32.mrf.mxu1  ;;  %v1829_v45 = vpop.f32.mrf.mxu2  ;;  %v1915_v52 = vand.u32 2147483647, %v1904_v24  ;;  %vm1913_vm14 = vmor %vm1911_vm13, %vm1912_vm12 }
 0x3df   :  { %v1937_v26 = vadd.f32 %v1841_v39, %v1735_v35  ;;  %v1908_v41 = vsub.f32 1.0, %v1907_v14  ;;  %v1918_v14 = vor.u32 1.1754944e-38, %v1917_v51 }
 0x3e0   :  { %v1853_v46 = vpop.f32.mrf.mxu0  ;;  %vm1916_vm15 = vcmp.eq.f32.partialorder %v1915_v52, 8.507059e+37 }
 0x3e1   :  { %v3236_v47 = vmul.f32 -1.442695, %v1937_v26  ;;  %v1909_v13 = vmul.f32 %v3446_v55, %v1908_v41  ;;  %v1854_v57 = vadd.f32 %v1853_v46, %v5454_v8  ;;  %v1930_v46 = vand.u32 2147483647, %v1905_v29  ;;  %v1736_v8 = vld [vmem:[#allocation4 + $0xe0] sm:$0xff] }
 0x3e2   :  { %v3448_v38 = vpop.eup %3447 }
 0x3e3   :  { %v3450_v10 = vpop.eup %3449  ;;  %3451 = vpow2.f32 %v3236_v47  ;;  %v1910_v36 = vadd.f32 %v3446_v55, %v1909_v13  ;;  %v1922_v58 = vmul.f32 %v3448_v38, %v1905_v29  ;;  %vm1927_vm0 = vweird.f32 %v3448_v38 }
 0x3e4   :  { %v1944_v60 = vadd.f32 1.0, %v3450_v10  ;;  %v1842_v28 = vpop.f32.mrf.mxu3  ;;  %vm1928_vm2 = vmor %vm1926_vm1, %vm1927_vm0  ;;  %vm1931_vm3 = vcmp.eq.f32.partialorder %v1930_v46, 8.507059e+37 }
 0x3e5   :  { %v1923_v18 = vsub.f32 1.0, %v1922_v58  ;;  %v1914_v39 = vsel %vm1913_vm14, %v3446_v55, %v1910_v36  ;;  %v1932_v28 = vand.u32 2147483648, %v1905_v29  ;;  %v5455_v58 = vld [vmem:[#allocation102_spill] sm:$0xff]  ;;  %v1737_v29 = vld [vmem:[#allocation4 + $0xe8] sm:$0xff] }
 0x3e6   :  { %3453 = vrcp.f32 %v1944_v60  ;;  %v1866_v35 = vpop.f32.mrf.mxu1  ;;  %v1879_v26 = vpop.f32.mrf.mxu2  ;;  %v1919_v34 = vsel %vm1916_vm15, %v1918_v14, %v1914_v39  ;;  %vm1951_vm5 = vweird.f32 %v1944_v60 }
 0x3e7   :  { %v1867_v41 = vadd.f32 %v1866_v35, %v1854_v57  ;;  %v1924_v45 = vmul.f32 %v3448_v38, %v1923_v18  ;;  %v1880_v30 = vadd.f32 %v1879_v26, %v5455_v58  ;;  %v1933_v18 = vor.u32 1.1754944e-38, %v1932_v28 }
 0x3e8   :  { %v1855_v47 = vpop.f32.mrf.mxu0  ;;  %v1955_v26 = vand.u32 2147483647, %v1944_v60 }
 0x3e9   :  { %v3452_v13 = vpop.eup %3451  ;;  %v1925_v10 = vadd.f32 %v3448_v38, %v1924_v45  ;;  %v1976_v24 = vmul.f32 %v1919_v34, %v1867_v41  ;;  %v1957_v41 = vand.u32 2147483648, %v1944_v60 }
 0x3ea   :  { %v1945_v49 = vadd.f32 1.0, %v3452_v13  ;;  %vm1956_vm7 = vcmp.eq.f32.partialorder %v1955_v26, 8.507059e+37  ;;  %v5457_v26 = vld [vmem:[#allocation96_spill] sm:$0xff] }
 0x3eb   :  { %v1929_v51 = vsel %vm1928_vm2, %v3448_v38, %v1925_v10  ;;  %v1978_v35 = vadd.f32 %v1976_v24, %v1736_v8  ;;  %v1958_v8 = vor.u32 1.1754944e-38, %v1957_v41 }
 0x3ec   :  { %v3454_v55 = vpop.eup %3453  ;;  %3455 = vrcp.f32 %v1945_v49  ;;  %v1892_v36 = vpop.f32.mrf.mxu3  ;;  %v1934_v47 = vsel %vm1931_vm3, %v1933_v18, %v1929_v51  ;;  %v1972_v46 = vand.u32 2147483648, %v1945_v49  ;;  %v1970_v51 = vand.u32 2147483647, %v1945_v49 }
 0x3ed   :  { %v1947_v57 = vmul.f32 %v3454_v55, %v1944_v60  ;;  %v1893_v52 = vadd.f32 %v1892_v36, %v1880_v30  ;;  %vm1952_vm4 = vweird.f32 %v3454_v55  ;;  %3457 = vtanh.f32 %v1978_v35  ;;  %v1996_v18 = vpop.permute.xlu2 %1995 }
 0x3ee   :  { %v1868_v39 = vpop.f32.mrf.mxu1  ;;  %v1881_v14 = vpop.f32.mrf.mxu2  ;;  %vm1953_vm6 = vmor %vm1951_vm5, %vm1952_vm4  ;;  %vm1966_vm9 = vweird.f32 %v1945_v49  ;;  %vm1997_vm11 = vcmp.eq.s32.totalorder %v1996_v18, 1  ;;  %vm1971_vm12 = vcmp.eq.f32.partialorder %v1970_v51, 8.507059e+37  ;;  %v5466_v51 = vld [vmem:[#allocation18_spill] sm:$0xff]  ;;  %v5469_v18 = vld [vmem:[#allocation27_spill] sm:$0xff] }
 0x3ef   :  { %v1948_v45 = vsub.f32 1.0, %v1947_v57  ;;  %v1977_v34 = vmul.f32 %v1934_v47, %v1893_v52  ;;  %v1973_v14 = vor.u32 1.1754944e-38, %v1972_v46  ;;  %v5464_v46 = vld [vmem:[#allocation21_spill] sm:$0xff] }
 0x3f1   :  { %v1949_v13 = vmul.f32 %v3454_v55, %v1948_v45  ;;  %v1979_v38 = vadd.f32 %v1977_v34, %v1737_v29 }
 0x3f2   :  { %v3456_v58 = vpop.eup %3455 }
 0x3f3   :  { %v1962_v6 = vmul.f32 %v3456_v58, %v1945_v49  ;;  %v1950_v32 = vadd.f32 %v3454_v55, %v1949_v13  ;;  %vm1967_vm8 = vweird.f32 %v3456_v58  ;;  %v3458_v52 = vpop.eup %3457  ;;  %3459 = vtanh.f32 %v1979_v38  ;;  %v5458_v38 = vld [vmem:[#allocation13_spill] sm:$0xff] }
 0x3f4   :  { %v1894_v30 = vpop.f32.mrf.mxu3  ;;  %vm1968_vm10 = vmor %vm1966_vm9, %vm1967_vm8 }
 0x3f5   :  { %v1963_v10 = vsub.f32 1.0, %v1962_v6  ;;  %v1954_v28 = vsel %vm1953_vm6, %v3454_v55, %v1950_v32  ;;  %v5459_v30 = vld [vmem:[#allocation14_spill] sm:$0xff] }
 0x3f6   :  { %v1959_v24 = vsel %vm1956_vm7, %v1958_v8, %v1954_v28  ;;  %v5460_v8 = vld [vmem:[#allocation17_spill] sm:$0xff]  ;;  %v5462_v28 = vld [vmem:[#allocation15_spill] sm:$0xff] }
 0x3f7   :  { %v1964_v36 = vmul.f32 %v3456_v58, %v1963_v10  ;;  %v1982_v57 = vsub.f32 1.0, %v1959_v24  ;;  %v1986_v60 = vmul.f32 %v1959_v24, %v4465_v63  ;;  %v5461_v10 = vld [vmem:[#allocation19_spill] sm:$0xff]  ;;  %v5463_v24 = vld [vmem:[#allocation16_spill] sm:$0xff] }
 0x3f9   :  { %v1965_v35 = vadd.f32 %v3456_v58, %v1964_v36  ;;  %v1984_v39 = vmul.f32 %v3458_v52, %v1982_v57  ;;  %v3460_v34 = vpop.eup %3459  ;;  %v5465_v36 = vld [vmem:[#allocation23_spill] sm:$0xff]  ;;  %v5467_v57 = vld [vmem:[#allocation20_spill] sm:$0xff]  ;;  %v5468_v52 = vld [vmem:[#allocation25_spill] sm:$0xff] }
 0x3fb   :  { %v1969_v6 = vsel %vm1968_vm10, %v3456_v58, %v1965_v35  ;;  %v1988_v32 = vadd.f32 %v1986_v60, %v1984_v39  ;;  %v5470_v35 = vld [vmem:[#allocation22_spill] sm:$0xff]  ;;  %v5471_v39 = vld [vmem:[#allocation24_spill] sm:$0xff]  ;;  %v5472_v60 = vld [vmem:[#allocation29_spill] sm:$0xff] }
 0x3fc   :  { %v1974_v55 = vsel %vm1971_vm12, %v1973_v14, %v1969_v6  ;;  %v5473_v14 = vld [vmem:[#allocation31_spill] sm:$0xff]  ;;  %v5474_v6 = vld [vmem:[#allocation26_spill] sm:$0xff] }
 0x3fd   :  { %v1983_v45 = vsub.f32 1.0, %v1974_v55  ;;  %v4585_v47 = vsel %vm1997_vm11, %v1988_v32, %v4465_v63  ;;  %v1987_v29 = vmul.f32 %v1974_v55, %v4473_v59  ;;  %v5475_v32 = vld [vmem:[#allocation28_spill] sm:$0xff]  ;;  %v5476_v55 = vld [vmem:[#allocation33_spill] sm:$0xff] }
 0x3fe   :  { %v2007_v41 = vpack.c.bf16 %v4585_v47, %v4585_v47 }
 0x3ff   :  { %v1985_v49 = vmul.f32 %v3460_v34, %v1983_v45  ;;  %v5477_v45 = vld [vmem:[#allocation35_spill] sm:$0xff]  ;;  %v5478_v34 = vld [vmem:[#allocation30_spill] sm:$0xff] }
 0x400   :  { %2017 = vmatmul.bf16.vlgmr.msrb.gmra.mxu0 %v2007_v41  ;;  %2043 = vmatmul.bf16.vlgmr.msrb.gmra.mxu2 %v2007_v41 }
 0x401   :  { %v1989_v13 = vadd.f32 %v1987_v29, %v1985_v49  ;;  %2113 = vmatpush.bf16.msrb.mxu0 %v5187_v40  ;;  %2139 = vmatpush.bf16.msrb.mxu2 %v5188_v15  ;;  %v5480_v49 = vld [vmem:[#allocation37_spill] sm:$0xff]  ;;  %v5481_v29 = vld [vmem:[#allocation39_spill] sm:$0xff] }
 0x403   :  { %v4594_v58 = vsel %vm1997_vm11, %v1989_v13, %v4473_v59  ;;  %v5456_v59 = vld [vmem:[#allocation95_spill] sm:$0xff]  ;;  %v5482_v13 = vld [vmem:[#allocation41_spill] sm:$0xff] }
 0x404   :  { %v2008_v63 = vpack.c.bf16 %v4594_v58, %v4594_v58 }
 0x405   :  { %2114 = vmatpush.bf16.msrb.mxu0 %v5189_v44  ;;  %2140 = vmatpush.bf16.msrb.mxu2 %v5190_v43 }
 0x406   :  { %2030 = vmatmul.bf16.vlgmr.msrb.gmra.mxu1 %v2008_v63  ;;  %2056 = vmatmul.bf16.vlgmr.msrb.gmra.mxu3 %v2008_v63 }
 0x407   :  { %2126 = vmatpush.bf16.msrb.mxu1 %v5191_v33  ;;  %2152 = vmatpush.bf16.msrb.mxu3 %v5192_v21 }
 0x409   :  { %2115 = vmatpush.bf16.msrb.mxu0 %v5193_v53  ;;  %2141 = vmatpush.bf16.msrb.mxu2 %v5194_v19 }
 0x40b   :  { %2127 = vmatpush.bf16.msrb.mxu1 %v5195_v56  ;;  %2153 = vmatpush.bf16.msrb.mxu3 %v5196_v7 }
 0x40d   :  { %2116 = vmatpush.bf16.msrb.mxu0 %v5197_v1  ;;  %2142 = vmatpush.bf16.msrb.mxu2 %v3910_v54 }
 0x40f   :  { %2128 = vmatpush.bf16.msrb.mxu1 %v5198_v23  ;;  %2154 = vmatpush.bf16.msrb.mxu3 %v5199_v61 }
 0x410   :  { %2069 = vmatmul.bf16.vlgmr.msra.gmra.mxu0 %v2007_v41  ;;  %2095 = vmatmul.bf16.vlgmr.msra.gmra.mxu2 %v2007_v41 }
 0x411   :  { %2117 = vmatpush.bf16.msrb.mxu0 %v5200_v0  ;;  %2143 = vmatpush.bf16.msrb.mxu2 %v3924_v48 }
 0x413   :  { %2129 = vmatpush.bf16.msrb.mxu1 %v5201_v2  ;;  %2155 = vmatpush.bf16.msrb.mxu3 %v5202_v25 }
 0x415   :  { %2118 = vmatpush.bf16.msrb.mxu0 %v5203_v37  ;;  %2144 = vmatpush.bf16.msrb.mxu2 %v3936_v3 }
 0x416   :  { %2082 = vmatmul.bf16.vlgmr.msra.gmra.mxu1 %v2008_v63  ;;  %2108 = vmatmul.bf16.vlgmr.msra.gmra.mxu3 %v2008_v63 }
 0x417   :  { %2130 = vmatpush.bf16.msrb.mxu1 %v5204_v50  ;;  %2156 = vmatpush.bf16.msrb.mxu3 %v5205_v12 }
 0x419   :  { %2119 = vmatpush.bf16.msrb.mxu0 %v3943_v42  ;;  %2145 = vmatpush.bf16.msrb.mxu2 %v3950_v5 }
 0x41b   :  { %2131 = vmatpush.bf16.msrb.mxu1 %v5206_v62  ;;  %2157 = vmatpush.bf16.msrb.mxu3 %v3940_v20 }
 0x41d   :  { %2120 = vmatpush.bf16.msrb.mxu0 %v3956_v31  ;;  %2146 = vmatpush.bf16.msrb.mxu2 %v3962_v27 }
 0x41f   :  { %2132 = vmatpush.bf16.msrb.mxu1 %v3948_v16  ;;  %2158 = vmatpush.bf16.msrb.mxu3 %v3953_v11 }
 0x420   :  { %2121 = vmatmul.bf16.vlgmr.msrb.gmra.mxu0 %v2007_v41  ;;  %2147 = vmatmul.bf16.vlgmr.msrb.gmra.mxu2 %v2007_v41  ;;  %v5479_v41 = vld [vmem:[#allocation32_spill] sm:$0xff] }
 0x421   :  { %2278 = vmatpush.bf16.msra.mxu0 %v3649_v4  ;;  %2304 = vmatpush.bf16.msra.mxu2 %v3653_v9 }
 0x423   :  { %2133 = vmatpush.bf16.msrb.mxu1 %v5456_v59  ;;  %2159 = vmatpush.bf16.msrb.mxu3 %v5457_v26 }
 0x425   :  { %2279 = vmatpush.bf16.msra.mxu0 %v3660_v17  ;;  %2305 = vmatpush.bf16.msra.mxu2 %v3665_v22 }
 0x426   :  { %2134 = vmatmul.bf16.vlgmr.msrb.gmra.mxu1 %v2008_v63  ;;  %2160 = vmatmul.bf16.vlgmr.msrb.gmra.mxu3 %v2008_v63  ;;  %v5483_v63 = vld [vmem:[#allocation45_spill] sm:$0xff] }
 0x427   :  { %2291 = vmatpush.bf16.msra.mxu1 %v5458_v38  ;;  %2317 = vmatpush.bf16.msra.mxu3 %v5459_v30 }
 0x429   :  { %2280 = vmatpush.bf16.msra.mxu0 %v5460_v8  ;;  %2306 = vmatpush.bf16.msra.mxu2 %v5461_v10 }
 0x42b   :  { %2292 = vmatpush.bf16.msra.mxu1 %v5462_v28  ;;  %2318 = vmatpush.bf16.msra.mxu3 %v5463_v24  ;;  %v5520_v28 = vld [vmem:[#allocation99_spill] sm:$0xff] }
 0x42d   :  { %2281 = vmatpush.bf16.msra.mxu0 %v5464_v46  ;;  %2307 = vmatpush.bf16.msra.mxu2 %v5465_v36 }
 0x42f   :  { %2293 = vmatpush.bf16.msra.mxu1 %v5466_v51  ;;  %2319 = vmatpush.bf16.msra.mxu3 %v5467_v57  ;;  %v2002_v57 = vld [vmem:[#allocation4 + $0xf8] sm:$0xff] }
 0x431   :  { %2282 = vmatpush.bf16.msra.mxu0 %v5468_v52  ;;  %2308 = vmatpush.bf16.msra.mxu2 %v5469_v18  ;;  %v5519_v52 = vld [vmem:[#allocation98_spill] sm:$0xff] }
 0x433   :  { %2294 = vmatpush.bf16.msra.mxu1 %v5470_v35  ;;  %2320 = vmatpush.bf16.msra.mxu3 %v5471_v39 }
 0x435   :  { %2283 = vmatpush.bf16.msra.mxu0 %v5472_v60  ;;  %2309 = vmatpush.bf16.msra.mxu2 %v5473_v14  ;;  %v5484_v14 = vld [vmem:[#allocation34_spill] sm:$0xff] }
 0x437   :  { %2295 = vmatpush.bf16.msra.mxu1 %v5474_v6  ;;  %2321 = vmatpush.bf16.msra.mxu3 %v5475_v32  ;;  %v5485_v6 = vld [vmem:[#allocation36_spill] sm:$0xff]  ;;  %v5486_v32 = vld [vmem:[#allocation47_spill] sm:$0xff] }
 0x439   :  { %2284 = vmatpush.bf16.msra.mxu0 %v5476_v55  ;;  %2310 = vmatpush.bf16.msra.mxu2 %v5477_v45  ;;  %v5487_v55 = vld [vmem:[#allocation49_spill] sm:$0xff]  ;;  %v5488_v45 = vld [vmem:[#allocation38_spill] sm:$0xff] }
 0x43b   :  { %2296 = vmatpush.bf16.msra.mxu1 %v5478_v34  ;;  %2322 = vmatpush.bf16.msra.mxu3 %v5479_v41  ;;  %v5489_v34 = vld [vmem:[#allocation40_spill] sm:$0xff] }
 0x43c   :  { %v5490_v41 = vld [vmem:[#allocation44_spill] sm:$0xff] }
 0x43d   :  { %2285 = vmatpush.bf16.msra.mxu0 %v5480_v49  ;;  %2311 = vmatpush.bf16.msra.mxu2 %v5481_v29  ;;  %v5491_v49 = vld [vmem:[#allocation46_spill] sm:$0xff]  ;;  %v5492_v29 = vld [vmem:[#allocation51_spill] sm:$0xff] }
 0x43f   :  { %2297 = vmatpush.bf16.msra.mxu1 %v5484_v14  ;;  %2323 = vmatpush.bf16.msra.mxu3 %v5485_v6  ;;  %v5495_v14 = vld [vmem:[#allocation50_spill] sm:$0xff]  ;;  %v5496_v6 = vld [vmem:[#allocation55_spill] sm:$0xff] }
 0x441   :  { %2330 = vmatpush.bf16.msrb.mxu0 %v5482_v13  ;;  %2356 = vmatpush.bf16.msrb.mxu2 %v5483_v63  ;;  %v5493_v13 = vld [vmem:[#allocation53_spill] sm:$0xff]  ;;  %v5494_v63 = vld [vmem:[#allocation48_spill] sm:$0xff] }
 0x443   :  { %2298 = vmatpush.bf16.msra.mxu1 %v5488_v45  ;;  %2324 = vmatpush.bf16.msra.mxu3 %v5489_v34  ;;  %v5499_v45 = vld [vmem:[#allocation54_spill] sm:$0xff]  ;;  %v5500_v34 = vld [vmem:[#allocation59_spill] sm:$0xff] }
 0x445   :  { %2331 = vmatpush.bf16.msrb.mxu0 %v5486_v32  ;;  %2357 = vmatpush.bf16.msrb.mxu2 %v5487_v55  ;;  %v5497_v32 = vld [vmem:[#allocation57_spill] sm:$0xff]  ;;  %v5498_v55 = vld [vmem:[#allocation52_spill] sm:$0xff] }
 0x447   :  { %2343 = vmatpush.bf16.msrb.mxu1 %v5490_v41  ;;  %2369 = vmatpush.bf16.msrb.mxu3 %v5491_v49  ;;  %v5501_v41 = vld [vmem:[#allocation61_spill] sm:$0xff]  ;;  %v5502_v49 = vld [vmem:[#allocation56_spill] sm:$0xff] }
 0x449   :  { %2332 = vmatpush.bf16.msrb.mxu0 %v5492_v29  ;;  %2358 = vmatpush.bf16.msrb.mxu2 %v5493_v13  ;;  %v5503_v29 = vld [vmem:[#allocation58_spill] sm:$0xff]  ;;  %v5504_v13 = vld [vmem:[#allocation63_spill] sm:$0xff] }
 0x44b   :  { %2344 = vmatpush.bf16.msrb.mxu1 %v5494_v63  ;;  %2370 = vmatpush.bf16.msrb.mxu3 %v5495_v14  ;;  %v5505_v63 = vld [vmem:[#allocation65_spill] sm:$0xff]  ;;  %v5506_v14 = vld [vmem:[#allocation60_spill] sm:$0xff] }
 0x44d   :  { %2333 = vmatpush.bf16.msrb.mxu0 %v5496_v6  ;;  %2359 = vmatpush.bf16.msrb.mxu2 %v5497_v32  ;;  %v5507_v6 = vld [vmem:[#allocation62_spill] sm:$0xff]  ;;  %v5508_v32 = vld [vmem:[#allocation67_spill] sm:$0xff] }
 0x44f   :  { %2345 = vmatpush.bf16.msrb.mxu1 %v5498_v55  ;;  %2371 = vmatpush.bf16.msrb.mxu3 %v5499_v45  ;;  %v5509_v55 = vld [vmem:[#allocation69_spill] sm:$0xff]  ;;  %v5510_v45 = vld [vmem:[#allocation64_spill] sm:$0xff] }
 0x451   :  { %2334 = vmatpush.bf16.msrb.mxu0 %v5500_v34  ;;  %2360 = vmatpush.bf16.msrb.mxu2 %v5501_v41  ;;  %v5511_v34 = vld [vmem:[#allocation66_spill] sm:$0xff]  ;;  %v5512_v41 = vld [vmem:[#allocation71_spill] sm:$0xff] }
 0x453   :  { %2346 = vmatpush.bf16.msrb.mxu1 %v5502_v49  ;;  %2372 = vmatpush.bf16.msrb.mxu3 %v5503_v29  ;;  %v5513_v49 = vld [vmem:[#allocation73_spill] sm:$0xff]  ;;  %v5514_v29 = vld [vmem:[#allocation68_spill] sm:$0xff] }
 0x455   :  { %2335 = vmatpush.bf16.msrb.mxu0 %v5504_v13  ;;  %2361 = vmatpush.bf16.msrb.mxu2 %v5505_v63  ;;  %v5515_v13 = vld [vmem:[#allocation70_spill] sm:$0xff]  ;;  %v5516_v63 = vld [vmem:[#allocation72_spill] sm:$0xff] }
 0x457   :  { %2347 = vmatpush.bf16.msrb.mxu1 %v5506_v14  ;;  %2373 = vmatpush.bf16.msrb.mxu3 %v5507_v6  ;;  %v5517_v14 = vld [vmem:[#allocation74_spill] sm:$0xff] }
 0x459   :  { %2336 = vmatpush.bf16.msrb.mxu0 %v5508_v32  ;;  %2362 = vmatpush.bf16.msrb.mxu2 %v5509_v55  ;;  %v5518_v32 = vld [vmem:[#allocation97_spill] sm:$0xff] }
 0x45a   :  { %v2001_v55 = vld [vmem:[#allocation4 + $0xf0] sm:$0xff] }
 0x45b   :  { %2348 = vmatpush.bf16.msrb.mxu1 %v5510_v45  ;;  %2374 = vmatpush.bf16.msrb.mxu3 %v5511_v34 }
 0x45d   :  { %2337 = vmatpush.bf16.msrb.mxu0 %v5512_v41  ;;  %2363 = vmatpush.bf16.msrb.mxu2 %v5513_v49 }
 0x45f   :  { %2349 = vmatpush.bf16.msrb.mxu1 %v5514_v29  ;;  %2375 = vmatpush.bf16.msrb.mxu3 %v5515_v13 }
 0x463   :  { %2350 = vmatpush.bf16.msrb.mxu1 %v5516_v63  ;;  %2376 = vmatpush.bf16.msrb.mxu3 %v5517_v14 }
 0x47d   :  { %v2018_v6 = vpop.f32.mrf.mxu0 }
 0x47e   :  { %v2019_v60 = vadd.f32 %v2018_v6, %v5518_v32 }
 0x483   :  { %v2031_v39 = vpop.f32.mrf.mxu1  ;;  %v2044_v45 = vpop.f32.mrf.mxu2 }
 0x484   :  { %v2032_v35 = vadd.f32 %v2031_v39, %v2019_v60  ;;  %v2045_v49 = vadd.f32 %v2044_v45, %v5519_v52 }
 0x485   :  { %v2020_v34 = vpop.f32.mrf.mxu0 }
 0x486   :  { %v2165_v18 = vadd.f32 %v2032_v35, %v2001_v55  ;;  %v2003_v35 = vld [vmem:[#allocation4 + $0x100] sm:$0xff] }
 0x488   :  { %v3238_v41 = vmul.f32 -1.442695, %v2165_v18 }
 0x489   :  { %v2057_v29 = vpop.f32.mrf.mxu3 }
 0x48a   :  { %3461 = vpow2.f32 %v3238_v41  ;;  %v2058_v13 = vadd.f32 %v2057_v29, %v2045_v49  ;;  %v5521_v29 = vld [vmem:[#allocation100_spill] sm:$0xff] }
 0x48b   :  { %v2033_v51 = vpop.f32.mrf.mxu1  ;;  %v2046_v63 = vpop.f32.mrf.mxu2 }
 0x48c   :  { %v2166_v36 = vadd.f32 %v2058_v13, %v2002_v57 }
 0x48d   :  { %v2070_v14 = vpop.f32.mrf.mxu0 }
 0x48e   :  { %v3239_v46 = vmul.f32 -1.442695, %v2166_v36  ;;  %v2071_v39 = vadd.f32 %v2070_v14, %v5520_v28  ;;  %v2004_v36 = vld [vmem:[#allocation4 + $0x108] sm:$0xff] }
 0x490   :  { %v3462_v24 = vpop.eup %3461  ;;  %3463 = vpow2.f32 %v3239_v46 }
 0x491   :  { %v2173_v6 = vadd.f32 1.0, %v3462_v24  ;;  %v2059_v32 = vpop.f32.mrf.mxu3 }
 0x493   :  { %3465 = vrcp.f32 %v2173_v6  ;;  %v2083_v18 = vpop.f32.mrf.mxu1  ;;  %v2096_v60 = vpop.f32.mrf.mxu2  ;;  %vm2180_vm14 = vweird.f32 %v2173_v6 }
 0x494   :  { %v2084_v55 = vadd.f32 %v2083_v18, %v2071_v39  ;;  %v2097_v57 = vadd.f32 %v2096_v60, %v5521_v29  ;;  %v2186_v60 = vand.u32 2147483648, %v2173_v6 }
 0x495   :  { %v2072_v45 = vpop.f32.mrf.mxu0 }
 0x496   :  { %v3464_v34 = vpop.eup %3463  ;;  %v2205_v41 = vadd.f32 %v2084_v55, %v2003_v35 }
 0x497   :  { %v2174_v49 = vadd.f32 1.0, %v3464_v34 }
 0x498   :  { %v3240_v51 = vmul.f32 -1.442695, %v2205_v41 }
 0x499   :  { %v3466_v13 = vpop.eup %3465  ;;  %3467 = vrcp.f32 %v2174_v49  ;;  %v2109_v46 = vpop.f32.mrf.mxu3  ;;  %vm2195_vm2 = vweird.f32 %v2174_v49 }
 0x49a   :  { %3469 = vpow2.f32 %v3240_v51  ;;  %v2110_v24 = vadd.f32 %v2109_v46, %v2097_v57  ;;  %v2176_v32 = vmul.f32 %v3466_v13, %v2173_v6  ;;  %vm2181_vm13 = vweird.f32 %v3466_v13  ;;  %v5522_v57 = vld [vmem:[#allocation101_spill] sm:$0xff] }
 0x49b   :  { %v2085_v14 = vpop.f32.mrf.mxu1  ;;  %v2098_v63 = vpop.f32.mrf.mxu2  ;;  %v2184_v51 = vand.u32 2147483647, %v2173_v6  ;;  %vm2182_vm15 = vmor %vm2180_vm14, %vm2181_vm13 }
 0x49c   :  { %v2206_v28 = vadd.f32 %v2110_v24, %v2004_v36  ;;  %v2177_v52 = vsub.f32 1.0, %v2176_v32  ;;  %v2187_v32 = vor.u32 1.1754944e-38, %v2186_v60 }
 0x49d   :  { %v2122_v10 = vpop.f32.mrf.mxu0  ;;  %vm2185_vm0 = vcmp.eq.f32.partialorder %v2184_v51, 8.507059e+37 }
 0x49e   :  { %v3241_v39 = vmul.f32 -1.442695, %v2206_v28  ;;  %v2178_v18 = vmul.f32 %v3466_v13, %v2177_v52  ;;  %v2123_v46 = vadd.f32 %v2122_v10, %v5522_v57  ;;  %v2199_v10 = vand.u32 2147483647, %v2174_v49  ;;  %v2005_v57 = vld [vmem:[#allocation4 + $0x110] sm:$0xff] }
 0x49f   :  { %v3468_v45 = vpop.eup %3467 }
 0x4a0   :  { %v3470_v35 = vpop.eup %3469  ;;  %3471 = vpow2.f32 %v3241_v39  ;;  %v2179_v55 = vadd.f32 %v3466_v13, %v2178_v18  ;;  %v2191_v34 = vmul.f32 %v3468_v45, %v2174_v49  ;;  %vm2196_vm1 = vweird.f32 %v3468_v45 }
 0x4a1   :  { %v2213_v41 = vadd.f32 1.0, %v3470_v35  ;;  %v2111_v29 = vpop.f32.mrf.mxu3  ;;  %vm2197_vm3 = vmor %vm2195_vm2, %vm2196_vm1  ;;  %vm2200_vm4 = vcmp.eq.f32.partialorder %v2199_v10, 8.507059e+37 }
 0x4a2   :  { %v2192_v14 = vsub.f32 1.0, %v2191_v34  ;;  %v2183_v24 = vsel %vm2182_vm15, %v3466_v13, %v2179_v55  ;;  %v2201_v29 = vand.u32 2147483648, %v2174_v49  ;;  %v5523_v34 = vld [vmem:[#allocation102_spill] sm:$0xff] }
 0x4a3   :  { %3473 = vrcp.f32 %v2213_v41  ;;  %v2135_v36 = vpop.f32.mrf.mxu1  ;;  %v2148_v28 = vpop.f32.mrf.mxu2  ;;  %v2188_v8 = vsel %vm2185_vm0, %v2187_v32, %v2183_v24  ;;  %vm2220_vm6 = vweird.f32 %v2213_v41 }
 0x4a4   :  { %v2136_v52 = vadd.f32 %v2135_v36, %v2123_v46  ;;  %v2193_v63 = vmul.f32 %v3468_v45, %v2192_v14  ;;  %v2149_v38 = vadd.f32 %v2148_v28, %v5523_v34  ;;  %v2202_v14 = vor.u32 1.1754944e-38, %v2201_v29  ;;  %v2006_v28 = vld [vmem:[#allocation4 + $0x118] sm:$0xff] }
 0x4a5   :  { %v2124_v39 = vpop.f32.mrf.mxu0 }
 0x4a6   :  { %v3472_v18 = vpop.eup %3471  ;;  %v2194_v35 = vadd.f32 %v3468_v45, %v2193_v63  ;;  %v2245_v6 = vmul.f32 %v2188_v8, %v2136_v52  ;;  %v2226_v8 = vand.u32 2147483648, %v2213_v41 }
 0x4a7   :  { %v2214_v30 = vadd.f32 1.0, %v3472_v18  ;;  %v2224_v18 = vand.u32 2147483647, %v2213_v41 }
 0x4a8   :  { %v2198_v60 = vsel %vm2197_vm3, %v3468_v45, %v2194_v35  ;;  %v2247_v36 = vadd.f32 %v2245_v6, %v2005_v57 }
 0x4a9   :  { %v3474_v13 = vpop.eup %3473  ;;  %3475 = vrcp.f32 %v2214_v30  ;;  %v2161_v55 = vpop.f32.mrf.mxu3  ;;  %v2203_v39 = vsel %vm2200_vm4, %v2202_v14, %v2198_v60  ;;  %vm2225_vm8 = vcmp.eq.f32.partialorder %v2224_v18, 8.507059e+37  ;;  %v2241_v10 = vand.u32 2147483648, %v2214_v30 }
 0x4aa   :  { %v2216_v46 = vmul.f32 %v3474_v13, %v2213_v41  ;;  %v2162_v51 = vadd.f32 %v2161_v55, %v2149_v38  ;;  %vm2221_vm5 = vweird.f32 %v3474_v13  ;;  %3477 = vtanh.f32 %v2247_v36 }
 0x4ab   :  { %v2137_v24 = vpop.f32.mrf.mxu1  ;;  %v2150_v32 = vpop.f32.mrf.mxu2  ;;  %vm2222_vm7 = vmor %vm2220_vm6, %vm2221_vm5  ;;  %v2227_v38 = vor.u32 1.1754944e-38, %v2226_v8  ;;  %vm2235_vm10 = vweird.f32 %v2214_v30 }
 0x4ac   :  { %v2217_v63 = vsub.f32 1.0, %v2216_v46  ;;  %v2246_v52 = vmul.f32 %v2203_v39, %v2162_v51  ;;  %v2239_v51 = vand.u32 2147483647, %v2214_v30  ;;  %v2265_v24 = vpop.permute.xlu2 %2264 }
 0x4ad   :  { %vm2266_vm13 = vcmp.eq.s32.totalorder %v2265_v24, 1  ;;  %v5540_v24 = vld [vmem:[#allocation31_spill] sm:$0xff] }
 0x4ae   :  { %v2218_v49 = vmul.f32 %v3474_v13, %v2217_v63  ;;  %v2248_v35 = vadd.f32 %v2246_v52, %v2006_v28  ;;  %v2242_v63 = vor.u32 1.1754944e-38, %v2241_v10  ;;  %vm2240_vm12 = vcmp.eq.f32.partialorder %v2239_v51, 8.507059e+37  ;;  %v5534_v10 = vld [vmem:[#allocation20_spill] sm:$0xff] }
 0x4af   :  { %v3476_v34 = vpop.eup %3475  ;;  %v5538_v51 = vld [vmem:[#allocation24_spill] sm:$0xff] }
 0x4b0   :  { %v2231_v26 = vmul.f32 %v3476_v34, %v2214_v30  ;;  %v2219_v45 = vadd.f32 %v3474_v13, %v2218_v49  ;;  %vm2236_vm9 = vweird.f32 %v3476_v34  ;;  %v3478_v14 = vpop.eup %3477  ;;  %3479 = vtanh.f32 %v2248_v35  ;;  %v5526_v35 = vld [vmem:[#allocation14_spill] sm:$0xff] }
 0x4b1   :  { %v2163_v57 = vpop.f32.mrf.mxu3  ;;  %vm2237_vm11 = vmor %vm2235_vm10, %vm2236_vm9 }
 0x4b2   :  { %v2232_v29 = vsub.f32 1.0, %v2231_v26  ;;  %v2223_v6 = vsel %vm2222_vm7, %v3474_v13, %v2219_v45  ;;  %v5529_v57 = vld [vmem:[#allocation15_spill] sm:$0xff] }
 0x4b3   :  { %v2228_v55 = vsel %vm2225_vm8, %v2227_v38, %v2223_v6  ;;  %v5525_v38 = vld [vmem:[#allocation13_spill] sm:$0xff]  ;;  %v5533_v6 = vld [vmem:[#allocation18_spill] sm:$0xff] }
 0x4b4   :  { %v2233_v60 = vmul.f32 %v3476_v34, %v2232_v29  ;;  %v2251_v46 = vsub.f32 1.0, %v2228_v55  ;;  %v2255_v36 = vmul.f32 %v2228_v55, %v4585_v47  ;;  %v5530_v29 = vld [vmem:[#allocation16_spill] sm:$0xff]  ;;  %v5535_v55 = vld [vmem:[#allocation25_spill] sm:$0xff] }
 0x4b6   :  { %v2253_v41 = vmul.f32 %v3478_v14, %v2251_v46  ;;  %v2234_v32 = vadd.f32 %v3476_v34, %v2233_v60  ;;  %v3480_v49 = vpop.eup %3479  ;;  %v5536_v60 = vld [vmem:[#allocation27_spill] sm:$0xff]  ;;  %v5537_v46 = vld [vmem:[#allocation22_spill] sm:$0xff]  ;;  %v5539_v14 = vld [vmem:[#allocation29_spill] sm:$0xff] }
 0x4b8   :  { %v2257_v39 = vadd.f32 %v2255_v36, %v2253_v41  ;;  %v2238_v26 = vsel %vm2237_vm11, %v3476_v34, %v2234_v32  ;;  %v5541_v41 = vld [vmem:[#allocation26_spill] sm:$0xff]  ;;  %v5542_v36 = vld [vmem:[#allocation28_spill] sm:$0xff]  ;;  %v5543_v32 = vld [vmem:[#allocation33_spill] sm:$0xff] }
 0x4b9   :  { %v2243_v13 = vsel %vm2240_vm12, %v2242_v63, %v2238_v26  ;;  %v5544_v63 = vld [vmem:[#allocation35_spill] sm:$0xff]  ;;  %v5546_v26 = vld [vmem:[#allocation32_spill] sm:$0xff] }
 0x4ba   :  { %v4700_v8 = vsel %vm2266_vm13, %v2257_v39, %v4585_v47  ;;  %v2252_v52 = vsub.f32 1.0, %v2243_v13  ;;  %v2256_v28 = vmul.f32 %v2243_v13, %v4594_v58  ;;  %v5545_v39 = vld [vmem:[#allocation30_spill] sm:$0xff]  ;;  %v5547_v13 = vld [vmem:[#allocation37_spill] sm:$0xff] }
 0x4bb   :  { %v2276_v18 = vpack.c.bf16 %v4700_v8, %v4700_v8 }
 0x4bc   :  { %v2254_v30 = vmul.f32 %v3480_v49, %v2252_v52  ;;  %v5548_v52 = vld [vmem:[#allocation39_spill] sm:$0xff]  ;;  %v5549_v49 = vld [vmem:[#allocation41_spill] sm:$0xff] }
 0x4bd   :  { %2286 = vmatmul.bf16.vlgmr.msra.gmra.mxu0 %v2276_v18  ;;  %2312 = vmatmul.bf16.vlgmr.msra.gmra.mxu2 %v2276_v18 }
 0x4be   :  { %v2258_v45 = vadd.f32 %v2256_v28, %v2254_v30  ;;  %2382 = vmatpush.bf16.msra.mxu0 %v5187_v40  ;;  %2408 = vmatpush.bf16.msra.mxu2 %v5188_v15  ;;  %v5551_v30 = vld [vmem:[#allocation34_spill] sm:$0xff]  ;;  %v5552_v28 = vld [vmem:[#allocation36_spill] sm:$0xff] }
 0x4c0   :  { %v4708_v34 = vsel %vm2266_vm13, %v2258_v45, %v4594_v58  ;;  %v5524_v58 = vld [vmem:[#allocation96_spill] sm:$0xff]  ;;  %v5553_v45 = vld [vmem:[#allocation47_spill] sm:$0xff] }
 0x4c1   :  { %v2277_v47 = vpack.c.bf16 %v4708_v34, %v4708_v34 }
 0x4c2   :  { %2383 = vmatpush.bf16.msra.mxu0 %v5189_v44  ;;  %2409 = vmatpush.bf16.msra.mxu2 %v5190_v43 }
 0x4c3   :  { %2299 = vmatmul.bf16.vlgmr.msra.gmra.mxu1 %v2277_v47  ;;  %2325 = vmatmul.bf16.vlgmr.msra.gmra.mxu3 %v2277_v47 }
 0x4c4   :  { %2395 = vmatpush.bf16.msra.mxu1 %v5191_v33  ;;  %2421 = vmatpush.bf16.msra.mxu3 %v5192_v21 }
 0x4c6   :  { %2384 = vmatpush.bf16.msra.mxu0 %v5193_v53  ;;  %2410 = vmatpush.bf16.msra.mxu2 %v5194_v19 }
 0x4c8   :  { %2396 = vmatpush.bf16.msra.mxu1 %v5195_v56  ;;  %2422 = vmatpush.bf16.msra.mxu3 %v5196_v7 }
 0x4ca   :  { %2385 = vmatpush.bf16.msra.mxu0 %v5197_v1  ;;  %2411 = vmatpush.bf16.msra.mxu2 %v3910_v54 }
 0x4cc   :  { %2397 = vmatpush.bf16.msra.mxu1 %v5198_v23  ;;  %2423 = vmatpush.bf16.msra.mxu3 %v5199_v61 }
 0x4cd   :  { %2338 = vmatmul.bf16.vlgmr.msrb.gmra.mxu0 %v2276_v18  ;;  %2364 = vmatmul.bf16.vlgmr.msrb.gmra.mxu2 %v2276_v18 }
 0x4ce   :  { %2386 = vmatpush.bf16.msra.mxu0 %v5200_v0  ;;  %2412 = vmatpush.bf16.msra.mxu2 %v3924_v48 }
 0x4d0   :  { %2398 = vmatpush.bf16.msra.mxu1 %v5201_v2  ;;  %2424 = vmatpush.bf16.msra.mxu3 %v5202_v25 }
 0x4d2   :  { %2387 = vmatpush.bf16.msra.mxu0 %v5203_v37  ;;  %2413 = vmatpush.bf16.msra.mxu2 %v3936_v3 }
 0x4d3   :  { %2351 = vmatmul.bf16.vlgmr.msrb.gmra.mxu1 %v2277_v47  ;;  %2377 = vmatmul.bf16.vlgmr.msrb.gmra.mxu3 %v2277_v47 }
 0x4d4   :  { %2399 = vmatpush.bf16.msra.mxu1 %v5204_v50  ;;  %2425 = vmatpush.bf16.msra.mxu3 %v5205_v12 }
 0x4d6   :  { %2388 = vmatpush.bf16.msra.mxu0 %v3943_v42  ;;  %2414 = vmatpush.bf16.msra.mxu2 %v3950_v5 }
 0x4d8   :  { %2400 = vmatpush.bf16.msra.mxu1 %v5206_v62  ;;  %2426 = vmatpush.bf16.msra.mxu3 %v3940_v20 }
 0x4da   :  { %2389 = vmatpush.bf16.msra.mxu0 %v3956_v31  ;;  %2415 = vmatpush.bf16.msra.mxu2 %v3962_v27 }
 0x4dc   :  { %2401 = vmatpush.bf16.msra.mxu1 %v3948_v16  ;;  %2427 = vmatpush.bf16.msra.mxu3 %v3953_v11 }
 0x4dd   :  { %2390 = vmatmul.bf16.vlgmr.msra.gmra.mxu0 %v2276_v18  ;;  %2416 = vmatmul.bf16.vlgmr.msra.gmra.mxu2 %v2276_v18  ;;  %v5550_v18 = vld [vmem:[#allocation45_spill] sm:$0xff] }
 0x4de   :  { %2547 = vmatpush.bf16.msrb.mxu0 %v3649_v4  ;;  %2573 = vmatpush.bf16.msrb.mxu2 %v3653_v9  ;;  %v5527_v4 = vld [vmem:[#allocation17_spill] sm:$0xff]  ;;  %v5528_v9 = vld [vmem:[#allocation19_spill] sm:$0xff] }
 0x4e0   :  { %2402 = vmatpush.bf16.msra.mxu1 %v5456_v59  ;;  %2428 = vmatpush.bf16.msra.mxu3 %v5524_v58 }
 0x4e2   :  { %2548 = vmatpush.bf16.msrb.mxu0 %v3660_v17  ;;  %2574 = vmatpush.bf16.msrb.mxu2 %v3665_v22  ;;  %v5531_v17 = vld [vmem:[#allocation21_spill] sm:$0xff]  ;;  %v5532_v22 = vld [vmem:[#allocation23_spill] sm:$0xff] }
 0x4e3   :  { %2403 = vmatmul.bf16.vlgmr.msra.gmra.mxu1 %v2277_v47  ;;  %2429 = vmatmul.bf16.vlgmr.msra.gmra.mxu3 %v2277_v47  ;;  %v5554_v47 = vld [vmem:[#allocation49_spill] sm:$0xff] }
 0x4e4   :  { %2560 = vmatpush.bf16.msrb.mxu1 %v5525_v38  ;;  %2586 = vmatpush.bf16.msrb.mxu3 %v5526_v35  ;;  %v5555_v38 = vld [vmem:[#allocation38_spill] sm:$0xff]  ;;  %v5556_v35 = vld [vmem:[#allocation40_spill] sm:$0xff] }
 0x4e6   :  { %2549 = vmatpush.bf16.msrb.mxu0 %v5527_v4  ;;  %2575 = vmatpush.bf16.msrb.mxu2 %v5528_v9  ;;  %v5557_v4 = vld [vmem:[#allocation44_spill] sm:$0xff]  ;;  %v5558_v9 = vld [vmem:[#allocation46_spill] sm:$0xff] }
 0x4e8   :  { %2561 = vmatpush.bf16.msrb.mxu1 %v5529_v57  ;;  %2587 = vmatpush.bf16.msrb.mxu3 %v5530_v29  ;;  %v5559_v57 = vld [vmem:[#allocation51_spill] sm:$0xff]  ;;  %v5560_v29 = vld [vmem:[#allocation53_spill] sm:$0xff] }
 0x4ea   :  { %2550 = vmatpush.bf16.msrb.mxu0 %v5531_v17  ;;  %2576 = vmatpush.bf16.msrb.mxu2 %v5532_v22  ;;  %v5561_v17 = vld [vmem:[#allocation48_spill] sm:$0xff]  ;;  %v5562_v22 = vld [vmem:[#allocation50_spill] sm:$0xff] }
 0x4ec   :  { %2562 = vmatpush.bf16.msrb.mxu1 %v5533_v6  ;;  %2588 = vmatpush.bf16.msrb.mxu3 %v5534_v10  ;;  %v5563_v6 = vld [vmem:[#allocation55_spill] sm:$0xff]  ;;  %v5564_v10 = vld [vmem:[#allocation57_spill] sm:$0xff] }
 0x4ee   :  { %2551 = vmatpush.bf16.msrb.mxu0 %v5535_v55  ;;  %2577 = vmatpush.bf16.msrb.mxu2 %v5536_v60  ;;  %v5565_v55 = vld [vmem:[#allocation52_spill] sm:$0xff]  ;;  %v5566_v60 = vld [vmem:[#allocation54_spill] sm:$0xff] }
 0x4f0   :  { %2563 = vmatpush.bf16.msrb.mxu1 %v5537_v46  ;;  %2589 = vmatpush.bf16.msrb.mxu3 %v5538_v51  ;;  %v5567_v46 = vld [vmem:[#allocation59_spill] sm:$0xff]  ;;  %v5568_v51 = vld [vmem:[#allocation61_spill] sm:$0xff] }
 0x4f2   :  { %2552 = vmatpush.bf16.msrb.mxu0 %v5539_v14  ;;  %2578 = vmatpush.bf16.msrb.mxu2 %v5540_v24  ;;  %v5569_v14 = vld [vmem:[#allocation56_spill] sm:$0xff]  ;;  %v5570_v24 = vld [vmem:[#allocation58_spill] sm:$0xff] }
 0x4f4   :  { %2564 = vmatpush.bf16.msrb.mxu1 %v5541_v41  ;;  %2590 = vmatpush.bf16.msrb.mxu3 %v5542_v36  ;;  %v5571_v41 = vld [vmem:[#allocation63_spill] sm:$0xff]  ;;  %v5572_v36 = vld [vmem:[#allocation65_spill] sm:$0xff] }
 0x4f6   :  { %2553 = vmatpush.bf16.msrb.mxu0 %v5543_v32  ;;  %2579 = vmatpush.bf16.msrb.mxu2 %v5544_v63  ;;  %v5573_v32 = vld [vmem:[#allocation60_spill] sm:$0xff]  ;;  %v5574_v63 = vld [vmem:[#allocation62_spill] sm:$0xff] }
 0x4f8   :  { %2565 = vmatpush.bf16.msrb.mxu1 %v5545_v39  ;;  %2591 = vmatpush.bf16.msrb.mxu3 %v5546_v26  ;;  %v5575_v39 = vld [vmem:[#allocation67_spill] sm:$0xff]  ;;  %v5576_v26 = vld [vmem:[#allocation69_spill] sm:$0xff] }
 0x4fa   :  { %2554 = vmatpush.bf16.msrb.mxu0 %v5547_v13  ;;  %2580 = vmatpush.bf16.msrb.mxu2 %v5548_v52  ;;  %v5577_v13 = vld [vmem:[#allocation64_spill] sm:$0xff]  ;;  %v5578_v52 = vld [vmem:[#allocation66_spill] sm:$0xff] }
 0x4fc   :  { %2566 = vmatpush.bf16.msrb.mxu1 %v5551_v30  ;;  %2592 = vmatpush.bf16.msrb.mxu3 %v5552_v28  ;;  %v5581_v30 = vld [vmem:[#allocation68_spill] sm:$0xff]  ;;  %v5582_v28 = vld [vmem:[#allocation70_spill] sm:$0xff] }
 0x4fe   :  { %2599 = vmatpush.bf16.msra.mxu0 %v5549_v49  ;;  %2625 = vmatpush.bf16.msra.mxu2 %v5550_v18  ;;  %v5579_v49 = vld [vmem:[#allocation71_spill] sm:$0xff]  ;;  %v5580_v18 = vld [vmem:[#allocation73_spill] sm:$0xff] }
 0x500   :  { %2567 = vmatpush.bf16.msrb.mxu1 %v5555_v38  ;;  %2593 = vmatpush.bf16.msrb.mxu3 %v5556_v35  ;;  %v5585_v35 = vld [vmem:[#allocation97_spill] sm:$0xff] }
 0x502   :  { %2600 = vmatpush.bf16.msra.mxu0 %v5553_v45  ;;  %2626 = vmatpush.bf16.msra.mxu2 %v5554_v47  ;;  %v5583_v45 = vld [vmem:[#allocation72_spill] sm:$0xff]  ;;  %v5584_v47 = vld [vmem:[#allocation74_spill] sm:$0xff] }
 0x504   :  { %2612 = vmatpush.bf16.msra.mxu1 %v5557_v4  ;;  %2638 = vmatpush.bf16.msra.mxu3 %v5558_v9  ;;  %v2270_v9 = vld [vmem:[#allocation4 + $0x120] sm:$0xff] }
 0x506   :  { %2601 = vmatpush.bf16.msra.mxu0 %v5559_v57  ;;  %2627 = vmatpush.bf16.msra.mxu2 %v5560_v29 }
 0x508   :  { %2613 = vmatpush.bf16.msra.mxu1 %v5561_v17  ;;  %2639 = vmatpush.bf16.msra.mxu3 %v5562_v22 }
 0x50a   :  { %2602 = vmatpush.bf16.msra.mxu0 %v5563_v6  ;;  %2628 = vmatpush.bf16.msra.mxu2 %v5564_v10 }
 0x50c   :  { %2614 = vmatpush.bf16.msra.mxu1 %v5565_v55  ;;  %2640 = vmatpush.bf16.msra.mxu3 %v5566_v60  ;;  %v5586_v55 = vld [vmem:[#allocation98_spill] sm:$0xff] }
 0x50e   :  { %2603 = vmatpush.bf16.msra.mxu0 %v5567_v46  ;;  %2629 = vmatpush.bf16.msra.mxu2 %v5568_v51  ;;  %v2271_v46 = vld [vmem:[#allocation4 + $0x128] sm:$0xff] }
 0x510   :  { %2615 = vmatpush.bf16.msra.mxu1 %v5569_v14  ;;  %2641 = vmatpush.bf16.msra.mxu3 %v5570_v24 }
 0x512   :  { %2604 = vmatpush.bf16.msra.mxu0 %v5571_v41  ;;  %2630 = vmatpush.bf16.msra.mxu2 %v5572_v36 }
 0x514   :  { %2616 = vmatpush.bf16.msra.mxu1 %v5573_v32  ;;  %2642 = vmatpush.bf16.msra.mxu3 %v5574_v63 }
 0x516   :  { %2605 = vmatpush.bf16.msra.mxu0 %v5575_v39  ;;  %2631 = vmatpush.bf16.msra.mxu2 %v5576_v26 }
 0x518   :  { %2617 = vmatpush.bf16.msra.mxu1 %v5577_v13  ;;  %2643 = vmatpush.bf16.msra.mxu3 %v5578_v52  ;;  %v5587_v52 = vld [vmem:[#allocation99_spill] sm:$0xff] }
 0x51a   :  { %2606 = vmatpush.bf16.msra.mxu0 %v5579_v49  ;;  %2632 = vmatpush.bf16.msra.mxu2 %v5580_v18  ;;  %v2272_v18 = vld [vmem:[#allocation4 + $0x130] sm:$0xff] }
 0x51c   :  { %2618 = vmatpush.bf16.msra.mxu1 %v5581_v30  ;;  %2644 = vmatpush.bf16.msra.mxu3 %v5582_v28 }
 0x520   :  { %2619 = vmatpush.bf16.msra.mxu1 %v5583_v45  ;;  %2645 = vmatpush.bf16.msra.mxu3 %v5584_v47 }
 0x53a   :  { %v2287_v38 = vpop.f32.mrf.mxu0 }
 0x53b   :  { %v2288_v4 = vadd.f32 %v2287_v38, %v5585_v35 }
 0x540   :  { %v2300_v57 = vpop.f32.mrf.mxu1  ;;  %v2313_v29 = vpop.f32.mrf.mxu2 }
 0x541   :  { %v2301_v17 = vadd.f32 %v2300_v57, %v2288_v4  ;;  %v2314_v60 = vadd.f32 %v2313_v29, %v5586_v55  ;;  %v5588_v29 = vld [vmem:[#allocation100_spill] sm:$0xff] }
 0x542   :  { %v2289_v22 = vpop.f32.mrf.mxu0 }
 0x543   :  { %v2434_v6 = vadd.f32 %v2301_v17, %v2270_v9 }
 0x545   :  { %v3243_v10 = vmul.f32 -1.442695, %v2434_v6  ;;  %v2273_v6 = vld [vmem:[#allocation4 + $0x138] sm:$0xff] }
 0x546   :  { %v2326_v51 = vpop.f32.mrf.mxu3 }
 0x547   :  { %3481 = vpow2.f32 %v3243_v10  ;;  %v2327_v14 = vadd.f32 %v2326_v51, %v2314_v60 }
 0x548   :  { %v2302_v24 = vpop.f32.mrf.mxu1  ;;  %v2315_v41 = vpop.f32.mrf.mxu2 }
 0x549   :  { %v2435_v36 = vadd.f32 %v2327_v14, %v2271_v46 }
 0x54a   :  { %v2339_v32 = vpop.f32.mrf.mxu0 }
 0x54b   :  { %v3244_v63 = vmul.f32 -1.442695, %v2435_v36  ;;  %v2340_v49 = vadd.f32 %v2339_v32, %v5587_v52 }
 0x54d   :  { %v3482_v39 = vpop.eup %3481  ;;  %3483 = vpow2.f32 %v3244_v63 }
 0x54e   :  { %v2442_v26 = vadd.f32 1.0, %v3482_v39  ;;  %v2328_v13 = vpop.f32.mrf.mxu3 }
 0x550   :  { %3485 = vrcp.f32 %v2442_v26  ;;  %v2352_v30 = vpop.f32.mrf.mxu1  ;;  %v2365_v28 = vpop.f32.mrf.mxu2  ;;  %vm2449_vm15 = vweird.f32 %v2442_v26 }
 0x551   :  { %v2353_v45 = vadd.f32 %v2352_v30, %v2340_v49  ;;  %v2366_v17 = vadd.f32 %v2365_v28, %v5588_v29 }
 0x552   :  { %v2341_v47 = vpop.f32.mrf.mxu0 }
 0x553   :  { %v3484_v38 = vpop.eup %3483  ;;  %v2474_v4 = vadd.f32 %v2353_v45, %v2272_v18  ;;  %v2455_v18 = vand.u32 2147483648, %v2442_v26  ;;  %v2453_v47 = vand.u32 2147483647, %v2442_v26 }
 0x554   :  { %v2443_v9 = vadd.f32 1.0, %v3484_v38  ;;  %v5589_v38 = vld [vmem:[#allocation101_spill] sm:$0xff] }
 0x555   :  { %v3245_v57 = vmul.f32 -1.442695, %v2474_v4  ;;  %vm2454_vm1 = vcmp.eq.f32.partialorder %v2453_v47, 8.507059e+37 }
 0x556   :  { %v3486_v22 = vpop.eup %3485  ;;  %3487 = vrcp.f32 %v2443_v9  ;;  %v2378_v10 = vpop.f32.mrf.mxu3  ;;  %vm2464_vm3 = vweird.f32 %v2443_v9 }
 0x557   :  { %3489 = vpow2.f32 %v3245_v57  ;;  %v2379_v60 = vadd.f32 %v2378_v10, %v2366_v17  ;;  %v2445_v46 = vmul.f32 %v3486_v22, %v2442_v26  ;;  %vm2450_vm14 = vweird.f32 %v3486_v22 }
 0x558   :  { %v2354_v51 = vpop.f32.mrf.mxu1  ;;  %v2367_v14 = vpop.f32.mrf.mxu2  ;;  %vm2451_vm0 = vmor %vm2449_vm15, %vm2450_vm14 }
 0x559   :  { %v2475_v24 = vadd.f32 %v2379_v60, %v2273_v6  ;;  %v2446_v41 = vsub.f32 1.0, %v2445_v46  ;;  %v2456_v46 = vor.u32 1.1754944e-38, %v2455_v18 }
 0x55a   :  { %v2391_v36 = vpop.f32.mrf.mxu0 }
 0x55b   :  { %v3246_v32 = vmul.f32 -1.442695, %v2475_v24  ;;  %v2447_v63 = vmul.f32 %v3486_v22, %v2446_v41  ;;  %v2392_v4 = vadd.f32 %v2391_v36, %v5589_v38  ;;  %v2468_v36 = vand.u32 2147483647, %v2443_v9 }
 0x55c   :  { %v3488_v39 = vpop.eup %3487 }
 0x55d   :  { %v3490_v13 = vpop.eup %3489  ;;  %3491 = vpow2.f32 %v3246_v32  ;;  %v2448_v49 = vadd.f32 %v3486_v22, %v2447_v63  ;;  %v2460_v30 = vmul.f32 %v3488_v39, %v2443_v9  ;;  %vm2465_vm2 = vweird.f32 %v3488_v39 }
 0x55e   :  { %v2482_v28 = vadd.f32 1.0, %v3490_v13  ;;  %v2380_v45 = vpop.f32.mrf.mxu3  ;;  %v2470_v63 = vand.u32 2147483648, %v2443_v9  ;;  %vm2466_vm4 = vmor %vm2464_vm3, %vm2465_vm2  ;;  %vm2469_vm5 = vcmp.eq.f32.partialorder %v2468_v36, 8.507059e+37 }
 0x55f   :  { %v2461_v57 = vsub.f32 1.0, %v2460_v30  ;;  %v2452_v6 = vsel %vm2451_vm0, %v3486_v22, %v2448_v49  ;;  %v2274_v45 = vld [vmem:[#allocation4 + $0x140] sm:$0xff]  ;;  %v5590_v30 = vld [vmem:[#allocation102_spill] sm:$0xff] }
 0x560   :  { %3493 = vrcp.f32 %v2482_v28  ;;  %v2404_v17 = vpop.f32.mrf.mxu1  ;;  %v2417_v10 = vpop.f32.mrf.mxu2  ;;  %v2457_v41 = vsel %vm2454_vm1, %v2456_v46, %v2452_v6  ;;  %vm2489_vm7 = vweird.f32 %v2482_v28 }
 0x561   :  { %v2405_v60 = vadd.f32 %v2404_v17, %v2392_v4  ;;  %v2462_v51 = vmul.f32 %v3488_v39, %v2461_v57  ;;  %v2418_v38 = vadd.f32 %v2417_v10, %v5590_v30  ;;  %v2471_v57 = vor.u32 1.1754944e-38, %v2470_v63  ;;  %v2275_v10 = vld [vmem:[#allocation4 + $0x148] sm:$0xff] }
 0x562   :  { %v2393_v14 = vpop.f32.mrf.mxu0 }
 0x563   :  { %v3492_v24 = vpop.eup %3491  ;;  %v2463_v32 = vadd.f32 %v3488_v39, %v2462_v51  ;;  %v2514_v26 = vmul.f32 %v2457_v41, %v2405_v60  ;;  %v2495_v60 = vand.u32 2147483648, %v2482_v28  ;;  %v2493_v41 = vand.u32 2147483647, %v2482_v28 }
 0x564   :  { %v2483_v13 = vadd.f32 1.0, %v3492_v24 }
 0x565   :  { %v2467_v18 = vsel %vm2466_vm4, %v3488_v39, %v2463_v32  ;;  %v2516_v17 = vadd.f32 %v2514_v26, %v2274_v45  ;;  %vm2494_vm9 = vcmp.eq.f32.partialorder %v2493_v41, 8.507059e+37 }
 0x566   :  { %v3494_v22 = vpop.eup %3493  ;;  %3495 = vrcp.f32 %v2483_v13  ;;  %v2430_v49 = vpop.f32.mrf.mxu3  ;;  %v2472_v14 = vsel %vm2469_vm5, %v2471_v57, %v2467_v18  ;;  %v2510_v45 = vand.u32 2147483648, %v2483_v13  ;;  %vm2504_vm11 = vweird.f32 %v2483_v13 }
 0x567   :  { %v2485_v4 = vmul.f32 %v3494_v22, %v2482_v28  ;;  %v2431_v47 = vadd.f32 %v2430_v49, %v2418_v38  ;;  %vm2490_vm6 = vweird.f32 %v3494_v22  ;;  %3497 = vtanh.f32 %v2516_v17 }
 0x568   :  { %v2406_v6 = vpop.f32.mrf.mxu1  ;;  %v2419_v46 = vpop.f32.mrf.mxu2  ;;  %vm2491_vm8 = vmor %vm2489_vm7, %vm2490_vm6  ;;  %v2496_v38 = vor.u32 1.1754944e-38, %v2495_v60 }
 0x569   :  { %v2486_v51 = vsub.f32 1.0, %v2485_v4  ;;  %v2515_v24 = vmul.f32 %v2472_v14, %v2431_v47  ;;  %v2508_v47 = vand.u32 2147483647, %v2483_v13  ;;  %v2534_v6 = vpop.permute.xlu0 %2533 }
 0x56a   :  { %vm2535_vm14 = vcmp.eq.s32.totalorder %v2534_v6, 1 }
 0x56b   :  { %v2487_v9 = vmul.f32 %v3494_v22, %v2486_v51  ;;  %v2517_v32 = vadd.f32 %v2515_v24, %v2275_v10  ;;  %v2511_v51 = vor.u32 1.1754944e-38, %v2510_v45  ;;  %vm2509_vm13 = vcmp.eq.f32.partialorder %v2508_v47, 8.507059e+37 }
 0x56c   :  { %v3496_v30 = vpop.eup %3495 }
 0x56d   :  { %v2500_v29 = vmul.f32 %v3496_v30, %v2483_v13  ;;  %v2488_v39 = vadd.f32 %v3494_v22, %v2487_v9  ;;  %vm2505_vm10 = vweird.f32 %v3496_v30  ;;  %v3498_v57 = vpop.eup %3497  ;;  %3499 = vtanh.f32 %v2517_v32 }
 0x56e   :  { %v2432_v63 = vpop.f32.mrf.mxu3  ;;  %vm2506_vm12 = vmor %vm2504_vm11, %vm2505_vm10 }
 0x56f   :  { %v2501_v26 = vsub.f32 1.0, %v2500_v29  ;;  %v2492_v36 = vsel %vm2491_vm8, %v3494_v22, %v2488_v39 }
 0x570   :  { %v2497_v49 = vsel %vm2494_vm9, %v2496_v38, %v2492_v36 }
 0x571   :  { %v2502_v18 = vmul.f32 %v3496_v30, %v2501_v26  ;;  %v2520_v4 = vsub.f32 1.0, %v2497_v49  ;;  %v2524_v17 = vmul.f32 %v2497_v49, %v4700_v8 }
 0x573   :  { %v2522_v28 = vmul.f32 %v3498_v57, %v2520_v4  ;;  %v2503_v46 = vadd.f32 %v3496_v30, %v2502_v18  ;;  %v3500_v9 = vpop.eup %3499 }
 0x575   :  { %v2526_v14 = vadd.f32 %v2524_v17, %v2522_v28  ;;  %v2507_v29 = vsel %vm2506_vm12, %v3496_v30, %v2503_v46 }
 0x576   :  { %v2512_v22 = vsel %vm2509_vm13, %v2511_v51, %v2507_v29  ;;  %v5592_v29 = vld [vmem:[#allocation101_spill] sm:$0xff] }
 0x577   :  { %v4814_v60 = vsel %vm2535_vm14, %v2526_v14, %v4700_v8  ;;  %v2521_v24 = vsub.f32 1.0, %v2512_v22  ;;  %v2525_v10 = vmul.f32 %v2512_v22, %v4708_v34 }
 0x578   :  { %v2545_v41 = vpack.c.bf16 %v4814_v60, %v4814_v60 }
 0x579   :  { %v2523_v13 = vmul.f32 %v3500_v9, %v2521_v24 }
 0x57a   :  { %2555 = vmatmul.bf16.vlgmr.msrb.gmra.mxu0 %v2545_v41  ;;  %2581 = vmatmul.bf16.vlgmr.msrb.gmra.mxu2 %v2545_v41 }
 0x57b   :  { %v2527_v39 = vadd.f32 %v2525_v10, %v2523_v13  ;;  %2651 = vmatpush.bf16.msrb.mxu0 %v5187_v40  ;;  %2677 = vmatpush.bf16.msrb.mxu2 %v5188_v15  ;;  %v2540_v40 = vld [vmem:[#allocation4 + $0x158] sm:$0xff] }
 0x57d   :  { %v4822_v30 = vsel %vm2535_vm14, %v2527_v39, %v4708_v34  ;;  %v5591_v34 = vld [vmem:[#allocation100_spill] sm:$0xff] }
 0x57e   :  { %v2546_v8 = vpack.c.bf16 %v4822_v30, %v4822_v30 }
 0x57f   :  { %2652 = vmatpush.bf16.msrb.mxu0 %v5189_v44  ;;  %2678 = vmatpush.bf16.msrb.mxu2 %v5190_v43 }
 0x580   :  { %2568 = vmatmul.bf16.vlgmr.msrb.gmra.mxu1 %v2546_v8  ;;  %2594 = vmatmul.bf16.vlgmr.msrb.gmra.mxu3 %v2546_v8 }
 0x581   :  { %2664 = vmatpush.bf16.msrb.mxu1 %v5191_v33  ;;  %2690 = vmatpush.bf16.msrb.mxu3 %v5192_v21 }
 0x583   :  { %2653 = vmatpush.bf16.msrb.mxu0 %v5193_v53  ;;  %2679 = vmatpush.bf16.msrb.mxu2 %v5194_v19 }
 0x585   :  { %2665 = vmatpush.bf16.msrb.mxu1 %v5195_v56  ;;  %2691 = vmatpush.bf16.msrb.mxu3 %v5196_v7 }
 0x587   :  { %2654 = vmatpush.bf16.msrb.mxu0 %v5197_v1  ;;  %2680 = vmatpush.bf16.msrb.mxu2 %v3910_v54 }
 0x589   :  { %2666 = vmatpush.bf16.msrb.mxu1 %v5198_v23  ;;  %2692 = vmatpush.bf16.msrb.mxu3 %v5199_v61  ;;  %v2541_v61 = vld [vmem:[#allocation4 + $0x160] sm:$0xff] }
 0x58a   :  { %2607 = vmatmul.bf16.vlgmr.msra.gmra.mxu0 %v2545_v41  ;;  %2633 = vmatmul.bf16.vlgmr.msra.gmra.mxu2 %v2545_v41 }
 0x58b   :  { %2655 = vmatpush.bf16.msrb.mxu0 %v5200_v0  ;;  %2681 = vmatpush.bf16.msrb.mxu2 %v3924_v48  ;;  %v2539_v48 = vld [vmem:[#allocation4 + $0x150] sm:$0xff] }
 0x58d   :  { %2667 = vmatpush.bf16.msrb.mxu1 %v5201_v2  ;;  %2693 = vmatpush.bf16.msrb.mxu3 %v5202_v25 }
 0x58f   :  { %2656 = vmatpush.bf16.msrb.mxu0 %v5203_v37  ;;  %2682 = vmatpush.bf16.msrb.mxu2 %v3936_v3 }
 0x590   :  { %2620 = vmatmul.bf16.vlgmr.msra.gmra.mxu1 %v2546_v8  ;;  %2646 = vmatmul.bf16.vlgmr.msra.gmra.mxu3 %v2546_v8 }
 0x591   :  { %2668 = vmatpush.bf16.msrb.mxu1 %v5204_v50  ;;  %2694 = vmatpush.bf16.msrb.mxu3 %v5205_v12 }
 0x593   :  { %2657 = vmatpush.bf16.msrb.mxu0 %v3943_v42  ;;  %2683 = vmatpush.bf16.msrb.mxu2 %v3950_v5 }
 0x595   :  { %2669 = vmatpush.bf16.msrb.mxu1 %v5206_v62  ;;  %2695 = vmatpush.bf16.msrb.mxu3 %v3940_v20 }
 0x597   :  { %2658 = vmatpush.bf16.msrb.mxu0 %v3956_v31  ;;  %2684 = vmatpush.bf16.msrb.mxu2 %v3962_v27 }
 0x599   :  { %2670 = vmatpush.bf16.msrb.mxu1 %v3948_v16  ;;  %2696 = vmatpush.bf16.msrb.mxu3 %v3953_v11 }
 0x59a   :  { %2659 = vmatmul.bf16.vlgmr.msrb.gmra.mxu0 %v2545_v41  ;;  %2685 = vmatmul.bf16.vlgmr.msrb.gmra.mxu2 %v2545_v41 }
 0x59d   :  { %2671 = vmatpush.bf16.msrb.mxu1 %v5456_v59  ;;  %2697 = vmatpush.bf16.msrb.mxu3 %v5524_v58 }
 0x5a0   :  { %2672 = vmatmul.bf16.vlgmr.msrb.gmra.mxu1 %v2546_v8  ;;  %2698 = vmatmul.bf16.vlgmr.msrb.gmra.mxu3 %v2546_v8 }
 0x5f7   :  { %v2556_v54 = vpop.f32.mrf.mxu0 }
 0x5f8   :  { %v2557_v42 = vadd.f32 %v2556_v54, %v5585_v35 }
 0x5fd   :  { %v2569_v3 = vpop.f32.mrf.mxu1  ;;  %v2582_v31 = vpop.f32.mrf.mxu2 }
 0x5fe   :  { %v2570_v20 = vadd.f32 %v2569_v3, %v2557_v42  ;;  %v2583_v11 = vadd.f32 %v2582_v31, %v5586_v55  ;;  %v2542_v55 = vld [vmem:[#allocation4 + $0x168] sm:$0xff] }
 0x5ff   :  { %v2558_v5 = vpop.f32.mrf.mxu0 }
 0x600   :  { %v2703_v27 = vadd.f32 %v2570_v20, %v2539_v48 }
 0x602   :  { %v3248_v16 = vmul.f32 -1.442695, %v2703_v27 }
 0x603   :  { %v2595_v15 = vpop.f32.mrf.mxu3 }
 0x604   :  { %3501 = vpow2.f32 %v3248_v16  ;;  %v2596_v44 = vadd.f32 %v2595_v15, %v2583_v11  ;;  %v2543_v16 = vld [vmem:[#allocation4 + $0x170] sm:$0xff]  ;;  %v5593_v11 = vld [vmem:[#allocation102_spill] sm:$0xff] }
 0x605   :  { %v2571_v43 = vpop.f32.mrf.mxu1  ;;  %v2584_v33 = vpop.f32.mrf.mxu2 }
 0x606   :  { %v2704_v21 = vadd.f32 %v2596_v44, %v2540_v40 }
 0x607   :  { %v2608_v53 = vpop.f32.mrf.mxu0 }
 0x608   :  { %v3249_v19 = vmul.f32 -1.442695, %v2704_v21  ;;  %v2609_v23 = vadd.f32 %v2608_v53, %v5587_v52 }
 0x60a   :  { %v3502_v56 = vpop.eup %3501  ;;  %3503 = vpow2.f32 %v3249_v19 }
 0x60b   :  { %v2711_v7 = vadd.f32 1.0, %v3502_v56  ;;  %v2597_v1 = vpop.f32.mrf.mxu3 }
 0x60d   :  { %3505 = vrcp.f32 %v2711_v7  ;;  %v2621_v0 = vpop.f32.mrf.mxu1  ;;  %v2634_v2 = vpop.f32.mrf.mxu2  ;;  %v2724_v28 = vand.u32 2147483648, %v2711_v7  ;;  %vm2718_vm0 = vweird.f32 %v2711_v7  ;;  %v2722_v14 = vand.u32 2147483647, %v2711_v7 }
 0x60e   :  { %v2622_v25 = vadd.f32 %v2621_v0, %v2609_v23  ;;  %v2635_v58 = vadd.f32 %v2634_v2, %v5591_v34 }
 0x60f   :  { %v2610_v37 = vpop.f32.mrf.mxu0  ;;  %v2725_v39 = vor.u32 1.1754944e-38, %v2724_v28  ;;  %vm2723_vm2 = vcmp.eq.f32.partialorder %v2722_v14, 8.507059e+37 }
 0x610   :  { %v3504_v50 = vpop.eup %3503  ;;  %v2743_v12 = vadd.f32 %v2622_v25, %v2541_v61  ;;  %v2544_v37 = vld [vmem:[#allocation4 + $0x178] sm:$0xff] }
 0x611   :  { %v2712_v62 = vadd.f32 1.0, %v3504_v50 }
 0x612   :  { %v3250_v59 = vmul.f32 -1.442695, %v2743_v12 }
 0x613   :  { %v3506_v35 = vpop.eup %3505  ;;  %3507 = vrcp.f32 %v2712_v62  ;;  %v2647_v38 = vpop.f32.mrf.mxu3  ;;  %v2739_v31 = vand.u32 2147483648, %v2712_v62  ;;  %vm2733_vm4 = vweird.f32 %v2712_v62  ;;  %v2737_v27 = vand.u32 2147483647, %v2712_v62 }
 0x614   :  { %3509 = vpow2.f32 %v3250_v59  ;;  %v2648_v32 = vadd.f32 %v2647_v38, %v2635_v58  ;;  %v2714_v63 = vmul.f32 %v3506_v35, %v2711_v7  ;;  %vm2719_vm15 = vweird.f32 %v3506_v35 }
 0x615   :  { %v2623_v52 = vpop.f32.mrf.mxu1  ;;  %v2636_v26 = vpop.f32.mrf.mxu2  ;;  %vm2720_vm1 = vmor %vm2718_vm0, %vm2719_vm15  ;;  %v2740_v53 = vor.u32 1.1754944e-38, %v2739_v31  ;;  %vm2738_vm6 = vcmp.eq.f32.partialorder %v2737_v27, 8.507059e+37 }
 0x616   :  { %v2744_v36 = vadd.f32 %v2648_v32, %v2542_v55  ;;  %v2715_v45 = vsub.f32 1.0, %v2714_v63 }
 0x617   :  { %v2660_v49 = vpop.f32.mrf.mxu0 }
 0x618   :  { %v3251_v18 = vmul.f32 -1.442695, %v2744_v36  ;;  %v2716_v4 = vmul.f32 %v3506_v35, %v2715_v45  ;;  %v2661_v22 = vadd.f32 %v2660_v49, %v5592_v29  ;;  %v2803_v45 = vpop.permute.xlu1 %2802 }
 0x619   :  { %v3508_v47 = vpop.eup %3507  ;;  %vm2804_vm15 = vcmp.eq.s32.totalorder %v2803_v45, 1 }
 0x61a   :  { %v3510_v57 = vpop.eup %3509  ;;  %3511 = vpow2.f32 %v3251_v18  ;;  %v2717_v6 = vadd.f32 %v3506_v35, %v2716_v4  ;;  %v2729_v17 = vmul.f32 %v3508_v47, %v2712_v62  ;;  %vm2734_vm3 = vweird.f32 %v3508_v47 }
 0x61b   :  { %v2751_v46 = vadd.f32 1.0, %v3510_v57  ;;  %v2649_v51 = vpop.f32.mrf.mxu3  ;;  %vm2735_vm5 = vmor %vm2733_vm4, %vm2734_vm3 }
 0x61c   :  { %v2730_v24 = vsub.f32 1.0, %v2729_v17  ;;  %v2721_v41 = vsel %vm2720_vm1, %v3506_v35, %v2717_v6 }
 0x61d   :  { %3513 = vrcp.f32 %v2751_v46  ;;  %v2673_v9 = vpop.f32.mrf.mxu1  ;;  %v2686_v13 = vpop.f32.mrf.mxu2  ;;  %v2726_v48 = vsel %vm2723_vm2, %v2725_v39, %v2721_v41  ;;  %v2764_v61 = vand.u32 2147483648, %v2751_v46  ;;  %v2762_v25 = vand.u32 2147483647, %v2751_v46 }
 0x61e   :  { %v2674_v10 = vadd.f32 %v2673_v9, %v2661_v22  ;;  %v2731_v8 = vmul.f32 %v3508_v47, %v2730_v24  ;;  %v2687_v40 = vadd.f32 %v2686_v13, %v5593_v11  ;;  %vm2758_vm8 = vweird.f32 %v2751_v46 }
 0x61f   :  { %v2662_v54 = vpop.f32.mrf.mxu0  ;;  %v2765_v59 = vor.u32 1.1754944e-38, %v2764_v61  ;;  %vm2763_vm10 = vcmp.eq.f32.partialorder %v2762_v25, 8.507059e+37 }
 0x620   :  { %v3512_v42 = vpop.eup %3511  ;;  %v2732_v3 = vadd.f32 %v3508_v47, %v2731_v8  ;;  %v2783_v5 = vmul.f32 %v2726_v48, %v2674_v10 }
 0x621   :  { %v2752_v20 = vadd.f32 1.0, %v3512_v42 }
 0x622   :  { %v2736_v43 = vsel %vm2735_vm5, %v3508_v47, %v2732_v3  ;;  %v2785_v19 = vadd.f32 %v2783_v5, %v2543_v16 }
 0x623   :  { %v3514_v15 = vpop.eup %3513  ;;  %3515 = vrcp.f32 %v2752_v20  ;;  %v2699_v44 = vpop.f32.mrf.mxu3  ;;  %v2741_v23 = vsel %vm2738_vm6, %v2740_v53, %v2736_v43  ;;  %v2779_v38 = vand.u32 2147483648, %v2752_v20  ;;  %v2777_v26 = vand.u32 2147483647, %v2752_v20 }
 0x624   :  { %v2754_v33 = vmul.f32 %v3514_v15, %v2751_v46  ;;  %v2700_v21 = vadd.f32 %v2699_v44, %v2687_v40  ;;  %vm2759_vm7 = vweird.f32 %v3514_v15  ;;  %3517 = vtanh.f32 %v2785_v19 }
 0x625   :  { %v2675_v56 = vpop.f32.mrf.mxu1  ;;  %v2688_v7 = vpop.f32.mrf.mxu2  ;;  %vm2760_vm9 = vmor %vm2758_vm8, %vm2759_vm7  ;;  %vm2773_vm12 = vweird.f32 %v2752_v20  ;;  %v2780_v47 = vor.u32 1.1754944e-38, %v2779_v38  ;;  %vm2778_vm14 = vcmp.eq.f32.partialorder %v2777_v26, 8.507059e+37 }
 0x626   :  { %v2755_v1 = vsub.f32 1.0, %v2754_v33  ;;  %v2784_v0 = vmul.f32 %v2741_v23, %v2700_v21 }
 0x628   :  { %v2756_v2 = vmul.f32 %v3514_v15, %v2755_v1  ;;  %v2786_v34 = vadd.f32 %v2784_v0, %v2544_v37 }
 0x629   :  { %v3516_v50 = vpop.eup %3515 }
 0x62a   :  { %v2769_v12 = vmul.f32 %v3516_v50, %v2752_v20  ;;  %v2757_v62 = vadd.f32 %v3514_v15, %v2756_v2  ;;  %vm2774_vm11 = vweird.f32 %v3516_v50  ;;  %v3518_v36 = vpop.eup %3517  ;;  %3519 = vtanh.f32 %v2786_v34 }
 0x62b   :  { %v2701_v58 = vpop.f32.mrf.mxu3  ;;  %vm2775_vm13 = vmor %vm2773_vm12, %vm2774_vm11 }
 0x62c   :  { %v2770_v35 = vsub.f32 1.0, %v2769_v12  ;;  %v2761_v55 = vsel %vm2760_vm9, %v3514_v15, %v2757_v62 }
 0x62d   :  { %v2766_v32 = vsel %vm2763_vm10, %v2765_v59, %v2761_v55 }
 0x62e   :  { %v2771_v63 = vmul.f32 %v3516_v50, %v2770_v35  ;;  %v2789_v52 = vsub.f32 1.0, %v2766_v32  ;;  %v2793_v18 = vmul.f32 %v2766_v32, %v4814_v60 }
 0x630   :  { %v2791_v49 = vmul.f32 %v3518_v36, %v2789_v52  ;;  %v2772_v4 = vadd.f32 %v3516_v50, %v2771_v63  ;;  %v3520_v51 = vpop.eup %3519 }
 0x632   :  { %v2795_v57 = vadd.f32 %v2793_v18, %v2791_v49  ;;  %v2776_v6 = vsel %vm2775_vm13, %v3516_v50, %v2772_v4 }
 0x633   :  { %v2781_v28 = vsel %vm2778_vm14, %v2780_v47, %v2776_v6 }
 0x634   :  { %v2805_v17 = vsel %vm2804_vm15, %v2795_v57, %v4814_v60  ;;  %v2790_v46 = vsub.f32 1.0, %v2781_v28  ;;  %v2794_v29 = vmul.f32 %v2781_v28, %v4822_v30 }
 0x635   :  { %2807 = vst [vmem:[#allocation9] sm:$0xff] %v2805_v17 }
 0x636   :  { %v2792_v14 = vmul.f32 %v3520_v51, %v2790_v46 }
 0x638   :  { %v2796_v22 = vadd.f32 %v2794_v29, %v2792_v14 }
 0x63a   :  { %v2806_v24 = vsel %vm2804_vm15, %v2796_v22, %v4822_v30 }
 0x63b   :  { %2808 = vst [vmem:[#allocation9 + $0x8] sm:$0xff] %v2806_v24 }
 0x63c PF:  { %s2816_s14 = sshll.u32 %s4874_s5, 4  ;;  %s3609_s15 = smov [#allocation9]   ;;  %s2817_s14 = int_to_ptr.hbm [resolvable:$true] %s2816_s14 }
 0x63d   :  { %s2814_s16 = sshll.u32 %s3609_s15, 4  ;;  %s2815_s16 = int_to_ptr.vmem [resolvable:$true] %s2814_s16 }
 0x63e   :  { %2819 = dma.vmem_to_hbm [thread:$0]  %s2815_s16, 256, %s2817_s14, [#allocation6]  }
 0x63f   :  { %3599 = dma.done.wait [#allocation6], 256  }
 0x640   :  { %3600 = vsyncadd [#allocation6], 4294967040 }
 0x641   :  { %2824 = vsyncpa [#allocation5], 1 }
 0x642   :  { %2825 = vsyncpa [#allocation8], 1 }
 0x643   :  { %2826 = vsyncpa [#allocation6], 1 }

</bundles_post_ra>
